<compile_context>
chip_gen: v6e
topology: v6e:2x2x1
jax: 0.10.0
libtpu: 0.0.40
codegen_flags: <defaults>
</compile_context>

<pallas_src>
import jax
import jax.numpy as jnp
from jax.experimental import pallas as pl
from jax.experimental.pallas import tpu as pltpu


def ffn_kernel(x_ref, w1_ref, b1_ref, w2_ref, b2_ref, o_ref):
    # x_ref:  (tm, D)  f32 (cast to bf16 on the fly for the MXU)
    # w1_ref: (D, tf)  bf16    b1_ref: (1, tf) f32
    # w2_ref: (tf, D)  bf16    b2_ref: (1, D)  f32
    # o_ref:  (tm, D)  f32  -- resident across k, doubles as the accumulator.
    k = pl.program_id(1)

    @pl.when(k == 0)
    def _init():
        # Fold the second bias into the output/accumulator initialization.
        o_ref[...] = jnp.broadcast_to(b2_ref[...], o_ref.shape)

    # First linear (bf16 inputs, f32 accumulate) + bias + ReLU on this F-chunk.
    h = jnp.dot(x_ref[...].astype(w1_ref.dtype), w1_ref[...],
                preferred_element_type=jnp.float32)
    h = jnp.maximum(h + b1_ref[...], 0.0)
    # Dropout(p=0.1): identity in eval mode.

    # Second linear: accumulate this F-chunk's contribution into the output.
    o_ref[...] += jnp.dot(h.astype(w2_ref.dtype), w2_ref[...],
                          preferred_element_type=jnp.float32)


def _round_up(n, m):
    return ((n + m - 1) // m) * m


def _cdiv(a, b):
    return (a + b - 1) // b


def _vmem_capacity_bytes():
    try:
        return int(pltpu.get_tpu_info().vmem_capacity_bytes)
    except Exception:
        return 64 << 20  # conservative fallback: v7x per-TensorCore VMEM


def _plan(M, D, F, w_itemsize):
    """Pick (tm, tf, F_pad, w_buffers, vmem_limit) from the per-chip VMEM size."""
    cap = _vmem_capacity_bytes()
    budget = min(int(cap * 0.8), cap - (8 << 20))  # leave compiler headroom

    # --- inner-dim tiling --------------------------------------------------
    weight_bytes = 2 * D * F * w_itemsize
    resident = weight_bytes <= budget // 3
    if resident:
        # Constant W1/W2/b1 block indices over the whole grid -> weights are
        # DMA'd once and stay VMEM-resident across the entire row sweep.
        tf, F_pad = F, F
    else:
        tf = next((c for c in (512, 384, 256, 128) if F % c == 0), None)
        if tf is None:
            tf = 256  # awkward F: zero-pad to a streamable, 128-aligned tile
        F_pad = _round_up(F, tf)

    # Deeper weight buffering only when streaming and VMEM is plentiful
    # (v5e/v6e 128 MiB parts); keep the default depth of 2 on v7x.
    w_buffers = 3 if (not resident and budget > (96 << 20)) else 2

    # --- row tiling ----------------------------------------------------------
    def footprint(tm):
        return (2 * tm * D * 4                               # x blocks (f32)
                + w_buffers * 2 * D * tf * w_itemsize        # W1 + W2 blocks
                + 2 * (tf + D) * 4                           # bias blocks
                + 2 * tm * D * 4                             # output blocks (f32)
                + tm * tf * 4)                               # intermediate h

    tm = 128
    for cand in (1024, 768, 512, 384, 256, 128):
        if footprint(cand) <= budget:
            tm = cand
            break

    # Clamp to the real row count; keep >= 2 row tiles when possible so the
    # "parallel" axis can actually shard across v7x's two TensorCores.
    tm = max(8, min(tm, _round_up(M, 8)))
    if M >= 16 and _cdiv(M, tm) < 2:
        tm = _round_up(_cdiv(M, 2), 8)

    # Real footprint + margin; never below the compiler default, never above
    # the per-generation budget (so v7x keeps headroom, v5e/v6e can go >64 MiB).
    vmem_limit = int(min(max(footprint(tm) + (4 << 20), min(32 << 20, budget)),
                         budget))
    return tm, tf, F_pad, w_buffers, vmem_limit


def position_wise_ffn(x, w1, b1, w2, b2, *, compute_dtype=jnp.bfloat16):
    """relu(x @ w1 + b1) @ w2 + b2  (Dropout in eval mode == identity).

    x: (B, S, D) f32.  w1: (D, F), w2: (F, D) -- pass them already in
    `compute_dtype` (bf16) so no per-call cast is needed.  b1: (1, F), b2: (1, D).
    Matmuls are bf16-in / f32-accumulate (not bit-exact vs f32 PyTorch Linear).
    """
    B, S, D = x.shape
    F = w1.shape[1]
    M = B * S

    tm, tf, F_pad, w_buffers, vmem_limit = _plan(
        M, D, F, jnp.dtype(compute_dtype).itemsize)
    M_pad = _round_up(M, tm)
    n_k = F_pad // tf

    # One-time parameter conditioning (no-op if already pre-cast / pre-shaped).
    w1c = w1 if w1.dtype == compute_dtype else w1.astype(compute_dtype)
    w2c = w2 if w2.dtype == compute_dtype else w2.astype(compute_dtype)
    b1f = jnp.reshape(b1, (1, F)).astype(jnp.float32)
    b2f = jnp.reshape(b2, (1, D)).astype(jnp.float32)
    if F_pad != F:
        w1c = jnp.pad(w1c, ((0, 0), (0, F_pad - F)))
        b1f = jnp.pad(b1f, ((0, 0), (0, F_pad - F)))
        w2c = jnp.pad(w2c, ((0, F_pad - F), (0, 0)))

    # x stays f32 (cast to bf16 inside the kernel); reshape is free, only the
    # row remainder (if any) is padded.
    x2 = x.reshape(M, D)
    if M_pad != M:
        x2 = jnp.pad(x2, ((0, M_pad - M), (0, 0)))

    if w_buffers != 2:
        w1_spec = pl.BlockSpec((D, tf), lambda i, k: (0, k),
                               pipeline_mode=pl.Buffered(w_buffers))
        w2_spec = pl.BlockSpec((tf, D), lambda i, k: (k, 0),
                               pipeline_mode=pl.Buffered(w_buffers))
    else:
        w1_spec = pl.BlockSpec((D, tf), lambda i, k: (0, k))
        w2_spec = pl.BlockSpec((tf, D), lambda i, k: (k, 0))

    out = pl.pallas_call(
        ffn_kernel,
        out_shape=jax.ShapeDtypeStruct((M_pad, D), jnp.float32),
        grid_spec=pltpu.PrefetchScalarGridSpec(
            num_scalar_prefetch=0,
            grid=(M_pad // tm, n_k),          # rows (parallel), F chunks (reduction)
            in_specs=[
                pl.BlockSpec((tm, D), lambda i, k: (i, 0)),   # x rows (held over k)
                w1_spec,                                      # W1 chunk
                pl.BlockSpec((1, tf), lambda i, k: (0, k)),   # b1 chunk
                w2_spec,                                      # W2 chunk
                pl.BlockSpec((1, D), lambda i, k: (0, 0)),    # b2 (constant)
            ],
            out_specs=pl.BlockSpec((tm, D), lambda i, k: (i, 0)),
        ),
        compiler_params=pltpu.CompilerParams(
            dimension_semantics=("parallel", "arbitrary"),
            vmem_limit_bytes=vmem_limit),
    )(x2, w1c, b1f, w2c, b2f)

    if M_pad != M:
        out = out[:M]
    return out.reshape(B, S, D).astype(x.dtype)


def init_linear_params(key, fan_in, fan_out):
    """Mimic torch.nn.Linear default init: U(-1/sqrt(fan_in), 1/sqrt(fan_in))."""
    kw, kb = jax.random.split(key)
    bound = 1.0 / jnp.sqrt(fan_in)
    # Stored already transposed for y = x @ W + b  (W: (fan_in, fan_out)).
    w = jax.random.uniform(kw, (fan_in, fan_out), jnp.float32, -bound, bound)
    b = jax.random.uniform(kb, (1, fan_out), jnp.float32, -bound, bound)
    return w, b


if __name__ == "__main__":
    # Small shapes consistent with the module: d_model=512, seq=10, inner=4*d.
    # M = 40 rows exercises the padded-remainder + >=2-row-tile path.
    B, S, D, F = 4, 10, 512, 2048

    key = jax.random.PRNGKey(0)
    kx, k1, k2 = jax.random.split(key, 3)

    x = jax.random.uniform(kx, (B, S, D), jnp.float32)
    w1, b1 = init_linear_params(k1, D, F)
    w2, b2 = init_linear_params(k2, F, D)

    # Pre-cast the weights to the MXU compute dtype once (parameter setup) so
    # the wrapper does not re-cast them on every call.
    w1_c = w1.astype(jnp.bfloat16)
    w2_c = w2.astype(jnp.bfloat16)

    out = position_wise_ffn(x, w1_c, b1, w2_c, b2)
    out = jax.block_until_ready(out)

    # Pure-JAX f32 reference (eval-mode dropout == identity). Loose tolerance
    # because the kernel computes the matmuls with bf16 inputs / f32 accumulate.
    ref = jnp.maximum(x.reshape(-1, D) @ w1 + b1, 0.0) @ w2 + b2
    ref = ref.reshape(B, S, D)

    assert out.shape == (B, S, D)
    assert jnp.allclose(out, ref, atol=2e-2, rtol=2e-2), (
        float(jnp.max(jnp.abs(out - ref))))

    print("KERNEL_OK")
</pallas_src>

<mosaic_0001>
module attributes {stable_mosaic.version = 11 : i64} {
  func.func @ffn_kernel(%arg0: i32, %arg1: i32, %arg2: memref<24x512xf32, #tpu.memory_space<vmem>>, %arg3: memref<512x2048xbf16, #tpu.memory_space<vmem>>, %arg4: memref<1x2048xf32, #tpu.memory_space<vmem>>, %arg5: memref<2048x512xbf16, #tpu.memory_space<vmem>>, %arg6: memref<1x512xf32, #tpu.memory_space<vmem>>, %arg7: memref<24x512xf32, #tpu.memory_space<vmem>>) attributes {dimension_semantics = [#tpu.dimension_semantics<parallel>, #tpu.dimension_semantics<arbitrary>], iteration_bounds = array<i64: 2, 1>, scalar_prefetch = 0 : i64, scratch_operands = 0 : i64, tpu.core_type = #tpu.core_type<tc>, window_params = [{transform_indices = @transform_0, window_bounds = array<i64: 24, 512>}, {transform_indices = @transform_1, window_bounds = array<i64: 512, 2048>}, {transform_indices = @transform_2, window_bounds = array<i64: 1, 2048>}, {transform_indices = @transform_3, window_bounds = array<i64: 2048, 512>}, {pipeline_mode = #tpu.pipeline_mode<synchronous>, transform_indices = @transform_4, window_bounds = array<i64: 1, 512>}, {transform_indices = @transform_5, window_bounds = array<i64: 24, 512>}]} {
    %c0_i32 = arith.constant 0 : i32
    %0 = arith.cmpi eq, %arg1, %c0_i32 : i32
    %1 = arith.extui %0 : i1 to i32
    %c0_i32_0 = arith.constant 0 : i32
    %2 = arith.cmpi ne, %1, %c0_i32_0 : i32
    scf.if %2 {
      %c0_14 = arith.constant 0 : index
      %c0_15 = arith.constant 0 : index
      %18 = vector.load %arg6[%c0_14, %c0_15] : memref<1x512xf32, #tpu.memory_space<vmem>>, vector<1x512xf32>
      %19 = vector.shape_cast %18 : vector<1x512xf32> to vector<1x512xf32>
      %20 = vector.broadcast %19 : vector<1x512xf32> to vector<24x512xf32>
      %c0_16 = arith.constant 0 : index
      %c0_17 = arith.constant 0 : index
      %21 = vector.load %arg7[%c0_16, %c0_17] : memref<24x512xf32, #tpu.memory_space<vmem>>, vector<24x512xf32>
      tpu.vector_store %arg7[%c0_16, %c0_17], %20 {strides = array<i32>} : memref<24x512xf32, #tpu.memory_space<vmem>>, vector<24x512xf32>,
    } else {
    }
    %c0 = arith.constant 0 : index
    %c0_1 = arith.constant 0 : index
    %3 = vector.load %arg2[%c0, %c0_1] : memref<24x512xf32, #tpu.memory_space<vmem>>, vector<24x512xf32>
    %4 = arith.truncf %3 : vector<24x512xf32> to vector<24x512xbf16>
    %c0_2 = arith.constant 0 : index
    %c0_3 = arith.constant 0 : index
    %5 = vector.load %arg3[%c0_2, %c0_3] : memref<512x2048xbf16, #tpu.memory_space<vmem>>, vector<512x2048xbf16>
    %cst = arith.constant dense<0.000000e+00> : vector<24x2048xf32>
    %6 = tpu.matmul %4, %5, %cst {dimension_numbers = #tpu.dot_dimension_numbers<[1], [0], [0], [1], [0, 0, 1, 1], [], []>} : vector<24x512xbf16>, vector<512x2048xbf16>, vector<24x2048xf32> -> vector<24x2048xf32>
    %c0_4 = arith.constant 0 : index
    %c0_5 = arith.constant 0 : index
    %7 = vector.load %arg4[%c0_4, %c0_5] : memref<1x2048xf32, #tpu.memory_space<vmem>>, vector<1x2048xf32>
    %8 = vector.broadcast %7 : vector<1x2048xf32> to vector<24x2048xf32>
    %9 = arith.addf %6, %8 : vector<24x2048xf32>
    %cst_6 = arith.constant 0.000000e+00 : f32
    %10 = vector.broadcast %cst_6 : f32 to vector<24x2048xf32>
    %11 = arith.maximumf %9, %10 : vector<24x2048xf32>
    %c0_7 = arith.constant 0 : index
    %c0_8 = arith.constant 0 : index
    %12 = vector.load %arg7[%c0_7, %c0_8] : memref<24x512xf32, #tpu.memory_space<vmem>>, vector<24x512xf32>
    %13 = arith.truncf %11 : vector<24x2048xf32> to vector<24x2048xbf16>
    %c0_9 = arith.constant 0 : index
    %c0_10 = arith.constant 0 : index
    %14 = vector.load %arg5[%c0_9, %c0_10] : memref<2048x512xbf16, #tpu.memory_space<vmem>>, vector<2048x512xbf16>
    %cst_11 = arith.constant dense<0.000000e+00> : vector<24x512xf32>
    %15 = tpu.matmul %13, %14, %cst_11 {dimension_numbers = #tpu.dot_dimension_numbers<[1], [0], [0], [1], [0, 0, 1, 1], [], []>} : vector<24x2048xbf16>, vector<2048x512xbf16>, vector<24x512xf32> -> vector<24x512xf32>
    %16 = arith.addf %12, %15 : vector<24x512xf32>
    %c0_12 = arith.constant 0 : index
    %c0_13 = arith.constant 0 : index
    %17 = vector.load %arg7[%c0_12, %c0_13] : memref<24x512xf32, #tpu.memory_space<vmem>>, vector<24x512xf32>
    tpu.vector_store %arg7[%c0_12, %c0_13], %16 {strides = array<i32>} : memref<24x512xf32, #tpu.memory_space<vmem>>, vector<24x512xf32>,
    return
  }
  func.func @transform_0(%arg0: i32, %arg1: i32) -> (i32, i32) {
    %c0_i32 = arith.constant 0 : i32
    %c0_i32_0 = arith.constant 0 : i32
    return %arg0, %c0_i32 : i32, i32
  }
  func.func @transform_1(%arg0: i32, %arg1: i32) -> (i32, i32) {
    %c0_i32 = arith.constant 0 : i32
    %c0_i32_0 = arith.constant 0 : i32
    return %c0_i32, %arg1 : i32, i32
  }
  func.func @transform_2(%arg0: i32, %arg1: i32) -> (i32, i32) {
    %c0_i32 = arith.constant 0 : i32
    %c0_i32_0 = arith.constant 0 : i32
    return %c0_i32, %arg1 : i32, i32
  }
  func.func @transform_3(%arg0: i32, %arg1: i32) -> (i32, i32) {
    %c0_i32 = arith.constant 0 : i32
    %c0_i32_0 = arith.constant 0 : i32
    return %arg1, %c0_i32 : i32, i32
  }
  func.func @transform_4(%arg0: i32, %arg1: i32) -> (i32, i32) {
    %c0_i32 = arith.constant 0 : i32
    %c0_i32_0 = arith.constant 0 : i32
    %c0_i32_1 = arith.constant 0 : i32
    return %c0_i32, %c0_i32_0 : i32, i32
  }
  func.func @transform_5(%arg0: i32, %arg1: i32) -> (i32, i32) {
    %c0_i32 = arith.constant 0 : i32
    %c0_i32_0 = arith.constant 0 : i32
    return %arg0, %c0_i32 : i32, i32
  }
}

</mosaic_0001>

<bundles_post_ra>
// kernel: tpu_custom_call.1
= control target key start
LH: loop header
LB: loop body
LE: loop exit
PB: predicated region body
PF: predicated region fallthrough
CT: control target
= control target key end

     0   :  { %s11469_s0 = inlined_call_operand.hbm [shape: f32[48,512], index: 0, kind: input, shape index: {}]   ;;  %s11470_s1 = inlined_call_operand.hbm [shape: bf16[512,2048], index: 1, kind: input, shape index: {}]   ;;  %s11471_s2 = inlined_call_operand.hbm [shape: f32[1,2048], index: 2, kind: input, shape index: {}]   ;;  %s11472_s3 = inlined_call_operand.hbm [shape: bf16[2048,512], index: 3, kind: input, shape index: {}]   ;;  %s11473_s4 = inlined_call_operand.hbm [shape: f32[1,512], index: 4, kind: input, shape index: {}]   ;;  %s11474_s5 = inlined_call_operand.hbm [shape: f32[48,512], index: 5, kind: output, shape index: {}]  }
   0x1   :  { %11482 = sst [smem:[#allocation16_spill]] %s11470_s1 }
   0x2   :  { %11483 = sst [smem:[#allocation17_spill]] %s11471_s2 }
   0x3   :  { %10 = vsyncpa [#allocation3], 0 }
   0x4   :  { %12 = vsyncpa [#allocation3 + $0x1], 0 }
   0x5   :  { %13 = vsyncpa [#allocation6], 0 }
   0x6   :  { %14 = vsyncpa [#allocation9], 0 }
   0x7   :  { %15 = vsyncpa [#allocation4], 0 }
   0x8   :  { %17 = vsyncpa [#allocation4 + $0x1], 0  ;;  %s10712_s18 = smov 0   ;;  %s10714_s19 = smov 0  }
   0x9   :  { %s10716_s20 = smov 0   ;;  %s10718_s21 = smov 0  }
   0xa   :  { %s10720_s22 = smov 0   ;;  %s10722_s23 = smov 0  }
   0xb LB: > { %s8514_s24 = sadd.s32 4294967295, %s10666_s23   ;;  %s8515_s25 = sadd.s32 4294967294, %s10666_s23   ;;  %s10666_s23 = sphi %s10722_s23, %s23_s23   ;;  %s10662_s22 = sphi %s10720_s22, %s11507_s22   ;;  %s10658_s21 = sphi %s10718_s21, %s11506_s21   ;;  %s10654_s20 = sphi %s10716_s20, %s11505_s20   ;;  %s10650_s19 = sphi %s10714_s19, %s11504_s19   ;;  %s10646_s18 = sphi %s10712_s18, %s11503_s18  }
   0xc   : > { %p55_p0 = scmp.ne.s32.totalorder %s10650_s19, %s10646_s18  ;;  %p10746_p1 = scmp.eq.s32.totalorder %s8514_s24, 0 }
   0xd   : > { %p10750_p2 = scmp.eq.s32.totalorder %s8514_s24, 1  ;;  %p184_p3 = scmp.eq.s32.totalorder %s8515_s25, 1 }
   0xe   : > { %s11484_s26 = scalar_select %p10746_p1, 1, 0 }
   0xf   : > { %s11485_s27 = scalar_select %p10750_p2, 1, 0 }
  0x10   : > { %p10756_p4 = por %p10746_p1, %p55_p0  ;;  %p8516_p5 = scmp.ge.s32.totalorder %s10666_s23, 1 }
  0x11   : > { %p10761_p6 = por %p184_p3, %p55_p0  ;;  %p191_p7 = scmp.lt.s32.totalorder %s10666_s23, 3 }
  0x12   : > { %s11486_s28 = scalar_select %p10756_p4, 1, 0 }
  0x13   : > { %s11487_s29 = scalar_select %p10761_p6, 1, 0 }
  0x14   : > { %p10766_p8 = pnand %p8516_p5, %p191_p7  ;;  %s10668_s6 = smov [#allocation5]  }
  0x15   : > { %s206_s7 = sshll.u32 %s10668_s6, 4  ;;  %s10669_s9 = smov [#allocation8]   ;;  %s207_s7 = int_to_ptr.vmem [resolvable:$true] %s206_s7 }
  0x16   : > { %s11488_s30 = scalar_select %p10766_p8, 1, 0 }
  0x17   : > { %p9585_p9 = pneg %p10766_p8  ;;  %s237_s10 = sshll.u32 %s10669_s9, 4  ;;  %s238_s10 = int_to_ptr.vmem [resolvable:$true] %s237_s10 }
  0x18   : > { %s10457_s11 = scalar_lea.vmem %s207_s7, 65536  ;;  %p10465_p5 = scmp.lt.s32.totalorder %s207_s7, %s207_s7 }
  0x19   : > { %p10775_p11 = pnand %p9585_p9, %p10746_p1  ;;  %p10458_p13 = scmp.ne.s32.totalorder %s207_s7, %s10457_s11 }
  0x1a   : > { %p10466_p7 = scmp.lt.s32.totalorder %s10457_s11, %s10457_s11 }
  0x1b   : > { %p10448_p12 = pneg %p10775_p11 }
  0x1c   : > { %p10467_p10 = por %p10466_p7, %p10465_p5 }
  0x1d   : > { %p10460_p0 = pnand %p10458_p13, %p10448_p12 }
  0x1f   : > { %p10461_p3 = pneg %p10460_p0 }
  0x21   : > { %p10468_p9 = pnand %p10467_p10, %p10461_p3 }
  0x23   : > { %10471 = shalt.err (!%p10468_p9)
}
  0x24   : > { %s10670_s12 = smov 1024   ;;  %s10671_s13 = smov 64  }
  0x25   : > { %s11490_s1 = sld [smem:[#allocation16_spill]]  ;;  %s10483_s16 = scalar_lea.vmem %s238_s10, 65536 }
  0x26   : > { %p10484_p6 = scmp.ne.s32.totalorder %s238_s10, %s10483_s16  ;;  %p10491_p1 = scmp.lt.s32.totalorder %s238_s10, %s238_s10 }
  0x27   : > { %p10492_p4 = scmp.lt.s32.totalorder %s10483_s16, %s10483_s16 }
  0x28   : > { %p10486_p13 = pnand %p10484_p6, %p10448_p12 }
  0x29   : > { %p10493_p5 = por %p10492_p4, %p10491_p1 }
  0x2a   : > { %p10487_p0 = pneg %p10486_p13 }
  0x2b   : > { %9588 = dma.hbm_to_vmem [thread:$0]  (!%p10775_p11), %s11490_s1, 65536, %s207_s7, [#allocation6], %s10670_s12, %s10670_s12, %s10671_s13  }
  0x2c   : > { %p10494_p10 = pnand %p10493_p5, %p10487_p0 }
  0x2e   : > { %10497 = shalt.err (!%p10494_p10)
}
  0x2f   : > { %s10672_s17 = smov 256   ;;  %s10673_s24 = smov 16  }
  0x30   : > { %9594 = dma.hbm_to_vmem [thread:$0]  (!%p10775_p11), %s11472_s3, 65536, %s238_s10, [#allocation9], %s10672_s17, %s10672_s17, %s10673_s24  }
  0x31   : > { %s10674_s7 = smov [#allocation7]   ;;  %s10675_s11 = smov [#allocation10]  }
  0x32   : > { %s223_s9 = sshll.u32 %s10674_s7, 4  ;;  %s251_s12 = sshll.u32 %s10675_s11, 4  ;;  %s224_s9 = int_to_ptr.vmem [resolvable:$true] %s223_s9  ;;  %s252_s12 = int_to_ptr.vmem [resolvable:$true] %s251_s12 }
  0x33   : > { %s10509_s13 = scalar_lea.vmem %s224_s9, 256  ;;  %p10517_p3 = scmp.lt.s32.totalorder %s224_s9, %s224_s9 }
  0x34   : > { %p10510_p6 = scmp.ne.s32.totalorder %s224_s9, %s10509_s13  ;;  %p10518_p7 = scmp.lt.s32.totalorder %s10509_s13, %s10509_s13 }
  0x36   : > { %p10512_p1 = pnand %p10510_p6, %p10448_p12  ;;  %p10519_p9 = por %p10518_p7, %p10517_p3 }
  0x38   : > { %p10513_p4 = pneg %p10512_p1 }
  0x3a   : > { %p10520_p13 = pnand %p10519_p9, %p10513_p4 }
  0x3c   : > { %10523 = shalt.err (!%p10520_p13)
}
  0x3d   : > { %s11491_s2 = sld [smem:[#allocation17_spill]]  ;;  %s10535_s15 = scalar_lea.vmem %s252_s12, 64 }
  0x3e   : > { %p10536_p0 = scmp.ne.s32.totalorder %s252_s12, %s10535_s15  ;;  %p10543_p6 = scmp.lt.s32.totalorder %s252_s12, %s252_s12 }
  0x3f   : > { %p10544_p1 = scmp.lt.s32.totalorder %s10535_s15, %s10535_s15 }
  0x40   : > { %p10538_p5 = pnand %p10536_p0, %p10448_p12 }
  0x41   : > { %p10545_p8 = por %p10544_p1, %p10543_p6 }
  0x42   : > { %p10539_p10 = pneg %p10538_p5 }
  0x43   : > { %9591 = dma.hbm_to_vmem [thread:$0]  (!%p10775_p11), %s11491_s2, 256, %s224_s9, [#allocation6]  }
  0x44   : > { %p10546_p2 = pnand %p10545_p8, %p10539_p10 }
  0x46   : > { %10549 = shalt.err (!%p10546_p2)
}
  0x47   : > { %9597 = dma.hbm_to_vmem [thread:$0]  (!%p10775_p11), %s11473_s4, 64, %s252_s12, [#allocation9]  }
  0x48   : > { %s35_s24 = sadd.s32 1, %s10662_s22  ;;  %s42_s25 = sadd.s32 1, %s10654_s20 }
  0x49   : > { %p37_p2 = scmp.ge.s32.totalorder %s35_s24, 2  ;;  %p49_p8 = scmp.ne.s32.totalorder %s10654_s20, %s10650_s19 }
  0x4a   : > { %p50_p12 = scmp.eq.s32.totalorder %s10666_s23, 0  ;;  %p9610_p4 = scmp.lt.s32.totalorder %s10666_s23, 2 }
  0x4b   : > { %s11509_s24 = smov (%p37_p2, %s35_s24), 0  ;;  %p11492_p7 = scmp.ne.s32.totalorder %s11485_s27, 0 }
  0x4c   : > { %p51_p3 = por %p50_p12, %p49_p8  ;;  %s39_s6 = ssub.s32 %s10662_s22, %s11509_s24 }
  0x4d   : > { %p10823_p9 = por %p11492_p7, %p49_p8  ;;  %s262_s7 = sand.u32 1, %s10654_s20  }
  0x4e   : > { %p40_p13 = scmp.eq.s32.totalorder %s39_s6, 0  ;;  %s9563_s9 = smul.u32 96, %s262_s7 }
  0x4f   : > { %p10830_p11 = pnand %p9610_p4, %p51_p3  ;;  %s9561_s13 = smul.u32 1536, %s10662_s22 }
  0x50   : > { %s10835_s12 = scalar_select %p40_p13, %s10654_s20, %s42_s25  }
  0x51   : > { %s266_s10 = scalar_lea.vmem [#allocation2], %s9563_s9  ;;  %s273_s16 = scalar_lea.hbm %s11469_s0, %s9561_s13 }
  0x52   : > { %s274_s14 = sshll.u32 %s266_s10, 4  ;;  %s263_s17 = scalar_lea.sflag [#allocation3], %s262_s7  ;;  %s275_s14 = int_to_ptr.vmem [resolvable:$true] %s274_s14 }
  0x53   : > { %p10552_p0 = pneg %p10830_p11  ;;  %s10563_s6 = scalar_lea.vmem %s275_s14, 1536 }
  0x54   : > { %p10564_p5 = scmp.ne.s32.totalorder %s275_s14, %s10563_s6  ;;  %s10676_s1 = smov [#allocation2]  }
  0x55   : > { %s10568_s2 = sshll.u32 %s10676_s1, 4  ;;  %s10569_s2 = int_to_ptr.vmem [resolvable:$false] %s10568_s2 }
  0x56   : > { %p10566_p10 = pnand %p10564_p5, %p10552_p0  ;;  %s10570_s25 = scalar_lea.vmem %s10569_s2, 3072 }
  0x57   : > { %p10571_p1 = scmp.lt.s32.totalorder %s275_s14, %s10569_s2  ;;  %p10572_p2 = scmp.lt.s32.totalorder %s10570_s25, %s10563_s6 }
  0x58   : > { %p10567_p6 = pneg %p10566_p10 }
  0x59   : > { %p10573_p8 = por %p10572_p2, %p10571_p1 }
  0x5b   : > { %p10574_p12 = pnand %p10573_p8, %p10567_p6 }
  0x5d   : > { %10577 = shalt.err (!%p10574_p12)
}
  0x5e   : > { %s10677_s9 = smov 512   ;;  %s10678_s13 = smov 32  }
  0x5f   : > { %9601 = dma.hbm_to_vmem [thread:$0]  (!%p10830_p11), %s273_s16, 1536, %s275_s14, %s263_s17, %s10677_s9, %s10677_s9, %s10678_s13  }
  0x60   : > { %p11495_p4 = scmp.ne.s32.totalorder %s11488_s30, 0 }
  0x61   : > { %s10848_s7 = sand.u32 (!%p11495_p4), 1, %s10650_s19   ;;  %p11496_p3 = scmp.ne.s32.totalorder (!%p11495_p4), %s11486_s28, 0 }
  0x62   : > { %286 = sbr.rel (%p11495_p4) target bundleno = 1361 (0x551), region = 40  ;;  %s289_s2 = scalar_lea.sflag (!%p11495_p4), [#allocation3], %s10848_s7 }
  0x63   : > { %s9564_s1 = smul.u32 (!%p11495_p4), 96, %s10848_s7 }
  0x65   : > { %s10854_s10 = scalar_lea.vmem (!%p11495_p4), [#allocation2], %s9564_s1 }
  0x67   : > { %10629 = dma.done.wait (%p11496_p3), %s289_s2, 1536  }
  0x68   : > { %10631 = vsyncadd (%p11496_p3), %s289_s2, 4294965760  ;;  %p11497_p7 = scmp.ne.s32.totalorder %s11484_s26, 0 }
  0x6a   : > { %10633 = dma.done.wait (%p11497_p7), [#allocation6], 65792  }
  0x6b   : > { %10635 = vsyncadd (%p11497_p7), [#allocation6], 4294901504 }
  0x6c   : > { %10637 = dma.done.wait (%p11497_p7), [#allocation9], 65600  }
  0x6d   : > { %10639 = vsyncadd (%p11497_p7), [#allocation9], 4294901696  ;;  %v510_v0 = vld [vmem:[#allocation5 + $0x380] sm:$0xff]  ;;  %v379_v54 = vld [vmem:[%s10854_s10 + $0x8] sm:$0xff]  ;;  %s11380_s26 = scalar_lea.vmem [#allocation11], %s9564_s1  ;;  %s9562_s28 = smul.u32 1536, %s10658_s21 }
  0x6e   : > { %v518_v1 = vld [vmem:[#allocation5 + $0x3c0] sm:$0xff]  ;;  %v383_v55 = vld [vmem:[%s10854_s10 + $0x28] sm:$0xff]  ;;  %v381_v59 = vld [vmem:[%s10854_s10 + $0x18] sm:$0xff]  ;;  %s8389_s30 = sshll.u32 %s11380_s26, 4  ;;  %s8375_s21 = scalar_lea.sflag [#allocation4], %s10848_s7  ;;  %s11419_s30 = int_to_ptr.vmem [resolvable:$true] %s8389_s30 }
  0x6f   : > { %v766_v2 = vld [vmem:[#allocation5 + $0xb80] sm:$0xff]  ;;  %v8642_v3 = vcombine.high %v510_v0, %v518_v1  ;;  %v8641_v5 = vcombine.low %v510_v0, %v518_v1  ;;  %v10870_v58 = vpack.c.bf16 %v383_v55, %v379_v54  ;;  %v385_v60 = vld [vmem:[%s10854_s10 + $0x38] sm:$0xff]  ;;  %s11417_s15 = scalar_lea.hbm %s11474_s5, %s9562_s28  ;;  %s10578_s27 = scalar_lea.vmem %s11419_s30, 1536 }
  0x70   : > { %v774_v4 = vld [vmem:[#allocation5 + $0xbc0] sm:$0xff]  ;;  %v10874_v63 = vpack.c.bf16 %v385_v60, %v381_v59  ;;  %p10579_p13 = scmp.ne.s32.totalorder %s11419_s30, %s10578_s27  ;;  %s10679_s16 = smov [#allocation11]  }
  0x71   : > { %v494_v6 = vld [vmem:[#allocation5 + $0x300] sm:$0xff]  ;;  %v8898_v8 = vcombine.high %v766_v2, %v774_v4  ;;  %v8897_v9 = vcombine.low %v766_v2, %v774_v4  ;;  %3554 = vmatprep.subr.bf16.mxu0 %v8642_v3  ;;  %3586 = vmatprep.mubr.bf16.mxu0 %v10870_v58  ;;  %s10582_s17 = sshll.u32 %s10679_s16, 4  ;;  %s10583_s17 = int_to_ptr.vmem [resolvable:$false] %s10582_s17 }
  0x72   : > { %v502_v7 = vld [vmem:[#allocation5 + $0x340] sm:$0xff]  ;;  %3555 = vmatpush1.bf16.msra.mxu0 %v8641_v5  ;;  %3637 = vmatprep.mubr.bf16.mxu1 %v10874_v63  ;;  %p10580_p11 = pnand %p10579_p13, %p10823_p9  ;;  %s10584_s6 = scalar_lea.vmem %s10583_s17, 3072 }
  0x73   : > { %v8626_v10 = vcombine.high %v494_v6, %v502_v7  ;;  %v750_v11 = vld [vmem:[#allocation5 + $0xb00] sm:$0xff]  ;;  %3605 = vmatprep.subr.bf16.mxu1 %v8898_v8  ;;  %v8625_v18 = vcombine.low %v494_v6, %v502_v7  ;;  %p10585_p5 = scmp.lt.s32.totalorder %s11419_s30, %s10583_s17  ;;  %p10586_p10 = scmp.lt.s32.totalorder %s10584_s6, %s10578_s27 }
  0x74   : > { %v758_v12 = vld [vmem:[#allocation5 + $0xb40] sm:$0xff]  ;;  %3606 = vmatpush1.bf16.msra.mxu1 %v8897_v9  ;;  %p10581_p0 = pneg %p10580_p11 }
  0x75   : > { %v478_v13 = vld [vmem:[#allocation5 + $0x280] sm:$0xff]  ;;  %v8882_v14 = vcombine.high %v750_v11, %v758_v12  ;;  %3556 = vmatprep.subr.bf16.mxu0 %v8626_v10  ;;  %v8881_v19 = vcombine.low %v750_v11, %v758_v12  ;;  %p10587_p6 = por %p10586_p10, %p10585_p5 }
  0x76   : > { %v486_v15 = vld [vmem:[#allocation5 + $0x2c0] sm:$0xff]  ;;  %3557 = vmatpush1.bf16.msra.mxu0 %v8625_v18 }
  0x77   : > { %v734_v16 = vld [vmem:[#allocation5 + $0xa80] sm:$0xff]  ;;  %v8610_v20 = vcombine.high %v478_v13, %v486_v15  ;;  %3607 = vmatprep.subr.bf16.mxu1 %v8882_v14  ;;  %v8609_v26 = vcombine.low %v478_v13, %v486_v15  ;;  %p10588_p1 = pnand %p10587_p6, %p10581_p0 }
  0x78   : > { %v742_v17 = vld [vmem:[#allocation5 + $0xac0] sm:$0xff]  ;;  %3608 = vmatpush1.bf16.msra.mxu1 %v8881_v19 }
  0x79   : > { %v8866_v21 = vcombine.high %v734_v16, %v742_v17  ;;  %v462_v22 = vld [vmem:[#allocation5 + $0x200] sm:$0xff]  ;;  %3558 = vmatprep.subr.bf16.mxu0 %v8610_v20  ;;  %v8865_v27 = vcombine.low %v734_v16, %v742_v17 }
  0x7a   : > { %v470_v23 = vld [vmem:[#allocation5 + $0x240] sm:$0xff]  ;;  %3559 = vmatpush1.bf16.msra.mxu0 %v8609_v26 }
  0x7b   : > { %v718_v24 = vld [vmem:[#allocation5 + $0xa00] sm:$0xff]  ;;  %v8594_v28 = vcombine.high %v462_v22, %v470_v23  ;;  %3609 = vmatprep.subr.bf16.mxu1 %v8866_v21  ;;  %v8593_v34 = vcombine.low %v462_v22, %v470_v23 }
  0x7c   : > { %v726_v25 = vld [vmem:[#allocation5 + $0xa40] sm:$0xff]  ;;  %3610 = vmatpush1.bf16.msra.mxu1 %v8865_v27 }
  0x7d   : > { %v8850_v29 = vcombine.high %v718_v24, %v726_v25  ;;  %v446_v30 = vld [vmem:[#allocation5 + $0x180] sm:$0xff]  ;;  %3560 = vmatprep.subr.bf16.mxu0 %v8594_v28  ;;  %v8849_v35 = vcombine.low %v718_v24, %v726_v25 }
  0x7e   : > { %v454_v31 = vld [vmem:[#allocation5 + $0x1c0] sm:$0xff]  ;;  %3561 = vmatpush1.bf16.msra.mxu0 %v8593_v34 }
  0x7f   : > { %v702_v32 = vld [vmem:[#allocation5 + $0x980] sm:$0xff]  ;;  %v8578_v36 = vcombine.high %v446_v30, %v454_v31  ;;  %3611 = vmatprep.subr.bf16.mxu1 %v8850_v29  ;;  %v8577_v42 = vcombine.low %v446_v30, %v454_v31 }
  0x80   : > { %v710_v33 = vld [vmem:[#allocation5 + $0x9c0] sm:$0xff]  ;;  %3612 = vmatpush1.bf16.msra.mxu1 %v8849_v35 }
  0x81   : > { %v8834_v37 = vcombine.high %v702_v32, %v710_v33  ;;  %v430_v38 = vld [vmem:[#allocation5 + $0x100] sm:$0xff]  ;;  %3562 = vmatprep.subr.bf16.mxu0 %v8578_v36  ;;  %v8833_v43 = vcombine.low %v702_v32, %v710_v33 }
  0x82   : > { %v438_v39 = vld [vmem:[#allocation5 + $0x140] sm:$0xff]  ;;  %3563 = vmatpush1.bf16.msra.mxu0 %v8577_v42 }
  0x83   : > { %v686_v40 = vld [vmem:[#allocation5 + $0x900] sm:$0xff]  ;;  %v8562_v44 = vcombine.high %v430_v38, %v438_v39  ;;  %3613 = vmatprep.subr.bf16.mxu1 %v8834_v37  ;;  %v8561_v50 = vcombine.low %v430_v38, %v438_v39 }
  0x84   : > { %v694_v41 = vld [vmem:[#allocation5 + $0x940] sm:$0xff]  ;;  %3614 = vmatpush1.bf16.msra.mxu1 %v8833_v43 }
  0x85   : > { %v8818_v45 = vcombine.high %v686_v40, %v694_v41  ;;  %v414_v46 = vld [vmem:[#allocation5 + $0x80] sm:$0xff]  ;;  %3564 = vmatprep.subr.bf16.mxu0 %v8562_v44  ;;  %v8817_v51 = vcombine.low %v686_v40, %v694_v41 }
  0x86   : > { %v422_v47 = vld [vmem:[#allocation5 + $0xc0] sm:$0xff]  ;;  %3565 = vmatpush1.bf16.msra.mxu0 %v8561_v50 }
  0x87   : > { %v670_v48 = vld [vmem:[#allocation5 + $0x880] sm:$0xff]  ;;  %v8546_v52 = vcombine.high %v414_v46, %v422_v47  ;;  %3615 = vmatprep.subr.bf16.mxu1 %v8818_v45  ;;  %v8545_v0 = vcombine.low %v414_v46, %v422_v47 }
  0x88   : > { %v678_v49 = vld [vmem:[#allocation5 + $0x8c0] sm:$0xff]  ;;  %3616 = vmatpush1.bf16.msra.mxu1 %v8817_v51 }
  0x89   : > { %v398_v53 = vld [vmem:[#allocation5] sm:$0xff]  ;;  %v8802_v56 = vcombine.high %v670_v48, %v678_v49  ;;  %3566 = vmatprep.subr.bf16.mxu0 %v8546_v52  ;;  %v8801_v1 = vcombine.low %v670_v48, %v678_v49 }
  0x8a   : > { %v406_v57 = vld [vmem:[#allocation5 + $0x40] sm:$0xff]  ;;  %3567 = vmatpush1.bf16.msra.mxu0 %v8545_v0 }
  0x8b   : > { %v654_v61 = vld [vmem:[#allocation5 + $0x800] sm:$0xff]  ;;  %v8530_v2 = vcombine.high %v398_v53, %v406_v57  ;;  %3617 = vmatprep.subr.bf16.mxu1 %v8802_v56  ;;  %v8529_v8 = vcombine.low %v398_v53, %v406_v57 }
  0x8c   : > { %v662_v62 = vld [vmem:[#allocation5 + $0x840] sm:$0xff]  ;;  %3618 = vmatpush1.bf16.msra.mxu1 %v8801_v1 }
  0x8d   : > { %v8786_v3 = vcombine.high %v654_v61, %v662_v62  ;;  %v638_v4 = vld [vmem:[#allocation5 + $0x780] sm:$0xff]  ;;  %3568 = vmatprep.subr.bf16.mxu0 %v8530_v2  ;;  %v8785_v9 = vcombine.low %v654_v61, %v662_v62 }
  0x8e   : > { %v646_v5 = vld [vmem:[#allocation5 + $0x7c0] sm:$0xff]  ;;  %3569 = vmatpush1.bf16.msra.mxu0 %v8529_v8  ;;  %v767_v8 = vld [vmem:[#allocation5 + $0xb88] sm:$0xff] }
  0x8f   : > { %v894_v6 = vld [vmem:[#allocation5 + $0xf80] sm:$0xff]  ;;  %v8770_v10 = vcombine.high %v638_v4, %v646_v5  ;;  %3619 = vmatprep.subr.bf16.mxu1 %v8786_v3  ;;  %v8769_v16 = vcombine.low %v638_v4, %v646_v5 }
  0x90   : > { %v902_v7 = vld [vmem:[#allocation5 + $0xfc0] sm:$0xff]  ;;  %3620 = vmatpush1.bf16.msra.mxu1 %v8785_v9  ;;  %v775_v9 = vld [vmem:[#allocation5 + $0xbc8] sm:$0xff] }
  0x91   : > { %v9026_v11 = vcombine.high %v894_v6, %v902_v7  ;;  %v622_v12 = vld [vmem:[#allocation5 + $0x700] sm:$0xff]  ;;  %3570 = vmatprep.subr.bf16.mxu0 %v8770_v10  ;;  %v9025_v17 = vcombine.low %v894_v6, %v902_v7  ;;  %v511_v6 = vld [vmem:[#allocation5 + $0x388] sm:$0xff] }
  0x92   : > { %v630_v13 = vld [vmem:[#allocation5 + $0x740] sm:$0xff]  ;;  %3571 = vmatpush2.bf16.msra.mxu0 %v8769_v16  ;;  %v519_v7 = vld [vmem:[#allocation5 + $0x3c8] sm:$0xff] }
  0x93   : > { %v878_v14 = vld [vmem:[#allocation5 + $0xf00] sm:$0xff]  ;;  %v8754_v18 = vcombine.high %v622_v12, %v630_v13  ;;  %3621 = vmatprep.subr.bf16.mxu1 %v9026_v11  ;;  %v8753_v24 = vcombine.low %v622_v12, %v630_v13  ;;  %v8644_v16 = vcombine.high %v511_v6, %v519_v7 }
  0x94   : > { %v886_v15 = vld [vmem:[#allocation5 + $0xf40] sm:$0xff]  ;;  %3622 = vmatpush2.bf16.msra.mxu1 %v9025_v17  ;;  %v8900_v17 = vcombine.high %v767_v8, %v775_v9 }
  0x95   : > { %v9010_v19 = vcombine.high %v878_v14, %v886_v15  ;;  %v606_v20 = vld [vmem:[#allocation5 + $0x680] sm:$0xff]  ;;  %3572 = vmatprep.subr.bf16.mxu0 %v8754_v18  ;;  %v9009_v25 = vcombine.low %v878_v14, %v886_v15  ;;  %v380_v14 = vld [vmem:[%s10854_s10 + $0x10] sm:$0xff]  ;;  %v495_v18 = vld [vmem:[#allocation5 + $0x308] sm:$0xff] }
  0x96   : > { %v614_v21 = vld [vmem:[#allocation5 + $0x6c0] sm:$0xff]  ;;  %3573 = vmatpush2.bf16.msra.mxu0 %v8753_v24  ;;  %v384_v15 = vld [vmem:[%s10854_s10 + $0x30] sm:$0xff] }
  0x97   : > { %v862_v22 = vld [vmem:[#allocation5 + $0xe80] sm:$0xff]  ;;  %v8738_v26 = vcombine.high %v606_v20, %v614_v21  ;;  %3623 = vmatprep.subr.bf16.mxu1 %v9010_v19  ;;  %v8737_v32 = vcombine.low %v606_v20, %v614_v21  ;;  %v503_v19 = vld [vmem:[#allocation5 + $0x348] sm:$0xff]  ;;  %v10885_v24 = vpack.c.bf16 %v384_v15, %v380_v14 }
  0x98   : > { %v870_v23 = vld [vmem:[#allocation5 + $0xec0] sm:$0xff]  ;;  %3624 = vmatpush2.bf16.msra.mxu1 %v9009_v25  ;;  %v751_v21 = vld [vmem:[#allocation5 + $0xb08] sm:$0xff]  ;;  %v8643_v25 = vcombine.low %v511_v6, %v519_v7 }
  0x99   : > { %v8994_v27 = vcombine.high %v862_v22, %v870_v23  ;;  %v590_v28 = vld [vmem:[#allocation5 + $0x600] sm:$0xff]  ;;  %3574 = vmatprep.subr.bf16.mxu0 %v8738_v26  ;;  %v8993_v33 = vcombine.low %v862_v22, %v870_v23  ;;  %v759_v22 = vld [vmem:[#allocation5 + $0xb48] sm:$0xff]  ;;  %v389_v26 = vld [vmem:[%s10854_s10 + $0x58] sm:$0xff] }
  0x9a   : > { %v598_v29 = vld [vmem:[#allocation5 + $0x640] sm:$0xff]  ;;  %3575 = vmatpush2.bf16.msra.mxu0 %v8737_v32  ;;  %v387_v23 = vld [vmem:[%s10854_s10 + $0x48] sm:$0xff] }
  0x9b   : > { %v846_v30 = vld [vmem:[#allocation5 + $0xe00] sm:$0xff]  ;;  %v8722_v34 = vcombine.high %v590_v28, %v598_v29  ;;  %3625 = vmatprep.subr.bf16.mxu1 %v8994_v27  ;;  %v8721_v40 = vcombine.low %v590_v28, %v598_v29  ;;  %v8899_v27 = vcombine.low %v767_v8, %v775_v9  ;;  %v8628_v28 = vcombine.high %v495_v18, %v503_v19  ;;  %v423_v6 = vld [vmem:[#allocation5 + $0xc8] sm:$0xff] }
  0x9c   : > { %v854_v31 = vld [vmem:[#allocation5 + $0xe40] sm:$0xff]  ;;  %3626 = vmatpush2.bf16.msra.mxu1 %v8993_v33  ;;  %v8884_v29 = vcombine.high %v751_v21, %v759_v22  ;;  %v10888_v32 = vpack.c.bf16 %v387_v23, %v387_v23  ;;  %v735_v33 = vld [vmem:[#allocation5 + $0xa88] sm:$0xff] }
  0x9d   : > { %v8978_v35 = vcombine.high %v846_v30, %v854_v31  ;;  %v574_v36 = vld [vmem:[#allocation5 + $0x580] sm:$0xff]  ;;  %3576 = vmatprep.subr.bf16.mxu0 %v8722_v34  ;;  %v8977_v41 = vcombine.low %v846_v30, %v854_v31  ;;  %v479_v30 = vld [vmem:[#allocation5 + $0x288] sm:$0xff] }
  0x9e   : > { %v582_v37 = vld [vmem:[#allocation5 + $0x5c0] sm:$0xff]  ;;  %3577 = vmatpush2.bf16.msra.mxu0 %v8721_v40  ;;  %v487_v31 = vld [vmem:[#allocation5 + $0x2c8] sm:$0xff] }
  0x9f   : > { %v830_v38 = vld [vmem:[#allocation5 + $0xd80] sm:$0xff]  ;;  %v8706_v42 = vcombine.high %v574_v36, %v582_v37  ;;  %3627 = vmatprep.subr.bf16.mxu1 %v8978_v35  ;;  %v8705_v48 = vcombine.low %v574_v36, %v582_v37  ;;  %v743_v34 = vld [vmem:[#allocation5 + $0xac8] sm:$0xff]  ;;  %v10891_v35 = vpack.c.bf16 %v389_v26, %v389_v26  ;;  %v8627_v36 = vcombine.low %v495_v18, %v503_v19 }
  0xa0   : > { %v838_v39 = vld [vmem:[#allocation5 + $0xdc0] sm:$0xff]  ;;  %3628 = vmatpush2.bf16.msra.mxu1 %v8977_v41  ;;  %v463_v40 = vld [vmem:[#allocation5 + $0x208] sm:$0xff] }
  0xa1   : > { %v8962_v43 = vcombine.high %v830_v38, %v838_v39  ;;  %v558_v44 = vld [vmem:[#allocation5 + $0x500] sm:$0xff]  ;;  %3578 = vmatprep.subr.bf16.mxu0 %v8706_v42  ;;  %v8961_v49 = vcombine.low %v830_v38, %v838_v39  ;;  %v8883_v38 = vcombine.low %v751_v21, %v759_v22  ;;  %v8612_v39 = vcombine.high %v479_v30, %v487_v31  ;;  %v471_v41 = vld [vmem:[#allocation5 + $0x248] sm:$0xff]  ;;  %v388_v42 = vld [vmem:[%s10854_s10 + $0x50] sm:$0xff] }
  0xa2   : > { %v566_v45 = vld [vmem:[#allocation5 + $0x540] sm:$0xff]  ;;  %3579 = vmatpush2.bf16.msra.mxu0 %v8705_v48  ;;  %v10900_v48 = vpack.c.bf16 %v388_v42, %v388_v42  ;;  %v671_v7 = vld [vmem:[#allocation5 + $0x888] sm:$0xff] }
  0xa3   : > { %v814_v46 = vld [vmem:[#allocation5 + $0xd00] sm:$0xff]  ;;  %v8690_v50 = vcombine.high %v558_v44, %v566_v45  ;;  %3629 = vmatprep.subr.bf16.mxu1 %v8962_v43  ;;  %v8689_v56 = vcombine.low %v558_v44, %v566_v45  ;;  %v8868_v43 = vcombine.high %v735_v33, %v743_v34  ;;  %v719_v44 = vld [vmem:[#allocation5 + $0xa08] sm:$0xff] }
  0xa4   : > { %v822_v47 = vld [vmem:[#allocation5 + $0xd40] sm:$0xff]  ;;  %3630 = vmatpush2.bf16.msra.mxu1 %v8961_v49  ;;  %v727_v45 = vld [vmem:[#allocation5 + $0xa48] sm:$0xff]  ;;  %v8867_v49 = vcombine.low %v735_v33, %v743_v34 }
  0xa5   : > { %v8946_v51 = vcombine.high %v814_v46, %v822_v47  ;;  %v542_v52 = vld [vmem:[#allocation5 + $0x480] sm:$0xff]  ;;  %3580 = vmatprep.subr.bf16.mxu0 %v8690_v50  ;;  %v8945_v57 = vcombine.low %v814_v46, %v822_v47  ;;  %v8611_v47 = vcombine.low %v479_v30, %v487_v31  ;;  %v8596_v50 = vcombine.high %v463_v40, %v471_v41  ;;  %v679_v9 = vld [vmem:[#allocation5 + $0x8c8] sm:$0xff] }
  0xa6   : > { %v550_v53 = vld [vmem:[#allocation5 + $0x4c0] sm:$0xff]  ;;  %3581 = vmatpush2.bf16.msra.mxu0 %v8689_v56  ;;  %v8595_v56 = vcombine.low %v463_v40, %v471_v41  ;;  %v407_v14 = vld [vmem:[#allocation5 + $0x48] sm:$0xff]  ;;  %v8803_v19 = vcombine.low %v671_v7, %v679_v9 }
  0xa7   : > { %v798_v54 = vld [vmem:[#allocation5 + $0xc80] sm:$0xff]  ;;  %v8674_v59 = vcombine.high %v542_v52, %v550_v53  ;;  %3631 = vmatprep.subr.bf16.mxu1 %v8946_v51  ;;  %v8673_v2 = vcombine.low %v542_v52, %v550_v53  ;;  %v447_v51 = vld [vmem:[#allocation5 + $0x188] sm:$0xff] }
  0xa8   : > { %v806_v55 = vld [vmem:[#allocation5 + $0xcc0] sm:$0xff]  ;;  %3632 = vmatpush2.bf16.msra.mxu1 %v8945_v57  ;;  %v455_v52 = vld [vmem:[#allocation5 + $0x1c8] sm:$0xff]  ;;  %v8851_v57 = vcombine.low %v719_v44, %v727_v45 }
  0xa9   : > { %v8930_v60 = vcombine.high %v798_v54, %v806_v55  ;;  %v526_v61 = vld [vmem:[#allocation5 + $0x400] sm:$0xff]  ;;  %3582 = vmatprep.subr.bf16.mxu0 %v8674_v59  ;;  %v8929_v3 = vcombine.low %v798_v54, %v806_v55  ;;  %v703_v53 = vld [vmem:[#allocation5 + $0x988] sm:$0xff]  ;;  %v8852_v54 = vcombine.high %v719_v44, %v727_v45  ;;  %v8580_v59 = vcombine.high %v447_v51, %v455_v52 }
  0xaa   : > { %v534_v62 = vld [vmem:[#allocation5 + $0x440] sm:$0xff]  ;;  %3583 = vmatpush2.bf16.msra.mxu0 %v8673_v2  ;;  %v711_v55 = vld [vmem:[#allocation5 + $0x9c8] sm:$0xff]  ;;  %v8579_v2 = vcombine.low %v447_v51, %v455_v52 }
  0xab   : > { %v782_v0 = vld [vmem:[#allocation5 + $0xc00] sm:$0xff]  ;;  %v8658_v4 = vcombine.high %v526_v61, %v534_v62  ;;  %3633 = vmatprep.subr.bf16.mxu1 %v8930_v60  ;;  %v8657_v10 = vcombine.low %v526_v61, %v534_v62  ;;  %v431_v60 = vld [vmem:[#allocation5 + $0x108] sm:$0xff] }
  0xac   : > { %v790_v1 = vld [vmem:[#allocation5 + $0xc40] sm:$0xff]  ;;  %3634 = vmatpush2.bf16.msra.mxu1 %v8929_v3  ;;  %v439_v61 = vld [vmem:[#allocation5 + $0x148] sm:$0xff]  ;;  %v8835_v3 = vcombine.low %v703_v53, %v711_v55 }
  0xad   : > { %v8914_v5 = vcombine.high %v782_v0, %v790_v1  ;;  %v378_v11 = vld [vmem:[%s10854_s10] sm:$0xff]  ;;  %3584 = vmatprep.subr.bf16.mxu0 %v8658_v4  ;;  %v8913_v13 = vcombine.low %v782_v0, %v790_v1  ;;  %v687_v62 = vld [vmem:[#allocation5 + $0x908] sm:$0xff]  ;;  %v8836_v0 = vcombine.high %v703_v53, %v711_v55  ;;  %v8564_v4 = vcombine.high %v431_v60, %v439_v61 }
  0xae   : > { %v382_v12 = vld [vmem:[%s10854_s10 + $0x20] sm:$0xff]  ;;  %3585 = vmatpush2.bf16.msra.mxu0 %v8657_v10  ;;  %v695_v1 = vld [vmem:[#allocation5 + $0x948] sm:$0xff]  ;;  %v8563_v10 = vcombine.low %v431_v60, %v439_v61 }
  0xaf   : > { %3635 = vmatprep.subr.bf16.mxu1 %v8914_v5  ;;  %v10882_v20 = vpack.c.bf16 %v382_v12, %v378_v11  ;;  %3656 = vmatprep.subr.bf16.mxu0 %v8644_v16  ;;  %v386_v37 = vld [vmem:[%s10854_s10 + $0x40] sm:$0xff]  ;;  %v415_v5 = vld [vmem:[#allocation5 + $0x88] sm:$0xff]  ;;  %v8820_v8 = vcombine.high %v687_v62, %v695_v1  ;;  %v8819_v11 = vcombine.low %v687_v62, %v695_v1 }
  0xb0   : > { %3636 = vmatpush2.bf16.msra.mxu1 %v8913_v13  ;;  %v10897_v46 = vpack.c.bf16 %v386_v37, %v386_v37  ;;  %v8548_v12 = vcombine.high %v415_v5, %v423_v6  ;;  %v399_v13 = vld [vmem:[#allocation5 + $0x8] sm:$0xff]  ;;  %v8804_v16 = vcombine.high %v671_v7, %v679_v9  ;;  %v8547_v18 = vcombine.low %v415_v5, %v423_v6 }
  0xb1   : > { %3707 = vmatprep.subr.bf16.mxu1 %v8900_v17  ;;  %3587 = vmatmul.mubr.bf16.vlgmr.msra.gmra.mxu0 %v10882_v20  ;;  %v655_v15 = vld [vmem:[#allocation5 + $0x808] sm:$0xff]  ;;  %v8532_v21 = vcombine.high %v399_v13, %v407_v14 }
  0xb2   : > { %3657 = vmatpush1.bf16.msra.mxu0 %v8643_v25  ;;  %3596 = vmatprep.mubr.bf16.mxu0 %v10888_v32  ;;  %v663_v17 = vld [vmem:[#allocation5 + $0x848] sm:$0xff] }
  0xb3   : > { %3638 = vmatmul.mubr.bf16.vlgmr.msra.gmra.mxu1 %v10885_v24  ;;  %3658 = vmatprep.subr.bf16.mxu0 %v8628_v28  ;;  %v639_v22 = vld [vmem:[#allocation5 + $0x788] sm:$0xff]  ;;  %v8788_v26 = vcombine.high %v655_v15, %v663_v17  ;;  %v8531_v28 = vcombine.low %v399_v13, %v407_v14 }
  0xb4   : > { %3708 = vmatpush1.bf16.msra.mxu1 %v8899_v27  ;;  %3647 = vmatprep.mubr.bf16.mxu1 %v10891_v35  ;;  %v647_v23 = vld [vmem:[#allocation5 + $0x7c8] sm:$0xff] }
  0xb5   : > { %3709 = vmatprep.subr.bf16.mxu1 %v8884_v29  ;;  %v895_v25 = vld [vmem:[#allocation5 + $0xf88] sm:$0xff]  ;;  %v8787_v29 = vcombine.low %v655_v15, %v663_v17  ;;  %v8772_v30 = vcombine.high %v639_v22, %v647_v23 }
  0xb6   : > { %3659 = vmatpush1.bf16.msra.mxu0 %v8627_v36  ;;  %v903_v27 = vld [vmem:[#allocation5 + $0xfc8] sm:$0xff] }
  0xb7   : > { %3660 = vmatprep.subr.bf16.mxu0 %v8612_v39  ;;  %v623_v31 = vld [vmem:[#allocation5 + $0x708] sm:$0xff]  ;;  %v9028_v36 = vcombine.high %v895_v25, %v903_v27  ;;  %v9027_v39 = vcombine.low %v895_v25, %v903_v27 }
  0xb8   : > { %3710 = vmatpush1.bf16.msra.mxu1 %v8883_v38  ;;  %v631_v33 = vld [vmem:[#allocation5 + $0x748] sm:$0xff]  ;;  %v8771_v38 = vcombine.low %v639_v22, %v647_v23 }
  0xb9   : > { %3711 = vmatprep.subr.bf16.mxu1 %v8868_v43  ;;  %3597 = vmatmul.mubr.bf16.gmra.mxu0 %v10897_v46  ;;  %v879_v34 = vld [vmem:[#allocation5 + $0xf08] sm:$0xff]  ;;  %v8756_v40 = vcombine.high %v623_v31, %v631_v33 }
  0xba   : > { %3661 = vmatpush1.bf16.msra.mxu0 %v8611_v47  ;;  %3688 = vmatprep.mubr.bf16.mxu0 %v10870_v58  ;;  %v887_v37 = vld [vmem:[#allocation5 + $0xf48] sm:$0xff]  ;;  %v8755_v47 = vcombine.low %v623_v31, %v631_v33  ;;  %v512_v31 = vld [vmem:[#allocation5 + $0x390] sm:$0xff] }
  0xbb   : > { %3648 = vmatmul.mubr.bf16.gmra.mxu1 %v10900_v48  ;;  %3662 = vmatprep.subr.bf16.mxu0 %v8596_v50  ;;  %v607_v41 = vld [vmem:[#allocation5 + $0x688] sm:$0xff]  ;;  %v9012_v44 = vcombine.high %v879_v34, %v887_v37  ;;  %v520_v33 = vld [vmem:[#allocation5 + $0x3d0] sm:$0xff] }
  0xbc   : > { %3712 = vmatpush1.bf16.msra.mxu1 %v8867_v49  ;;  %3739 = vmatprep.mubr.bf16.mxu1 %v10874_v63  ;;  %v615_v42 = vld [vmem:[#allocation5 + $0x6c8] sm:$0xff]  ;;  %v9011_v49 = vcombine.low %v879_v34, %v887_v37  ;;  %v768_v34 = vld [vmem:[#allocation5 + $0xb90] sm:$0xff] }
  0xbd   : > { %3713 = vmatprep.subr.bf16.mxu1 %v8852_v54  ;;  %v863_v43 = vld [vmem:[#allocation5 + $0xe88] sm:$0xff]  ;;  %v8740_v50 = vcombine.high %v607_v41, %v615_v42  ;;  %v776_v37 = vld [vmem:[#allocation5 + $0xbd0] sm:$0xff] }
  0xbe   : > { %3663 = vmatpush1.bf16.msra.mxu0 %v8595_v56  ;;  %v871_v45 = vld [vmem:[#allocation5 + $0xec8] sm:$0xff]  ;;  %v8739_v56 = vcombine.low %v607_v41, %v615_v42  ;;  %v496_v41 = vld [vmem:[#allocation5 + $0x310] sm:$0xff] }
  0xbf   : > { %3664 = vmatprep.subr.bf16.mxu0 %v8580_v59  ;;  %v591_v51 = vld [vmem:[#allocation5 + $0x608] sm:$0xff]  ;;  %v8996_v54 = vcombine.high %v863_v43, %v871_v45  ;;  %v504_v42 = vld [vmem:[#allocation5 + $0x350] sm:$0xff] }
  0xc0   : > { %3714 = vmatpush1.bf16.msra.mxu1 %v8851_v57  ;;  %v599_v52 = vld [vmem:[#allocation5 + $0x648] sm:$0xff]  ;;  %v8995_v57 = vcombine.low %v863_v43, %v871_v45  ;;  %v752_v43 = vld [vmem:[#allocation5 + $0xb10] sm:$0xff] }
  0xc1   : > { %3715 = vmatprep.subr.bf16.mxu1 %v8836_v0  ;;  %v847_v53 = vld [vmem:[#allocation5 + $0xe08] sm:$0xff]  ;;  %v8724_v59 = vcombine.high %v591_v51, %v599_v52  ;;  %v760_v45 = vld [vmem:[#allocation5 + $0xb50] sm:$0xff] }
  0xc2   : > { %3665 = vmatpush1.bf16.msra.mxu0 %v8579_v2  ;;  %v855_v55 = vld [vmem:[#allocation5 + $0xe48] sm:$0xff]  ;;  %v8723_v2 = vcombine.low %v591_v51, %v599_v52  ;;  %v480_v51 = vld [vmem:[#allocation5 + $0x290] sm:$0xff]  ;;  %v8886_v52 = vcombine.high %v752_v43, %v760_v45 }
  0xc3   : > { %3666 = vmatprep.subr.bf16.mxu0 %v8564_v4  ;;  %v575_v60 = vld [vmem:[#allocation5 + $0x588] sm:$0xff]  ;;  %v8980_v0 = vcombine.high %v847_v53, %v855_v55 }
  0xc4   : > { %3716 = vmatpush1.bf16.msra.mxu1 %v8835_v3  ;;  %v583_v61 = vld [vmem:[#allocation5 + $0x5c8] sm:$0xff]  ;;  %v8979_v3 = vcombine.low %v847_v53, %v855_v55  ;;  %v488_v53 = vld [vmem:[#allocation5 + $0x2d0] sm:$0xff] }
  0xc5   : > { %3717 = vmatprep.subr.bf16.mxu1 %v8820_v8  ;;  %v831_v62 = vld [vmem:[#allocation5 + $0xd88] sm:$0xff]  ;;  %v8708_v4 = vcombine.high %v575_v60, %v583_v61  ;;  %v744_v55 = vld [vmem:[#allocation5 + $0xad0] sm:$0xff] }
  0xc6   : > { %3667 = vmatpush1.bf16.msra.mxu0 %v8563_v10  ;;  %v839_v1 = vld [vmem:[#allocation5 + $0xdc8] sm:$0xff]  ;;  %v8707_v10 = vcombine.low %v575_v60, %v583_v61  ;;  %v464_v60 = vld [vmem:[#allocation5 + $0x210] sm:$0xff] }
  0xc7   : > { %3668 = vmatprep.subr.bf16.mxu0 %v8548_v12  ;;  %v559_v5 = vld [vmem:[#allocation5 + $0x508] sm:$0xff]  ;;  %v8964_v8 = vcombine.high %v831_v62, %v839_v1  ;;  %v472_v61 = vld [vmem:[#allocation5 + $0x250] sm:$0xff] }
  0xc8   : > { %3718 = vmatpush1.bf16.msra.mxu1 %v8819_v11  ;;  %v567_v6 = vld [vmem:[#allocation5 + $0x548] sm:$0xff]  ;;  %v8963_v11 = vcombine.low %v831_v62, %v839_v1  ;;  %v720_v62 = vld [vmem:[#allocation5 + $0xa10] sm:$0xff] }
  0xc9   : > { %3719 = vmatprep.subr.bf16.mxu1 %v8804_v16  ;;  %v815_v7 = vld [vmem:[#allocation5 + $0xd08] sm:$0xff]  ;;  %v8692_v12 = vcombine.high %v559_v5, %v567_v6  ;;  %v728_v1 = vld [vmem:[#allocation5 + $0xa50] sm:$0xff] }
  0xca   : > { %3669 = vmatpush1.bf16.msra.mxu0 %v8547_v18  ;;  %v823_v9 = vld [vmem:[#allocation5 + $0xd48] sm:$0xff]  ;;  %v8691_v18 = vcombine.low %v559_v5, %v567_v6  ;;  %v448_v5 = vld [vmem:[#allocation5 + $0x190] sm:$0xff] }
  0xcb   : > { %3670 = vmatprep.subr.bf16.mxu0 %v8532_v21  ;;  %v543_v13 = vld [vmem:[#allocation5 + $0x488] sm:$0xff]  ;;  %v8948_v16 = vcombine.high %v815_v7, %v823_v9  ;;  %v456_v6 = vld [vmem:[#allocation5 + $0x1d0] sm:$0xff] }
  0xcc   : > { %3720 = vmatpush1.bf16.msra.mxu1 %v8803_v19  ;;  %v551_v14 = vld [vmem:[#allocation5 + $0x4c8] sm:$0xff]  ;;  %v8947_v19 = vcombine.low %v815_v7, %v823_v9  ;;  %v704_v7 = vld [vmem:[#allocation5 + $0x990] sm:$0xff] }
  0xcd   : > { %3721 = vmatprep.subr.bf16.mxu1 %v8788_v26  ;;  %v799_v15 = vld [vmem:[#allocation5 + $0xc88] sm:$0xff]  ;;  %v8676_v21 = vcombine.high %v543_v13, %v551_v14  ;;  %v712_v9 = vld [vmem:[#allocation5 + $0x9d0] sm:$0xff] }
  0xce   : > { %3671 = vmatpush1.bf16.msra.mxu0 %v8531_v28  ;;  %v807_v17 = vld [vmem:[#allocation5 + $0xcc8] sm:$0xff]  ;;  %v8675_v28 = vcombine.low %v543_v13, %v551_v14  ;;  %v432_v13 = vld [vmem:[#allocation5 + $0x110] sm:$0xff] }
  0xcf   : > { %3672 = vmatprep.subr.bf16.mxu0 %v8772_v30  ;;  %v527_v22 = vld [vmem:[#allocation5 + $0x408] sm:$0xff]  ;;  %v8932_v26 = vcombine.high %v799_v15, %v807_v17  ;;  %v440_v14 = vld [vmem:[#allocation5 + $0x150] sm:$0xff] }
  0xd0   : > { %3722 = vmatpush1.bf16.msra.mxu1 %v8787_v29  ;;  %v535_v23 = vld [vmem:[#allocation5 + $0x448] sm:$0xff]  ;;  %v8931_v29 = vcombine.low %v799_v15, %v807_v17  ;;  %v688_v15 = vld [vmem:[#allocation5 + $0x910] sm:$0xff] }
  0xd1   : > { %3723 = vmatprep.subr.bf16.mxu1 %v9028_v36  ;;  %v783_v25 = vld [vmem:[#allocation5 + $0xc08] sm:$0xff]  ;;  %v8660_v30 = vcombine.high %v527_v22, %v535_v23  ;;  %v696_v17 = vld [vmem:[#allocation5 + $0x950] sm:$0xff] }
  0xd2   : > { %3673 = vmatpush2.bf16.msra.mxu0 %v8771_v38  ;;  %v791_v27 = vld [vmem:[#allocation5 + $0xc48] sm:$0xff]  ;;  %v8659_v38 = vcombine.low %v527_v22, %v535_v23  ;;  %v416_v22 = vld [vmem:[#allocation5 + $0x90] sm:$0xff] }
  0xd3   : > { %3674 = vmatprep.subr.bf16.mxu0 %v8756_v40  ;;  %v8916_v36 = vcombine.high %v783_v25, %v791_v27  ;;  %v8646_v40 = vcombine.high %v512_v31, %v520_v33  ;;  %v424_v23 = vld [vmem:[#allocation5 + $0xd0] sm:$0xff] }
  0xd4   : > { %3724 = vmatpush2.bf16.msra.mxu1 %v9027_v39  ;;  %v8915_v39 = vcombine.low %v783_v25, %v791_v27  ;;  %v672_v25 = vld [vmem:[#allocation5 + $0x890] sm:$0xff] }
  0xd5   : > { %3725 = vmatprep.subr.bf16.mxu1 %v9012_v44  ;;  %v8902_v44 = vcombine.high %v768_v34, %v776_v37  ;;  %v680_v27 = vld [vmem:[#allocation5 + $0x8d0] sm:$0xff] }
  0xd6   : > { %3675 = vmatpush2.bf16.msra.mxu0 %v8755_v47  ;;  %v8645_v47 = vcombine.low %v512_v31, %v520_v33  ;;  %v400_v31 = vld [vmem:[#allocation5 + $0x10] sm:$0xff] }
  0xd7   : > { %3676 = vmatprep.subr.bf16.mxu0 %v8740_v50  ;;  %v8630_v50 = vcombine.high %v496_v41, %v504_v42  ;;  %v408_v33 = vld [vmem:[#allocation5 + $0x50] sm:$0xff] }
  0xd8   : > { %3726 = vmatpush2.bf16.msra.mxu1 %v9011_v49  ;;  %v8901_v49 = vcombine.low %v768_v34, %v776_v37  ;;  %v656_v34 = vld [vmem:[#allocation5 + $0x810] sm:$0xff] }
  0xd9   : > { %3727 = vmatprep.subr.bf16.mxu1 %v8996_v54  ;;  %v736_v54 = vld [vmem:[#allocation5 + $0xa90] sm:$0xff] }
  0xda   : > { %3677 = vmatpush2.bf16.msra.mxu0 %v8739_v56  ;;  %v8629_v56 = vcombine.low %v496_v41, %v504_v42  ;;  %v664_v37 = vld [vmem:[#allocation5 + $0x850] sm:$0xff] }
  0xdb   : > { %3678 = vmatprep.subr.bf16.mxu0 %v8724_v59  ;;  %v8614_v59 = vcombine.high %v480_v51, %v488_v53  ;;  %v640_v41 = vld [vmem:[#allocation5 + $0x790] sm:$0xff] }
  0xdc   : > { %3728 = vmatpush2.bf16.msra.mxu1 %v8995_v57  ;;  %v8885_v57 = vcombine.low %v752_v43, %v760_v45  ;;  %v648_v42 = vld [vmem:[#allocation5 + $0x7d0] sm:$0xff] }
  0xdd   : > { %3729 = vmatprep.subr.bf16.mxu1 %v8980_v0  ;;  %v8870_v0 = vcombine.high %v736_v54, %v744_v55  ;;  %v896_v43 = vld [vmem:[#allocation5 + $0xf90] sm:$0xff] }
  0xde   : > { %3679 = vmatpush2.bf16.msra.mxu0 %v8723_v2  ;;  %v8613_v2 = vcombine.low %v480_v51, %v488_v53  ;;  %v904_v45 = vld [vmem:[#allocation5 + $0xfd0] sm:$0xff] }
  0xdf   : > { %3680 = vmatprep.subr.bf16.mxu0 %v8708_v4  ;;  %v8598_v4 = vcombine.high %v464_v60, %v472_v61  ;;  %v624_v51 = vld [vmem:[#allocation5 + $0x710] sm:$0xff] }
  0xe0   : > { %3730 = vmatpush2.bf16.msra.mxu1 %v8979_v3  ;;  %v8869_v3 = vcombine.low %v736_v54, %v744_v55  ;;  %v880_v53 = vld [vmem:[#allocation5 + $0xf10] sm:$0xff]  ;;  %v9030_v54 = vcombine.high %v896_v43, %v904_v45 }
  0xe1   : > { %3731 = vmatprep.subr.bf16.mxu1 %v8964_v8  ;;  %v8854_v8 = vcombine.high %v720_v62, %v728_v1  ;;  %v888_v55 = vld [vmem:[#allocation5 + $0xf50] sm:$0xff] }
  0xe2   : > { %3681 = vmatpush2.bf16.msra.mxu0 %v8707_v10  ;;  %v8597_v10 = vcombine.low %v464_v60, %v472_v61  ;;  %v608_v60 = vld [vmem:[#allocation5 + $0x690] sm:$0xff] }
  0xe3   : > { %3682 = vmatprep.subr.bf16.mxu0 %v8692_v12  ;;  %v8582_v12 = vcombine.high %v448_v5, %v456_v6  ;;  %v616_v61 = vld [vmem:[#allocation5 + $0x6d0] sm:$0xff] }
  0xe4   : > { %3732 = vmatpush2.bf16.msra.mxu1 %v8963_v11  ;;  %v8853_v11 = vcombine.low %v720_v62, %v728_v1  ;;  %v864_v62 = vld [vmem:[#allocation5 + $0xe90] sm:$0xff] }
  0xe5   : > { %3733 = vmatprep.subr.bf16.mxu1 %v8948_v16  ;;  %v8838_v16 = vcombine.high %v704_v7, %v712_v9  ;;  %v872_v1 = vld [vmem:[#allocation5 + $0xed0] sm:$0xff] }
  0xe6   : > { %3683 = vmatpush2.bf16.msra.mxu0 %v8691_v18  ;;  %v8581_v18 = vcombine.low %v448_v5, %v456_v6  ;;  %v592_v5 = vld [vmem:[#allocation5 + $0x610] sm:$0xff] }
  0xe7   : > { %3684 = vmatprep.subr.bf16.mxu0 %v8676_v21  ;;  %v8566_v21 = vcombine.high %v432_v13, %v440_v14  ;;  %v600_v6 = vld [vmem:[#allocation5 + $0x650] sm:$0xff] }
  0xe8   : > { %3734 = vmatpush2.bf16.msra.mxu1 %v8947_v19  ;;  %v8837_v19 = vcombine.low %v704_v7, %v712_v9  ;;  %v848_v7 = vld [vmem:[#allocation5 + $0xe10] sm:$0xff] }
  0xe9   : > { %3735 = vmatprep.subr.bf16.mxu1 %v8932_v26  ;;  %v8822_v26 = vcombine.high %v688_v15, %v696_v17  ;;  %v856_v9 = vld [vmem:[#allocation5 + $0xe50] sm:$0xff] }
  0xea   : > { %3685 = vmatpush2.bf16.msra.mxu0 %v8675_v28  ;;  %v8565_v28 = vcombine.low %v432_v13, %v440_v14  ;;  %v576_v13 = vld [vmem:[#allocation5 + $0x590] sm:$0xff] }
  0xeb   : > { %3686 = vmatprep.subr.bf16.mxu0 %v8660_v30  ;;  %v8550_v30 = vcombine.high %v416_v22, %v424_v23  ;;  %v584_v14 = vld [vmem:[#allocation5 + $0x5d0] sm:$0xff] }
  0xec   : > { %3736 = vmatpush2.bf16.msra.mxu1 %v8931_v29  ;;  %v8821_v29 = vcombine.low %v688_v15, %v696_v17  ;;  %v832_v15 = vld [vmem:[#allocation5 + $0xd90] sm:$0xff] }
  0xed   : > { %3737 = vmatprep.subr.bf16.mxu1 %v8916_v36  ;;  %v8806_v36 = vcombine.high %v672_v25, %v680_v27  ;;  %v840_v17 = vld [vmem:[#allocation5 + $0xdd0] sm:$0xff] }
  0xee   : > { %3687 = vmatpush2.bf16.msra.mxu0 %v8659_v38  ;;  %v8549_v38 = vcombine.low %v416_v22, %v424_v23  ;;  %v560_v22 = vld [vmem:[#allocation5 + $0x510] sm:$0xff] }
  0xef   : > { %3758 = vmatprep.subr.bf16.mxu0 %v8646_v40  ;;  %v8534_v40 = vcombine.high %v400_v31, %v408_v33  ;;  %v568_v23 = vld [vmem:[#allocation5 + $0x550] sm:$0xff] }
  0xf0   : > { %3738 = vmatpush2.bf16.msra.mxu1 %v8915_v39  ;;  %v8805_v39 = vcombine.low %v672_v25, %v680_v27  ;;  %v816_v25 = vld [vmem:[#allocation5 + $0xd10] sm:$0xff] }
  0xf1   : > { %3809 = vmatprep.subr.bf16.mxu1 %v8902_v44  ;;  %3689 = vmatmul.mubr.bf16.vlgmr.msra.gmra.mxu0 %v10882_v20  ;;  %v8790_v44 = vcombine.high %v656_v34, %v664_v37  ;;  %v824_v27 = vld [vmem:[#allocation5 + $0xd50] sm:$0xff] }
  0xf2   : > { %3759 = vmatpush1.bf16.msra.mxu0 %v8645_v47  ;;  %3698 = vmatprep.mubr.bf16.mxu0 %v10888_v32  ;;  %v8533_v47 = vcombine.low %v400_v31, %v408_v33  ;;  %v544_v31 = vld [vmem:[#allocation5 + $0x490] sm:$0xff] }
  0xf3   : > { %3740 = vmatmul.mubr.bf16.vlgmr.msra.gmra.mxu1 %v10885_v24  ;;  %3760 = vmatprep.subr.bf16.mxu0 %v8630_v50  ;;  %v8774_v50 = vcombine.high %v640_v41, %v648_v42  ;;  %v552_v33 = vld [vmem:[#allocation5 + $0x4d0] sm:$0xff] }
  0xf4   : > { %3810 = vmatpush1.bf16.msra.mxu1 %v8901_v49  ;;  %3749 = vmatprep.mubr.bf16.mxu1 %v10891_v35  ;;  %v8789_v49 = vcombine.low %v656_v34, %v664_v37  ;;  %v800_v34 = vld [vmem:[#allocation5 + $0xc90] sm:$0xff] }
  0xf5   : > { %3811 = vmatprep.subr.bf16.mxu1 %v8886_v52  ;;  %v632_v52 = vld [vmem:[#allocation5 + $0x750] sm:$0xff] }
  0xf6   : > { %3761 = vmatpush1.bf16.msra.mxu0 %v8629_v56  ;;  %v8773_v56 = vcombine.low %v640_v41, %v648_v42  ;;  %v808_v37 = vld [vmem:[#allocation5 + $0xcd0] sm:$0xff] }
  0xf7   : > { %3762 = vmatprep.subr.bf16.mxu0 %v8614_v59  ;;  %v8758_v59 = vcombine.high %v624_v51, %v632_v52  ;;  %v528_v41 = vld [vmem:[#allocation5 + $0x410] sm:$0xff] }
  0xf8   : > { %3812 = vmatpush1.bf16.msra.mxu1 %v8885_v57  ;;  %v9029_v57 = vcombine.low %v896_v43, %v904_v45  ;;  %v536_v42 = vld [vmem:[#allocation5 + $0x450] sm:$0xff] }
  0xf9   : > { %3813 = vmatprep.subr.bf16.mxu1 %v8870_v0  ;;  %3699 = vmatmul.mubr.bf16.gmra.mxu0 %v10897_v46  ;;  %v9014_v0 = vcombine.high %v880_v53, %v888_v55  ;;  %v784_v43 = vld [vmem:[#allocation5 + $0xc10] sm:$0xff] }
  0xfa   : > { %3763 = vmatpush1.bf16.msra.mxu0 %v8613_v2  ;;  %3790 = vmatprep.mubr.bf16.mxu0 %v10870_v58  ;;  %v8757_v2 = vcombine.low %v624_v51, %v632_v52  ;;  %v792_v45 = vld [vmem:[#allocation5 + $0xc50] sm:$0xff]  ;;  %v513_v51 = vld [vmem:[#allocation5 + $0x398] sm:$0xff] }
  0xfb   : > { %3750 = vmatmul.mubr.bf16.gmra.mxu1 %v10900_v48  ;;  %3764 = vmatprep.subr.bf16.mxu0 %v8598_v4  ;;  %v8742_v4 = vcombine.high %v608_v60, %v616_v61  ;;  %v521_v52 = vld [vmem:[#allocation5 + $0x3d8] sm:$0xff] }
  0xfc   : > { %3814 = vmatpush1.bf16.msra.mxu1 %v8869_v3  ;;  %3841 = vmatprep.mubr.bf16.mxu1 %v10874_v63  ;;  %v9013_v3 = vcombine.low %v880_v53, %v888_v55  ;;  %v769_v53 = vld [vmem:[#allocation5 + $0xb98] sm:$0xff] }
  0xfd   : > { %3815 = vmatprep.subr.bf16.mxu1 %v8854_v8  ;;  %v8998_v8 = vcombine.high %v864_v62, %v872_v1  ;;  %v777_v55 = vld [vmem:[#allocation5 + $0xbd8] sm:$0xff] }
  0xfe   : > { %3765 = vmatpush1.bf16.msra.mxu0 %v8597_v10  ;;  %v8741_v10 = vcombine.low %v608_v60, %v616_v61  ;;  %v497_v60 = vld [vmem:[#allocation5 + $0x318] sm:$0xff] }
  0xff   : > { %3766 = vmatprep.subr.bf16.mxu0 %v8582_v12  ;;  %v8726_v12 = vcombine.high %v592_v5, %v600_v6  ;;  %v505_v61 = vld [vmem:[#allocation5 + $0x358] sm:$0xff] }
 0x100   : > { %3816 = vmatpush1.bf16.msra.mxu1 %v8853_v11  ;;  %v8997_v11 = vcombine.low %v864_v62, %v872_v1  ;;  %v753_v62 = vld [vmem:[#allocation5 + $0xb18] sm:$0xff] }
 0x101   : > { %3817 = vmatprep.subr.bf16.mxu1 %v8838_v16  ;;  %v8982_v16 = vcombine.high %v848_v7, %v856_v9  ;;  %v761_v1 = vld [vmem:[#allocation5 + $0xb58] sm:$0xff] }
 0x102   : > { %3767 = vmatpush1.bf16.msra.mxu0 %v8581_v18  ;;  %v8725_v18 = vcombine.low %v592_v5, %v600_v6  ;;  %v481_v5 = vld [vmem:[#allocation5 + $0x298] sm:$0xff] }
 0x103   : > { %3768 = vmatprep.subr.bf16.mxu0 %v8566_v21  ;;  %v8710_v21 = vcombine.high %v576_v13, %v584_v14  ;;  %v489_v6 = vld [vmem:[#allocation5 + $0x2d8] sm:$0xff] }
 0x104   : > { %3818 = vmatpush1.bf16.msra.mxu1 %v8837_v19  ;;  %v8981_v19 = vcombine.low %v848_v7, %v856_v9  ;;  %v737_v7 = vld [vmem:[#allocation5 + $0xa98] sm:$0xff] }
 0x105   : > { %3819 = vmatprep.subr.bf16.mxu1 %v8822_v26  ;;  %v8966_v26 = vcombine.high %v832_v15, %v840_v17  ;;  %v745_v9 = vld [vmem:[#allocation5 + $0xad8] sm:$0xff] }
 0x106   : > { %3769 = vmatpush1.bf16.msra.mxu0 %v8565_v28  ;;  %v8709_v28 = vcombine.low %v576_v13, %v584_v14  ;;  %v465_v13 = vld [vmem:[#allocation5 + $0x218] sm:$0xff] }
 0x107   : > { %3770 = vmatprep.subr.bf16.mxu0 %v8550_v30  ;;  %v8694_v30 = vcombine.high %v560_v22, %v568_v23  ;;  %v473_v14 = vld [vmem:[#allocation5 + $0x258] sm:$0xff] }
 0x108   : > { %3820 = vmatpush1.bf16.msra.mxu1 %v8821_v29  ;;  %v8965_v29 = vcombine.low %v832_v15, %v840_v17  ;;  %v721_v15 = vld [vmem:[#allocation5 + $0xa18] sm:$0xff] }
 0x109   : > { %3821 = vmatprep.subr.bf16.mxu1 %v8806_v36  ;;  %v8950_v36 = vcombine.high %v816_v25, %v824_v27  ;;  %v729_v17 = vld [vmem:[#allocation5 + $0xa58] sm:$0xff] }
 0x10a   : > { %3771 = vmatpush1.bf16.msra.mxu0 %v8549_v38  ;;  %v8693_v38 = vcombine.low %v560_v22, %v568_v23  ;;  %v449_v22 = vld [vmem:[#allocation5 + $0x198] sm:$0xff] }
 0x10b   : > { %3772 = vmatprep.subr.bf16.mxu0 %v8534_v40  ;;  %v8678_v40 = vcombine.high %v544_v31, %v552_v33  ;;  %v457_v23 = vld [vmem:[#allocation5 + $0x1d8] sm:$0xff] }
 0x10c   : > { %3822 = vmatpush1.bf16.msra.mxu1 %v8805_v39  ;;  %v8949_v39 = vcombine.low %v816_v25, %v824_v27  ;;  %v705_v25 = vld [vmem:[#allocation5 + $0x998] sm:$0xff] }
 0x10d   : > { %3823 = vmatprep.subr.bf16.mxu1 %v8790_v44  ;;  %v8934_v44 = vcombine.high %v800_v34, %v808_v37  ;;  %v713_v27 = vld [vmem:[#allocation5 + $0x9d8] sm:$0xff] }
 0x10e   : > { %3773 = vmatpush1.bf16.msra.mxu0 %v8533_v47  ;;  %v8677_v47 = vcombine.low %v544_v31, %v552_v33  ;;  %v433_v31 = vld [vmem:[#allocation5 + $0x118] sm:$0xff] }
 0x10f   : > { %3774 = vmatprep.subr.bf16.mxu0 %v8774_v50  ;;  %v8662_v50 = vcombine.high %v528_v41, %v536_v42  ;;  %v441_v33 = vld [vmem:[#allocation5 + $0x158] sm:$0xff] }
 0x110   : > { %3824 = vmatpush1.bf16.msra.mxu1 %v8789_v49  ;;  %v8933_v49 = vcombine.low %v800_v34, %v808_v37  ;;  %v689_v34 = vld [vmem:[#allocation5 + $0x918] sm:$0xff] }
 0x111   : > { %3825 = vmatprep.subr.bf16.mxu1 %v9030_v54  ;;  %v8918_v54 = vcombine.high %v784_v43, %v792_v45  ;;  %v697_v37 = vld [vmem:[#allocation5 + $0x958] sm:$0xff] }
 0x112   : > { %3775 = vmatpush2.bf16.msra.mxu0 %v8773_v56  ;;  %v8661_v56 = vcombine.low %v528_v41, %v536_v42  ;;  %v417_v41 = vld [vmem:[#allocation5 + $0x98] sm:$0xff] }
 0x113   : > { %3776 = vmatprep.subr.bf16.mxu0 %v8758_v59  ;;  %v8648_v59 = vcombine.high %v513_v51, %v521_v52  ;;  %v425_v42 = vld [vmem:[#allocation5 + $0xd8] sm:$0xff] }
 0x114   : > { %3826 = vmatpush2.bf16.msra.mxu1 %v9029_v57  ;;  %v8917_v57 = vcombine.low %v784_v43, %v792_v45  ;;  %v673_v43 = vld [vmem:[#allocation5 + $0x898] sm:$0xff] }
 0x115   : > { %3827 = vmatprep.subr.bf16.mxu1 %v9014_v0  ;;  %v8904_v0 = vcombine.high %v769_v53, %v777_v55  ;;  %v681_v45 = vld [vmem:[#allocation5 + $0x8d8] sm:$0xff] }
 0x116   : > { %3777 = vmatpush2.bf16.msra.mxu0 %v8757_v2  ;;  %v8647_v2 = vcombine.low %v513_v51, %v521_v52  ;;  %v401_v51 = vld [vmem:[#allocation5 + $0x18] sm:$0xff] }
 0x117   : > { %3778 = vmatprep.subr.bf16.mxu0 %v8742_v4  ;;  %v8632_v4 = vcombine.high %v497_v60, %v505_v61  ;;  %v409_v52 = vld [vmem:[#allocation5 + $0x58] sm:$0xff] }
 0x118   : > { %3828 = vmatpush2.bf16.msra.mxu1 %v9013_v3  ;;  %v8903_v3 = vcombine.low %v769_v53, %v777_v55  ;;  %v657_v53 = vld [vmem:[#allocation5 + $0x818] sm:$0xff] }
 0x119   : > { %3829 = vmatprep.subr.bf16.mxu1 %v8998_v8  ;;  %v8888_v8 = vcombine.high %v753_v62, %v761_v1  ;;  %v665_v55 = vld [vmem:[#allocation5 + $0x858] sm:$0xff] }
 0x11a   : > { %3779 = vmatpush2.bf16.msra.mxu0 %v8741_v10  ;;  %v8631_v10 = vcombine.low %v497_v60, %v505_v61  ;;  %v641_v60 = vld [vmem:[#allocation5 + $0x798] sm:$0xff] }
 0x11b   : > { %3780 = vmatprep.subr.bf16.mxu0 %v8726_v12  ;;  %v8616_v12 = vcombine.high %v481_v5, %v489_v6  ;;  %v649_v61 = vld [vmem:[#allocation5 + $0x7d8] sm:$0xff] }
 0x11c   : > { %3830 = vmatpush2.bf16.msra.mxu1 %v8997_v11  ;;  %v8887_v11 = vcombine.low %v753_v62, %v761_v1  ;;  %v897_v62 = vld [vmem:[#allocation5 + $0xf98] sm:$0xff] }
 0x11d   : > { %3831 = vmatprep.subr.bf16.mxu1 %v8982_v16  ;;  %v8872_v16 = vcombine.high %v737_v7, %v745_v9  ;;  %v905_v1 = vld [vmem:[#allocation5 + $0xfd8] sm:$0xff] }
 0x11e   : > { %3781 = vmatpush2.bf16.msra.mxu0 %v8725_v18  ;;  %v8615_v18 = vcombine.low %v481_v5, %v489_v6  ;;  %v625_v5 = vld [vmem:[#allocation5 + $0x718] sm:$0xff] }
 0x11f   : > { %3782 = vmatprep.subr.bf16.mxu0 %v8710_v21  ;;  %v8600_v21 = vcombine.high %v465_v13, %v473_v14  ;;  %v633_v6 = vld [vmem:[#allocation5 + $0x758] sm:$0xff] }
 0x120   : > { %3832 = vmatpush2.bf16.msra.mxu1 %v8981_v19  ;;  %v8871_v19 = vcombine.low %v737_v7, %v745_v9  ;;  %v881_v7 = vld [vmem:[#allocation5 + $0xf18] sm:$0xff] }
 0x121   : > { %3833 = vmatprep.subr.bf16.mxu1 %v8966_v26  ;;  %v8856_v26 = vcombine.high %v721_v15, %v729_v17  ;;  %v889_v9 = vld [vmem:[#allocation5 + $0xf58] sm:$0xff] }
 0x122   : > { %3783 = vmatpush2.bf16.msra.mxu0 %v8709_v28  ;;  %v8599_v28 = vcombine.low %v465_v13, %v473_v14  ;;  %v609_v13 = vld [vmem:[#allocation5 + $0x698] sm:$0xff] }
 0x123   : > { %3784 = vmatprep.subr.bf16.mxu0 %v8694_v30  ;;  %v8584_v30 = vcombine.high %v449_v22, %v457_v23  ;;  %v617_v14 = vld [vmem:[#allocation5 + $0x6d8] sm:$0xff] }
 0x124   : > { %3834 = vmatpush2.bf16.msra.mxu1 %v8965_v29  ;;  %v8855_v29 = vcombine.low %v721_v15, %v729_v17  ;;  %v865_v15 = vld [vmem:[#allocation5 + $0xe98] sm:$0xff] }
 0x125   : > { %3835 = vmatprep.subr.bf16.mxu1 %v8950_v36  ;;  %v8840_v36 = vcombine.high %v705_v25, %v713_v27  ;;  %v873_v17 = vld [vmem:[#allocation5 + $0xed8] sm:$0xff] }
 0x126   : > { %3785 = vmatpush2.bf16.msra.mxu0 %v8693_v38  ;;  %v8583_v38 = vcombine.low %v449_v22, %v457_v23  ;;  %v593_v22 = vld [vmem:[#allocation5 + $0x618] sm:$0xff] }
 0x127   : > { %3786 = vmatprep.subr.bf16.mxu0 %v8678_v40  ;;  %v8568_v40 = vcombine.high %v433_v31, %v441_v33  ;;  %v601_v23 = vld [vmem:[#allocation5 + $0x658] sm:$0xff] }
 0x128   : > { %3836 = vmatpush2.bf16.msra.mxu1 %v8949_v39  ;;  %v8839_v39 = vcombine.low %v705_v25, %v713_v27  ;;  %v849_v25 = vld [vmem:[#allocation5 + $0xe18] sm:$0xff] }
 0x129   : > { %3837 = vmatprep.subr.bf16.mxu1 %v8934_v44  ;;  %v8824_v44 = vcombine.high %v689_v34, %v697_v37  ;;  %v857_v27 = vld [vmem:[#allocation5 + $0xe58] sm:$0xff] }
 0x12a   : > { %3787 = vmatpush2.bf16.msra.mxu0 %v8677_v47  ;;  %v8567_v47 = vcombine.low %v433_v31, %v441_v33  ;;  %v577_v31 = vld [vmem:[#allocation5 + $0x598] sm:$0xff] }
 0x12b   : > { %3788 = vmatprep.subr.bf16.mxu0 %v8662_v50  ;;  %v8552_v50 = vcombine.high %v417_v41, %v425_v42  ;;  %v585_v33 = vld [vmem:[#allocation5 + $0x5d8] sm:$0xff] }
 0x12c   : > { %3838 = vmatpush2.bf16.msra.mxu1 %v8933_v49  ;;  %v8823_v49 = vcombine.low %v689_v34, %v697_v37  ;;  %v833_v34 = vld [vmem:[#allocation5 + $0xd98] sm:$0xff] }
 0x12d   : > { %3839 = vmatprep.subr.bf16.mxu1 %v8918_v54  ;;  %v8808_v54 = vcombine.high %v673_v43, %v681_v45  ;;  %v841_v37 = vld [vmem:[#allocation5 + $0xdd8] sm:$0xff] }
 0x12e   : > { %3789 = vmatpush2.bf16.msra.mxu0 %v8661_v56  ;;  %v8551_v56 = vcombine.low %v417_v41, %v425_v42  ;;  %v561_v41 = vld [vmem:[#allocation5 + $0x518] sm:$0xff] }
 0x12f   : > { %3860 = vmatprep.subr.bf16.mxu0 %v8648_v59  ;;  %v8536_v59 = vcombine.high %v401_v51, %v409_v52  ;;  %v569_v42 = vld [vmem:[#allocation5 + $0x558] sm:$0xff] }
 0x130   : > { %3840 = vmatpush2.bf16.msra.mxu1 %v8917_v57  ;;  %v8807_v57 = vcombine.low %v673_v43, %v681_v45  ;;  %v817_v43 = vld [vmem:[#allocation5 + $0xd18] sm:$0xff] }
 0x131   : > { %3911 = vmatprep.subr.bf16.mxu1 %v8904_v0  ;;  %3791 = vmatmul.mubr.bf16.vlgmr.msra.gmra.mxu0 %v10882_v20  ;;  %v8792_v0 = vcombine.high %v657_v53, %v665_v55  ;;  %v825_v45 = vld [vmem:[#allocation5 + $0xd58] sm:$0xff] }
 0x132   : > { %3861 = vmatpush1.bf16.msra.mxu0 %v8647_v2  ;;  %3800 = vmatprep.mubr.bf16.mxu0 %v10888_v32  ;;  %v8535_v2 = vcombine.low %v401_v51, %v409_v52  ;;  %v545_v51 = vld [vmem:[#allocation5 + $0x498] sm:$0xff] }
 0x133   : > { %3842 = vmatmul.mubr.bf16.vlgmr.msra.gmra.mxu1 %v10885_v24  ;;  %3862 = vmatprep.subr.bf16.mxu0 %v8632_v4  ;;  %v8776_v4 = vcombine.high %v641_v60, %v649_v61  ;;  %v553_v52 = vld [vmem:[#allocation5 + $0x4d8] sm:$0xff] }
 0x134   : > { %3912 = vmatpush1.bf16.msra.mxu1 %v8903_v3  ;;  %3851 = vmatprep.mubr.bf16.mxu1 %v10891_v35  ;;  %v8791_v3 = vcombine.low %v657_v53, %v665_v55  ;;  %v801_v53 = vld [vmem:[#allocation5 + $0xc98] sm:$0xff] }
 0x135   : > { %3913 = vmatprep.subr.bf16.mxu1 %v8888_v8  ;;  %v9032_v8 = vcombine.high %v897_v62, %v905_v1  ;;  %v809_v55 = vld [vmem:[#allocation5 + $0xcd8] sm:$0xff] }
 0x136   : > { %3863 = vmatpush1.bf16.msra.mxu0 %v8631_v10  ;;  %v8775_v10 = vcombine.low %v641_v60, %v649_v61  ;;  %v8680_v60 = vcombine.high %v545_v51, %v553_v52  ;;  %v529_v61 = vld [vmem:[#allocation5 + $0x418] sm:$0xff] }
 0x137   : > { %3864 = vmatprep.subr.bf16.mxu0 %v8616_v12  ;;  %v8760_v12 = vcombine.high %v625_v5, %v633_v6 }
 0x138   : > { %3914 = vmatpush1.bf16.msra.mxu1 %v8887_v11  ;;  %v9031_v11 = vcombine.low %v897_v62, %v905_v1  ;;  %v537_v62 = vld [vmem:[#allocation5 + $0x458] sm:$0xff]  ;;  %v8936_v1 = vcombine.high %v801_v53, %v809_v55 }
 0x139   : > { %3915 = vmatprep.subr.bf16.mxu1 %v8872_v16  ;;  %3801 = vmatmul.mubr.bf16.gmra.mxu0 %v10897_v46  ;;  %v9016_v16 = vcombine.high %v881_v7, %v889_v9 }
 0x13a   : > { %3865 = vmatpush1.bf16.msra.mxu0 %v8615_v18  ;;  %3892 = vmatprep.mubr.bf16.mxu0 %v10870_v58  ;;  %v8759_v18 = vcombine.low %v625_v5, %v633_v6  ;;  %v8935_v5 = vcombine.low %v801_v53, %v809_v55  ;;  %v8664_v6 = vcombine.high %v529_v61, %v537_v62  ;;  %v730_v53 = vld [vmem:[#allocation5 + $0xa60] sm:$0xff] }
 0x13b   : > { %3852 = vmatmul.mubr.bf16.gmra.mxu1 %v10900_v48  ;;  %3866 = vmatprep.subr.bf16.mxu0 %v8600_v21  ;;  %v8744_v21 = vcombine.high %v609_v13, %v617_v14 }
 0x13c   : > { %3916 = vmatpush1.bf16.msra.mxu1 %v8871_v19  ;;  %3943 = vmatprep.mubr.bf16.mxu1 %v10874_v63  ;;  %v9015_v19 = vcombine.low %v881_v7, %v889_v9  ;;  %v514_v7 = vld [vmem:[#allocation5 + $0x3a0] sm:$0xff] }
 0x13d   : > { %3917 = vmatprep.subr.bf16.mxu1 %v8856_v26  ;;  %v9000_v26 = vcombine.high %v865_v15, %v873_v17  ;;  %v770_v9 = vld [vmem:[#allocation5 + $0xba0] sm:$0xff] }
 0x13e   : > { %3867 = vmatpush1.bf16.msra.mxu0 %v8599_v28  ;;  %v8743_v28 = vcombine.low %v609_v13, %v617_v14  ;;  %v8663_v13 = vcombine.low %v529_v61, %v537_v62 }
 0x13f   : > { %3868 = vmatprep.subr.bf16.mxu0 %v8584_v30  ;;  %v8728_v30 = vcombine.high %v593_v22, %v601_v23 }
 0x140   : > { %3918 = vmatpush1.bf16.msra.mxu1 %v8855_v29  ;;  %v8999_v29 = vcombine.low %v865_v15, %v873_v17  ;;  %v498_v17 = vld [vmem:[#allocation5 + $0x320] sm:$0xff] }
 0x141   : > { %3919 = vmatprep.subr.bf16.mxu1 %v8840_v36  ;;  %v8984_v36 = vcombine.high %v849_v25, %v857_v27 }
 0x142   : > { %3869 = vmatpush1.bf16.msra.mxu0 %v8583_v38  ;;  %v8727_v38 = vcombine.low %v593_v22, %v601_v23  ;;  %v762_v23 = vld [vmem:[#allocation5 + $0xb60] sm:$0xff] }
 0x143   : > { %3870 = vmatprep.subr.bf16.mxu0 %v8568_v40  ;;  %v8712_v40 = vcombine.high %v577_v31, %v585_v33 }
 0x144   : > { %3920 = vmatpush1.bf16.msra.mxu1 %v8839_v39  ;;  %v8983_v39 = vcombine.low %v849_v25, %v857_v27 }
 0x145   : > { %3921 = vmatprep.subr.bf16.mxu1 %v8824_v44  ;;  %v8968_v44 = vcombine.high %v833_v34, %v841_v37 }
 0x146   : > { %3871 = vmatpush1.bf16.msra.mxu0 %v8567_v47  ;;  %v8711_v47 = vcombine.low %v577_v31, %v585_v33  ;;  %v738_v31 = vld [vmem:[#allocation5 + $0xaa0] sm:$0xff] }
 0x147   : > { %3872 = vmatprep.subr.bf16.mxu0 %v8552_v50  ;;  %v8696_v50 = vcombine.high %v561_v41, %v569_v42 }
 0x148   : > { %3922 = vmatpush1.bf16.msra.mxu1 %v8823_v49  ;;  %v8967_v49 = vcombine.low %v833_v34, %v841_v37 }
 0x149   : > { %3923 = vmatprep.subr.bf16.mxu1 %v8808_v54  ;;  %v8952_v54 = vcombine.high %v817_v43, %v825_v45 }
 0x14a   : > { %3873 = vmatpush1.bf16.msra.mxu0 %v8551_v56  ;;  %v8695_v56 = vcombine.low %v561_v41, %v569_v42 }
 0x14b   : > { %3874 = vmatprep.subr.bf16.mxu0 %v8536_v59  ;;  %v8951_v59 = vcombine.low %v817_v43, %v825_v45  ;;  %v474_v45 = vld [vmem:[#allocation5 + $0x260] sm:$0xff] }
 0x14c   : > { %3924 = vmatpush1.bf16.msra.mxu1 %v8807_v57  ;;  %v346_v57 = vlaneseq }
 0x14d   : > { %3925 = vmatprep.subr.bf16.mxu1 %v8792_v0  ;;  %v785_v0 = vld [vmem:[#allocation5 + $0xc18] sm:$0xff] }
 0x14e   : > { %3875 = vmatpush1.bf16.msra.mxu0 %v8535_v2  ;;  %v793_v2 = vld [vmem:[#allocation5 + $0xc58] sm:$0xff] }
 0x14f   : > { %3876 = vmatprep.subr.bf16.mxu0 %v8776_v4  ;;  %v10922_v4 = vshrl.u32 %v346_v57, 7  ;;  %v8919_v15 = vcombine.low %v785_v0, %v793_v2 }
 0x150   : > { %3926 = vmatpush1.bf16.msra.mxu1 %v8791_v3  ;;  %v8679_v3 = vcombine.low %v545_v51, %v553_v52 }
 0x151   : > { %3927 = vmatprep.subr.bf16.mxu1 %v9032_v8  ;;  %v522_v8 = vld [vmem:[#allocation5 + $0x3e0] sm:$0xff]  ;;  %v10927_v14 = vsub.s32 0, %v10922_v4  ;;  %v10930_v22 = vsub.s32 1, %v10922_v4 }
 0x152   : > { %3877 = vmatpush2.bf16.msra.mxu0 %v8775_v10  ;;  %v8920_v10 = vcombine.high %v785_v0, %v793_v2  ;;  %v450_v0 = vld [vmem:[#allocation5 + $0x1a0] sm:$0xff] }
 0x153   : > { %3878 = vmatprep.subr.bf16.mxu0 %v8760_v12  ;;  %v10924_v12 = vld [vmem:[#allocation7] sm:$0xff] }
 0x154   : > { %3928 = vmatpush2.bf16.msra.mxu1 %v9031_v11  ;;  %v778_v11 = vld [vmem:[#allocation5 + $0xbe0] sm:$0xff]  ;;  %v917_v25 = vrot.slane %v10924_v12, %v10927_v14  ;;  %v10936_v33 = vrot.slane %v10924_v12, %v10930_v22 }
 0x155   : > { %3929 = vmatprep.subr.bf16.mxu1 %v9016_v16  ;;  %v8650_v16 = vcombine.high %v514_v7, %v522_v8  ;;  %v8905_v27 = vcombine.low %v770_v9, %v778_v11  ;;  %v706_v2 = vld [vmem:[#allocation5 + $0x9a0] sm:$0xff] }
 0x156   : > { %3879 = vmatpush2.bf16.msra.mxu0 %v8759_v18  ;;  %v506_v18 = vld [vmem:[#allocation5 + $0x360] sm:$0xff] }
 0x157   : > { %3880 = vmatprep.subr.bf16.mxu0 %v8744_v21  ;;  %v8906_v21 = vcombine.high %v770_v9, %v778_v11 }
 0x158   : > { %3930 = vmatpush2.bf16.msra.mxu1 %v9015_v19  ;;  %v754_v19 = vld [vmem:[#allocation5 + $0xb20] sm:$0xff] }
 0x159   : > { %3931 = vmatprep.subr.bf16.mxu1 %v9000_v26  ;;  %v8649_v26 = vcombine.low %v514_v7, %v522_v8  ;;  %v8890_v34 = vcombine.high %v754_v19, %v762_v23  ;;  %v8889_v42 = vcombine.low %v754_v19, %v762_v23  ;;  %v714_v7 = vld [vmem:[#allocation5 + $0x9e0] sm:$0xff] }
 0x15a   : > { %3881 = vmatpush2.bf16.msra.mxu0 %v8743_v28  ;;  %v8634_v28 = vcombine.high %v498_v17, %v506_v18  ;;  %v434_v19 = vld [vmem:[#allocation5 + $0x120] sm:$0xff] }
 0x15b   : > { %3882 = vmatprep.subr.bf16.mxu0 %v8728_v30  ;;  %v490_v30 = vld [vmem:[#allocation5 + $0x2e0] sm:$0xff] }
 0x15c   : > { %3932 = vmatpush2.bf16.msra.mxu1 %v8999_v29  ;;  %v482_v29 = vld [vmem:[#allocation5 + $0x2a0] sm:$0xff] }
 0x15d   : > { %3933 = vmatprep.subr.bf16.mxu1 %v8984_v36  ;;  %v746_v36 = vld [vmem:[#allocation5 + $0xae0] sm:$0xff]  ;;  %v8618_v43 = vcombine.high %v482_v29, %v490_v30 }
 0x15e   : > { %3883 = vmatpush2.bf16.msra.mxu0 %v8727_v38  ;;  %v8874_v52 = vcombine.high %v738_v31, %v746_v36  ;;  %v8873_v61 = vcombine.low %v738_v31, %v746_v36  ;;  %v690_v23 = vld [vmem:[#allocation5 + $0x920] sm:$0xff] }
 0x15f   : > { %3884 = vmatprep.subr.bf16.mxu0 %v8712_v40  ;;  %v8633_v40 = vcombine.low %v498_v17, %v506_v18  ;;  %v8842_v18 = vcombine.high %v706_v2, %v714_v7 }
 0x160   : > { %3934 = vmatpush2.bf16.msra.mxu1 %v8983_v39 }
 0x161   : > { %3935 = vmatprep.subr.bf16.mxu1 %v8968_v44  ;;  %v466_v44 = vld [vmem:[#allocation5 + $0x220] sm:$0xff] }
 0x162   : > { %3885 = vmatpush2.bf16.msra.mxu0 %v8711_v47  ;;  %v722_v47 = vld [vmem:[#allocation5 + $0xa20] sm:$0xff]  ;;  %v8602_v62 = vcombine.high %v466_v44, %v474_v45  ;;  %v8601_v11 = vcombine.low %v466_v44, %v474_v45 }
 0x163   : > { %3886 = vmatprep.subr.bf16.mxu0 %v8696_v50  ;;  %v682_v45 = vld [vmem:[#allocation5 + $0x8e0] sm:$0xff] }
 0x164   : > { %3936 = vmatpush2.bf16.msra.mxu1 %v8967_v49 }
 0x165   : > { %3937 = vmatprep.subr.bf16.mxu1 %v8952_v54 }
 0x166   : > { %3887 = vmatpush2.bf16.msra.mxu0 %v8695_v56 }
 0x167   : > { %3888 = vmatprep.subr.bf16.mxu0 %v8680_v60 }
 0x168   : > { %3938 = vmatpush2.bf16.msra.mxu1 %v8951_v59  ;;  %v8617_v59 = vcombine.low %v482_v29, %v490_v30 }
 0x169   : > { %3939 = vmatprep.subr.bf16.mxu1 %v8936_v1  ;;  %v458_v1 = vld [vmem:[#allocation5 + $0x1e0] sm:$0xff] }
 0x16a   : > { %3889 = vmatpush2.bf16.msra.mxu0 %v8679_v3  ;;  %v8586_v17 = vcombine.high %v450_v0, %v458_v1 }
 0x16b   : > { %3890 = vmatprep.subr.bf16.mxu0 %v8664_v6  ;;  %v8858_v6 = vcombine.high %v722_v47, %v730_v53 }
 0x16c   : > { %3940 = vmatpush2.bf16.msra.mxu1 %v8935_v5 }
 0x16d   : > { %3941 = vmatprep.subr.bf16.mxu1 %v8920_v10 }
 0x16e   : > { %3891 = vmatpush2.bf16.msra.mxu0 %v8663_v13 }
 0x16f   : > { %3962 = vmatprep.subr.bf16.mxu0 %v8650_v16  ;;  %v8857_v16 = vcombine.low %v722_v47, %v730_v53  ;;  %v410_v53 = vld [vmem:[#allocation5 + $0x60] sm:$0xff] }
 0x170   : > { %3942 = vmatpush2.bf16.msra.mxu1 %v8919_v15 }
 0x171   : > { %4013 = vmatprep.subr.bf16.mxu1 %v8906_v21  ;;  %v3588_v37 = vpop.f32.mrf.mxu0  ;;  %3893 = vmatmul.mubr.bf16.vlgmr.msra.gmra.mxu0 %v10882_v20  ;;  %v442_v21 = vld [vmem:[#allocation5 + $0x160] sm:$0xff] }
 0x172   : > { %v3589_v38 = vadd.f32 %v3588_v37, %v917_v25  ;;  %3963 = vmatpush1.bf16.msra.mxu0 %v8649_v26  ;;  %3902 = vmatprep.mubr.bf16.mxu0 %v10888_v32 }
 0x173   : > { %v3639_v39 = vpop.f32.mrf.mxu1  ;;  %3944 = vmatmul.mubr.bf16.vlgmr.msra.gmra.mxu1 %v10885_v24  ;;  %v3590_v41 = vpop.f32.mrf.mxu0  ;;  %3964 = vmatprep.subr.bf16.mxu0 %v8634_v28  ;;  %v698_v28 = vld [vmem:[#allocation5 + $0x960] sm:$0xff] }
 0x174   : > { %4014 = vmatpush1.bf16.msra.mxu1 %v8905_v27  ;;  %v3640_v49 = vadd.f32 %v3639_v39, %v3589_v38  ;;  %v3591_v50 = vadd.f32 %v3590_v41, %v10936_v33  ;;  %3953 = vmatprep.mubr.bf16.mxu1 %v10891_v35  ;;  %v8841_v38 = vcombine.low %v706_v2, %v714_v7  ;;  %v426_v41 = vld [vmem:[#allocation5 + $0xe0] sm:$0xff] }
 0x175   : > { %v3641_v51 = vpop.f32.mrf.mxu1  ;;  %4015 = vmatprep.subr.bf16.mxu1 %v8890_v34  ;;  %v3592_v54 = vpop.f32.mrf.mxu0  ;;  %v8585_v34 = vcombine.low %v450_v0, %v458_v1  ;;  %v8570_v39 = vcombine.high %v434_v19, %v442_v21  ;;  %v8826_v44 = vcombine.high %v690_v23, %v698_v28  ;;  %v642_v0 = vld [vmem:[#allocation5 + $0x7a0] sm:$0xff] }
 0x176   : > { %v10943_v55 = vadd.f32 %v3641_v51, %v3591_v50  ;;  %v3593_v56 = vadd.f32 %v3592_v54, %v917_v25  ;;  %3965 = vmatpush1.bf16.msra.mxu0 %v8633_v40  ;;  %v4370_v9 = vmax.f32 %v3640_v49, 0.0  ;;  %v418_v40 = vld [vmem:[#allocation5 + $0xa0] sm:$0xff]  ;;  %v8569_v49 = vcombine.low %v434_v19, %v442_v21 }
 0x177   : > { %v3643_v57 = vpop.f32.mrf.mxu1  ;;  %v10945_v60 = vpop.f32.mrf.mxu0  ;;  %3966 = vmatprep.subr.bf16.mxu0 %v8618_v43  ;;  %v8825_v50 = vcombine.low %v690_v23, %v698_v28  ;;  %v8554_v51 = vcombine.high %v418_v40, %v426_v41  ;;  %v658_v54 = vld [vmem:[#allocation5 + $0x820] sm:$0xff] }
 0x178   : > { %4016 = vmatpush1.bf16.msra.mxu1 %v8889_v42  ;;  %v3644_v3 = vadd.f32 %v3643_v57, %v3593_v56  ;;  %v674_v42 = vld [vmem:[#allocation5 + $0x8a0] sm:$0xff] }
 0x179   : > { %v10947_v5 = vpop.f32.mrf.mxu1  ;;  %4017 = vmatprep.subr.bf16.mxu1 %v8874_v52  ;;  %v3598_v8 = vpop.f32.mrf.mxu0  ;;  %3903 = vmatmul.mubr.bf16.gmra.mxu0 %v10897_v46  ;;  %v402_v52 = vld [vmem:[#allocation5 + $0x20] sm:$0xff]  ;;  %v8810_v56 = vcombine.high %v674_v42, %v682_v45 }
 0x17a   : > { %v4386_v10 = vmax.f32 %v3644_v3, 0.0  ;;  %3967 = vmatpush1.bf16.msra.mxu0 %v8617_v59  ;;  %v3599_v13 = vadd.f32 %v3598_v8, %v917_v25  ;;  %3994 = vmatprep.mubr.bf16.mxu0 %v10870_v58  ;;  %v666_v57 = vld [vmem:[#allocation5 + $0x860] sm:$0xff]  ;;  %v8553_v59 = vcombine.low %v418_v40, %v426_v41  ;;  %v8537_v7 = vcombine.low %v402_v52, %v410_v53 }
 0x17b   : > { %v3649_v15 = vpop.f32.mrf.mxu1  ;;  %3954 = vmatmul.mubr.bf16.gmra.mxu1 %v10900_v48  ;;  %3968 = vmatprep.subr.bf16.mxu0 %v8602_v62  ;;  %v3600_v26 = vpop.f32.mrf.mxu0  ;;  %v8538_v62 = vcombine.high %v402_v52, %v410_v53  ;;  %v650_v1 = vld [vmem:[#allocation5 + $0x7e0] sm:$0xff]  ;;  %v8794_v3 = vcombine.high %v658_v54, %v666_v57  ;;  %v8793_v8 = vcombine.low %v658_v54, %v666_v57 }
 0x17c   : > { %4018 = vmatpush1.bf16.msra.mxu1 %v8873_v61  ;;  %v10951_v27 = vpack.c.bf16 %v4386_v10, %v4370_v9  ;;  %v3601_v29 = vadd.f32 %v3600_v26, %v10936_v33  ;;  %v10954_v30 = vadd.f32 %v3649_v15, %v3599_v13  ;;  %4045 = vmatprep.mubr.bf16.mxu1 %v10874_v63  ;;  %v898_v2 = vld [vmem:[#allocation5 + $0xfa0] sm:$0xff] }
 0x17d   : > { %4019 = vmatprep.subr.bf16.mxu1 %v8858_v6  ;;  %v3651_v25 = vpop.f32.mrf.mxu1  ;;  %v3602_v31 = vpop.f32.mrf.mxu0  ;;  %v8809_v61 = vcombine.low %v674_v42, %v682_v45  ;;  %v906_v6 = vld [vmem:[#allocation5 + $0xfe0] sm:$0xff]  ;;  %v8778_v9 = vcombine.high %v642_v0, %v650_v1 }
 0x17e   : > { %3969 = vmatpush1.bf16.msra.mxu0 %v8601_v11  ;;  %v10958_v36 = vadd.f32 %v3651_v25, %v3601_v29  ;;  %v626_v10 = vld [vmem:[#allocation5 + $0x720] sm:$0xff]  ;;  %v9034_v15 = vcombine.high %v898_v2, %v906_v6 }
 0x17f   : > { %v3653_v37 = vpop.f32.mrf.mxu1  ;;  %3970 = vmatprep.subr.bf16.mxu0 %v8586_v17  ;;  %v3603_v43 = vpop.f32.mrf.mxu0  ;;  %v634_v11 = vld [vmem:[#allocation5 + $0x760] sm:$0xff]  ;;  %v8777_v17 = vcombine.low %v642_v0, %v650_v1 }
 0x180   : > { %4020 = vmatpush1.bf16.msra.mxu1 %v8857_v16  ;;  %v882_v13 = vld [vmem:[#allocation5 + $0xf20] sm:$0xff]  ;;  %v8762_v19 = vcombine.high %v626_v10, %v634_v11  ;;  %v8761_v25 = vcombine.low %v626_v10, %v634_v11 }
 0x181   : > { %4021 = vmatprep.subr.bf16.mxu1 %v8842_v18  ;;  %v3654_v47 = vpop.f32.mrf.mxu1  ;;  %v890_v16 = vld [vmem:[#allocation5 + $0xf60] sm:$0xff]  ;;  %v9033_v18 = vcombine.low %v898_v2, %v906_v6 }
 0x182   : > { %3971 = vmatpush1.bf16.msra.mxu0 %v8585_v34  ;;  %v610_v21 = vld [vmem:[#allocation5 + $0x6a0] sm:$0xff]  ;;  %v9018_v28 = vcombine.high %v882_v13, %v890_v16  ;;  %v9017_v31 = vcombine.low %v882_v13, %v890_v16 }
 0x183   : > { %3972 = vmatprep.subr.bf16.mxu0 %v8570_v39  ;;  %v618_v23 = vld [vmem:[#allocation5 + $0x6e0] sm:$0xff] }
 0x184   : > { %4022 = vmatpush1.bf16.msra.mxu1 %v8841_v38  ;;  %v866_v26 = vld [vmem:[#allocation5 + $0xea0] sm:$0xff]  ;;  %v8746_v34 = vcombine.high %v610_v21, %v618_v23  ;;  %v8745_v42 = vcombine.low %v610_v21, %v618_v23 }
 0x185   : > { %4023 = vmatprep.subr.bf16.mxu1 %v8826_v44  ;;  %v874_v29 = vld [vmem:[#allocation5 + $0xee0] sm:$0xff] }
 0x186   : > { %3973 = vmatpush1.bf16.msra.mxu0 %v8569_v49  ;;  %v594_v37 = vld [vmem:[#allocation5 + $0x620] sm:$0xff]  ;;  %v9002_v40 = vcombine.high %v866_v26, %v874_v29  ;;  %v9001_v43 = vcombine.low %v866_v26, %v874_v29  ;;  %v523_v29 = vld [vmem:[#allocation5 + $0x3e8] sm:$0xff] }
 0x187   : > { %3974 = vmatprep.subr.bf16.mxu0 %v8554_v51  ;;  %v602_v38 = vld [vmem:[#allocation5 + $0x660] sm:$0xff] }
 0x188   : > { %4024 = vmatpush1.bf16.msra.mxu1 %v8825_v50  ;;  %v850_v39 = vld [vmem:[#allocation5 + $0xe20] sm:$0xff]  ;;  %v8730_v44 = vcombine.high %v594_v37, %v602_v38  ;;  %v8729_v52 = vcombine.low %v594_v37, %v602_v38  ;;  %v10961_v38 = vsub.s32 2, %v10922_v4 }
 0x189   : > { %4025 = vmatprep.subr.bf16.mxu1 %v8810_v56  ;;  %v858_v41 = vld [vmem:[#allocation5 + $0xe60] sm:$0xff] }
 0x18a   : > { %3975 = vmatpush1.bf16.msra.mxu0 %v8553_v59  ;;  %v578_v45 = vld [vmem:[#allocation5 + $0x5a0] sm:$0xff]  ;;  %v8986_v50 = vcombine.high %v850_v39, %v858_v41  ;;  %v8985_v53 = vcombine.low %v850_v39, %v858_v41  ;;  %v499_v41 = vld [vmem:[#allocation5 + $0x328] sm:$0xff] }
 0x18b   : > { %3976 = vmatprep.subr.bf16.mxu0 %v8538_v62  ;;  %v586_v47 = vld [vmem:[#allocation5 + $0x5e0] sm:$0xff] }
 0x18c   : > { %4026 = vmatpush1.bf16.msra.mxu1 %v8809_v61  ;;  %v834_v49 = vld [vmem:[#allocation5 + $0xda0] sm:$0xff]  ;;  %v8714_v54 = vcombine.high %v578_v45, %v586_v47  ;;  %v8713_v0 = vcombine.low %v578_v45, %v586_v47  ;;  %v10964_v45 = vsub.s32 3, %v10922_v4  ;;  %v763_v47 = vld [vmem:[#allocation5 + $0xb68] sm:$0xff] }
 0x18d   : > { %4027 = vmatprep.subr.bf16.mxu1 %v8794_v3  ;;  %v842_v51 = vld [vmem:[#allocation5 + $0xde0] sm:$0xff] }
 0x18e   : > { %3977 = vmatpush1.bf16.msra.mxu0 %v8537_v7  ;;  %v562_v56 = vld [vmem:[#allocation5 + $0x520] sm:$0xff]  ;;  %v8970_v61 = vcombine.high %v834_v49, %v842_v51  ;;  %v8969_v1 = vcombine.low %v834_v49, %v842_v51  ;;  %v925_v49 = vrot.slane %v10924_v12, %v10961_v38 }
 0x18f   : > { %3978 = vmatprep.subr.bf16.mxu0 %v8778_v9  ;;  %v570_v57 = vld [vmem:[#allocation5 + $0x560] sm:$0xff] }
 0x190   : > { %4028 = vmatpush1.bf16.msra.mxu1 %v8793_v8  ;;  %v818_v59 = vld [vmem:[#allocation5 + $0xd20] sm:$0xff]  ;;  %v8698_v2 = vcombine.high %v562_v56, %v570_v57  ;;  %v8697_v10 = vcombine.low %v562_v56, %v570_v57  ;;  %v739_v56 = vld [vmem:[#allocation5 + $0xaa8] sm:$0xff]  ;;  %v10970_v57 = vrot.slane %v10924_v12, %v10964_v45 }
 0x191   : > { %4029 = vmatprep.subr.bf16.mxu1 %v9034_v15  ;;  %v826_v62 = vld [vmem:[#allocation5 + $0xd60] sm:$0xff] }
 0x192   : > { %3979 = vmatpush2.bf16.msra.mxu0 %v8777_v17  ;;  %v546_v3 = vld [vmem:[#allocation5 + $0x4a0] sm:$0xff]  ;;  %v8954_v8 = vcombine.high %v818_v59, %v826_v62  ;;  %v8953_v11 = vcombine.low %v818_v59, %v826_v62 }
 0x193   : > { %3980 = vmatprep.subr.bf16.mxu0 %v8762_v19  ;;  %v554_v6 = vld [vmem:[#allocation5 + $0x4e0] sm:$0xff] }
 0x194   : > { %4030 = vmatpush2.bf16.msra.mxu1 %v9033_v18  ;;  %v802_v7 = vld [vmem:[#allocation5 + $0xca0] sm:$0xff]  ;;  %v8682_v13 = vcombine.high %v546_v3, %v554_v6  ;;  %v8681_v21 = vcombine.low %v546_v3, %v554_v6 }
 0x195   : > { %4031 = vmatprep.subr.bf16.mxu1 %v9018_v28  ;;  %v810_v9 = vld [vmem:[#allocation5 + $0xce0] sm:$0xff]  ;;  %v515_v28 = vld [vmem:[#allocation5 + $0x3a8] sm:$0xff] }
 0x196   : > { %3981 = vmatpush2.bf16.msra.mxu0 %v8761_v25  ;;  %v530_v15 = vld [vmem:[#allocation5 + $0x420] sm:$0xff]  ;;  %v8938_v18 = vcombine.high %v802_v7, %v810_v9  ;;  %v8937_v23 = vcombine.low %v802_v7, %v810_v9  ;;  %v771_v25 = vld [vmem:[#allocation5 + $0xba8] sm:$0xff] }
 0x197   : > { %3982 = vmatprep.subr.bf16.mxu0 %v8746_v34  ;;  %v538_v16 = vld [vmem:[#allocation5 + $0x460] sm:$0xff]  ;;  %v779_v34 = vld [vmem:[#allocation5 + $0xbe8] sm:$0xff] }
 0x198   : > { %4032 = vmatpush2.bf16.msra.mxu1 %v9017_v31  ;;  %v786_v17 = vld [vmem:[#allocation5 + $0xc20] sm:$0xff]  ;;  %v8666_v26 = vcombine.high %v530_v15, %v538_v16  ;;  %v8665_v37 = vcombine.low %v530_v15, %v538_v16  ;;  %v8907_v51 = vcombine.low %v771_v25, %v779_v34  ;;  %v723_v16 = vld [vmem:[#allocation5 + $0xa28] sm:$0xff] }
 0x199   : > { %4033 = vmatprep.subr.bf16.mxu1 %v9002_v40  ;;  %v794_v19 = vld [vmem:[#allocation5 + $0xc60] sm:$0xff]  ;;  %v8652_v40 = vcombine.high %v515_v28, %v523_v29 }
 0x19a   : > { %3983 = vmatpush2.bf16.msra.mxu0 %v8745_v42  ;;  %v8922_v31 = vcombine.high %v786_v17, %v794_v19  ;;  %v8921_v39 = vcombine.low %v786_v17, %v794_v19  ;;  %v507_v42 = vld [vmem:[#allocation5 + $0x368] sm:$0xff] }
 0x19b   : > { %3984 = vmatprep.subr.bf16.mxu0 %v8730_v44  ;;  %v8908_v44 = vcombine.high %v771_v25, %v779_v34  ;;  %v731_v17 = vld [vmem:[#allocation5 + $0xa68] sm:$0xff] }
 0x19c   : > { %4034 = vmatpush2.bf16.msra.mxu1 %v9001_v43  ;;  %v755_v43 = vld [vmem:[#allocation5 + $0xb28] sm:$0xff] }
 0x19d   : > { %4035 = vmatprep.subr.bf16.mxu1 %v8986_v50  ;;  %v8651_v50 = vcombine.low %v515_v28, %v523_v29  ;;  %v8892_v59 = vcombine.high %v755_v43, %v763_v47  ;;  %v8891_v6 = vcombine.low %v755_v43, %v763_v47  ;;  %v451_v25 = vld [vmem:[#allocation5 + $0x1a8] sm:$0xff] }
 0x19e   : > { %3985 = vmatpush2.bf16.msra.mxu0 %v8729_v52  ;;  %v8636_v52 = vcombine.high %v499_v41, %v507_v42 }
 0x19f   : > { %3986 = vmatprep.subr.bf16.mxu0 %v8714_v54  ;;  %v491_v54 = vld [vmem:[#allocation5 + $0x2e8] sm:$0xff] }
 0x1a0   : > { %4036 = vmatpush2.bf16.msra.mxu1 %v8985_v53  ;;  %v483_v53 = vld [vmem:[#allocation5 + $0x2a8] sm:$0xff] }
 0x1a1   : > { %4037 = vmatprep.subr.bf16.mxu1 %v8970_v61  ;;  %v747_v61 = vld [vmem:[#allocation5 + $0xae8] sm:$0xff]  ;;  %v8620_v7 = vcombine.high %v483_v53, %v491_v54 }
 0x1a2   : > { %3987 = vmatpush2.bf16.msra.mxu0 %v8713_v0  ;;  %v8875_v28 = vcombine.low %v739_v56, %v747_v61 }
 0x1a3   : > { %3988 = vmatprep.subr.bf16.mxu0 %v8698_v2  ;;  %v8635_v2 = vcombine.low %v499_v41, %v507_v42  ;;  %v715_v41 = vld [vmem:[#allocation5 + $0x9e8] sm:$0xff] }
 0x1a4   : > { %4038 = vmatpush2.bf16.msra.mxu1 %v8969_v1 }
 0x1a5   : > { %4039 = vmatprep.subr.bf16.mxu1 %v8954_v8  ;;  %v467_v8 = vld [vmem:[#allocation5 + $0x228] sm:$0xff] }
 0x1a6   : > { %3989 = vmatpush2.bf16.msra.mxu0 %v8697_v10 }
 0x1a7   : > { %3990 = vmatprep.subr.bf16.mxu0 %v8682_v13  ;;  %v475_v13 = vld [vmem:[#allocation5 + $0x268] sm:$0xff] }
 0x1a8   : > { %4040 = vmatpush2.bf16.msra.mxu1 %v8953_v11  ;;  %v8876_v11 = vcombine.high %v739_v56, %v747_v61  ;;  %v8604_v29 = vcombine.high %v467_v8, %v475_v13  ;;  %v8603_v47 = vcombine.low %v467_v8, %v475_v13  ;;  %v435_v61 = vld [vmem:[#allocation5 + $0x128] sm:$0xff] }
 0x1a9   : > { %4041 = vmatprep.subr.bf16.mxu1 %v8938_v18 }
 0x1aa   : > { %3991 = vmatpush2.bf16.msra.mxu0 %v8681_v21 }
 0x1ab   : > { %3992 = vmatprep.subr.bf16.mxu0 %v8666_v26 }
 0x1ac   : > { %4042 = vmatpush2.bf16.msra.mxu1 %v8937_v23  ;;  %v8619_v23 = vcombine.low %v483_v53, %v491_v54 }
 0x1ad   : > { %4043 = vmatprep.subr.bf16.mxu1 %v8922_v31 }
 0x1ae   : > { %3993 = vmatpush2.bf16.msra.mxu0 %v8665_v37  ;;  %v8860_v37 = vcombine.high %v723_v16, %v731_v17 }
 0x1af   : > { %4064 = vmatprep.subr.bf16.mxu0 %v8652_v40  ;;  %v707_v40 = vld [vmem:[#allocation5 + $0x9a8] sm:$0xff] }
 0x1b0   : > { %4044 = vmatpush2.bf16.msra.mxu1 %v8921_v39  ;;  %v459_v39 = vld [vmem:[#allocation5 + $0x1e8] sm:$0xff]  ;;  %v8844_v54 = vcombine.high %v707_v40, %v715_v41 }
 0x1b1   : > { %4115 = vmatprep.subr.bf16.mxu1 %v8908_v44  ;;  %v3690_v62 = vpop.f32.mrf.mxu0  ;;  %3995 = vmatmul.mubr.bf16.vlgmr.msra.gmra.mxu0 %v10882_v20  ;;  %v8588_v53 = vcombine.high %v451_v25, %v459_v39 }
 0x1b2   : > { %v3691_v0 = vadd.f32 %v3690_v62, %v925_v49  ;;  %4065 = vmatpush1.bf16.msra.mxu0 %v8651_v50  ;;  %4004 = vmatprep.mubr.bf16.mxu0 %v10888_v32  ;;  %v443_v62 = vld [vmem:[#allocation5 + $0x168] sm:$0xff] }
 0x1b3   : > { %v3741_v1 = vpop.f32.mrf.mxu1  ;;  %4046 = vmatmul.mubr.bf16.vlgmr.msra.gmra.mxu1 %v10885_v24  ;;  %v3692_v3 = vpop.f32.mrf.mxu0  ;;  %4066 = vmatprep.subr.bf16.mxu0 %v8636_v52  ;;  %v8859_v52 = vcombine.low %v723_v16, %v731_v17  ;;  %v427_v16 = vld [vmem:[#allocation5 + $0xe8] sm:$0xff] }
 0x1b4   : > { %4116 = vmatpush1.bf16.msra.mxu1 %v8907_v51  ;;  %v3742_v9 = vadd.f32 %v3741_v1, %v3691_v0  ;;  %v3693_v12 = vadd.f32 %v3692_v3, %v10970_v57  ;;  %4055 = vmatprep.mubr.bf16.mxu1 %v10891_v35  ;;  %v699_v3 = vld [vmem:[#allocation5 + $0x968] sm:$0xff] }
 0x1b5   : > { %v3743_v10 = vpop.f32.mrf.mxu1  ;;  %4117 = vmatprep.subr.bf16.mxu1 %v8892_v59  ;;  %v3694_v15 = vpop.f32.mrf.mxu0 }
 0x1b6   : > { %v10977_v18 = vadd.f32 %v3743_v10, %v3693_v12  ;;  %v3695_v19 = vadd.f32 %v3694_v15, %v925_v49  ;;  %4067 = vmatpush1.bf16.msra.mxu0 %v8635_v2  ;;  %v4372_v43 = vmax.f32 %v3742_v9, 0.0  ;;  %v8843_v12 = vcombine.low %v707_v40, %v715_v41  ;;  %v419_v15 = vld [vmem:[#allocation5 + $0xa8] sm:$0xff] }
 0x1b7   : > { %v3745_v21 = vpop.f32.mrf.mxu1  ;;  %v10979_v26 = vpop.f32.mrf.mxu0  ;;  %4068 = vmatprep.subr.bf16.mxu0 %v8620_v7  ;;  %v8587_v7 = vcombine.low %v451_v25, %v459_v39  ;;  %v8572_v10 = vcombine.high %v435_v61, %v443_v62  ;;  %v659_v39 = vld [vmem:[#allocation5 + $0x828] sm:$0xff]  ;;  %v8555_v41 = vcombine.low %v419_v15, %v427_v16 }
 0x1b8   : > { %4118 = vmatpush1.bf16.msra.mxu1 %v8891_v6  ;;  %v3746_v31 = vadd.f32 %v3745_v21, %v3695_v19  ;;  %v675_v19 = vld [vmem:[#allocation5 + $0x8a8] sm:$0xff] }
 0x1b9   : > { %v10981_v34 = vpop.f32.mrf.mxu1  ;;  %4119 = vmatprep.subr.bf16.mxu1 %v8876_v11  ;;  %v3700_v42 = vpop.f32.mrf.mxu0  ;;  %4005 = vmatmul.mubr.bf16.gmra.mxu0 %v10897_v46  ;;  %v683_v21 = vld [vmem:[#allocation5 + $0x8e8] sm:$0xff] }
 0x1ba   : > { %v4388_v44 = vmax.f32 %v3746_v31, 0.0  ;;  %4069 = vmatpush1.bf16.msra.mxu0 %v8619_v23  ;;  %v3701_v50 = vadd.f32 %v3700_v42, %v925_v49  ;;  %4096 = vmatprep.mubr.bf16.mxu0 %v10870_v58  ;;  %v691_v49 = vld [vmem:[#allocation5 + $0x928] sm:$0xff]  ;;  %v8571_v23 = vcombine.low %v435_v61, %v443_v62  ;;  %v8812_v25 = vcombine.high %v675_v19, %v683_v21 }
 0x1bb   : > { %v3751_v51 = vpop.f32.mrf.mxu1  ;;  %4056 = vmatmul.mubr.bf16.gmra.mxu1 %v10900_v48  ;;  %4070 = vmatprep.subr.bf16.mxu0 %v8604_v29  ;;  %v3702_v56 = vpop.f32.mrf.mxu0  ;;  %v8828_v13 = vcombine.high %v691_v49, %v699_v3  ;;  %v8556_v29 = vcombine.high %v419_v15, %v427_v16  ;;  %v403_v31 = vld [vmem:[#allocation5 + $0x28] sm:$0xff]  ;;  %v8811_v42 = vcombine.low %v675_v19, %v683_v21 }
 0x1bc   : > { %4120 = vmatpush1.bf16.msra.mxu1 %v8875_v28  ;;  %v10985_v59 = vpack.c.bf16 %v4388_v44, %v4372_v43  ;;  %v3703_v0 = vadd.f32 %v3702_v56, %v10970_v57  ;;  %v10988_v1 = vadd.f32 %v3751_v51, %v3701_v50  ;;  %4147 = vmatprep.mubr.bf16.mxu1 %v10874_v63  ;;  %v667_v40 = vld [vmem:[#allocation5 + $0x868] sm:$0xff] }
 0x1bd   : > { %4121 = vmatprep.subr.bf16.mxu1 %v8860_v37  ;;  %v3753_v2 = vpop.f32.mrf.mxu1  ;;  %v3704_v6 = vpop.f32.mrf.mxu0  ;;  %v8827_v28 = vcombine.low %v691_v49, %v699_v3  ;;  %v411_v37 = vld [vmem:[#allocation5 + $0x68] sm:$0xff]  ;;  %v8796_v44 = vcombine.high %v659_v39, %v667_v40 }
 0x1be   : > { %4071 = vmatpush1.bf16.msra.mxu0 %v8603_v47  ;;  %v10992_v8 = vadd.f32 %v3753_v2, %v3703_v0  ;;  %v8540_v43 = vcombine.high %v403_v31, %v411_v37  ;;  %v643_v47 = vld [vmem:[#allocation5 + $0x7a8] sm:$0xff] }
 0x1bf   : > { %v3755_v9 = vpop.f32.mrf.mxu1  ;;  %4072 = vmatprep.subr.bf16.mxu0 %v8588_v53  ;;  %v3705_v11 = vpop.f32.mrf.mxu0  ;;  %v651_v50 = vld [vmem:[#allocation5 + $0x7e8] sm:$0xff]  ;;  %v8539_v53 = vcombine.low %v403_v31, %v411_v37 }
 0x1c0   : > { %4122 = vmatpush1.bf16.msra.mxu1 %v8859_v52  ;;  %v899_v51 = vld [vmem:[#allocation5 + $0xfa8] sm:$0xff]  ;;  %v8780_v56 = vcombine.high %v643_v47, %v651_v50  ;;  %v8779_v3 = vcombine.low %v643_v47, %v651_v50 }
 0x1c1   : > { %4123 = vmatprep.subr.bf16.mxu1 %v8844_v54  ;;  %v3756_v17 = vpop.f32.mrf.mxu1  ;;  %v907_v52 = vld [vmem:[#allocation5 + $0xfe8] sm:$0xff]  ;;  %v8795_v54 = vcombine.low %v659_v39, %v667_v40 }
 0x1c2   : > { %4073 = vmatpush1.bf16.msra.mxu0 %v8587_v7  ;;  %v9036_v61 = vcombine.high %v899_v51, %v907_v52  ;;  %v627_v62 = vld [vmem:[#allocation5 + $0x728] sm:$0xff]  ;;  %v9035_v6 = vcombine.low %v899_v51, %v907_v52 }
 0x1c3   : > { %4074 = vmatprep.subr.bf16.mxu0 %v8572_v10  ;;  %v635_v0 = vld [vmem:[#allocation5 + $0x768] sm:$0xff] }
 0x1c4   : > { %4124 = vmatpush1.bf16.msra.mxu1 %v8843_v12  ;;  %v883_v2 = vld [vmem:[#allocation5 + $0xf28] sm:$0xff]  ;;  %v8764_v7 = vcombine.high %v627_v62, %v635_v0  ;;  %v8763_v15 = vcombine.low %v627_v62, %v635_v0 }
 0x1c5   : > { %4125 = vmatprep.subr.bf16.mxu1 %v8828_v13  ;;  %v891_v49 = vld [vmem:[#allocation5 + $0xf68] sm:$0xff] }
 0x1c6   : > { %4075 = vmatpush1.bf16.msra.mxu0 %v8571_v23  ;;  %v9020_v9 = vcombine.high %v883_v2, %v891_v49  ;;  %v611_v12 = vld [vmem:[#allocation5 + $0x6a8] sm:$0xff]  ;;  %v9019_v16 = vcombine.low %v883_v2, %v891_v49 }
 0x1c7   : > { %4076 = vmatprep.subr.bf16.mxu0 %v8556_v29  ;;  %v619_v10 = vld [vmem:[#allocation5 + $0x6e8] sm:$0xff] }
 0x1c8   : > { %4126 = vmatpush1.bf16.msra.mxu1 %v8827_v28  ;;  %v867_v11 = vld [vmem:[#allocation5 + $0xea8] sm:$0xff]  ;;  %v8748_v17 = vcombine.high %v611_v12, %v619_v10 }
 0x1c9   : > { %4127 = vmatprep.subr.bf16.mxu1 %v8812_v25  ;;  %v875_v13 = vld [vmem:[#allocation5 + $0xee8] sm:$0xff]  ;;  %v8747_v25 = vcombine.low %v611_v12, %v619_v10 }
 0x1ca   : > { %4077 = vmatpush1.bf16.msra.mxu0 %v8555_v41  ;;  %v9004_v19 = vcombine.high %v867_v11, %v875_v13  ;;  %v595_v21 = vld [vmem:[#allocation5 + $0x628] sm:$0xff]  ;;  %v9003_v31 = vcombine.low %v867_v11, %v875_v13 }
 0x1cb   : > { %4078 = vmatprep.subr.bf16.mxu0 %v8540_v43  ;;  %v603_v23 = vld [vmem:[#allocation5 + $0x668] sm:$0xff] }
 0x1cc   : > { %4128 = vmatpush1.bf16.msra.mxu1 %v8811_v42  ;;  %v851_v28 = vld [vmem:[#allocation5 + $0xe28] sm:$0xff]  ;;  %v8732_v37 = vcombine.high %v595_v21, %v603_v23 }
 0x1cd   : > { %4129 = vmatprep.subr.bf16.mxu1 %v8796_v44  ;;  %v859_v29 = vld [vmem:[#allocation5 + $0xe68] sm:$0xff]  ;;  %v8731_v44 = vcombine.low %v595_v21, %v603_v23 }
 0x1ce   : > { %4079 = vmatpush1.bf16.msra.mxu0 %v8539_v53  ;;  %v8988_v39 = vcombine.high %v851_v28, %v859_v29  ;;  %v579_v40 = vld [vmem:[#allocation5 + $0x5a8] sm:$0xff]  ;;  %v8987_v47 = vcombine.low %v851_v28, %v859_v29  ;;  %v516_v29 = vld [vmem:[#allocation5 + $0x3b0] sm:$0xff] }
 0x1cf   : > { %4080 = vmatprep.subr.bf16.mxu0 %v8780_v56  ;;  %v587_v41 = vld [vmem:[#allocation5 + $0x5e8] sm:$0xff] }
 0x1d0   : > { %4130 = vmatpush1.bf16.msra.mxu1 %v8795_v54  ;;  %v835_v42 = vld [vmem:[#allocation5 + $0xda8] sm:$0xff]  ;;  %v8716_v50 = vcombine.high %v579_v40, %v587_v41 }
 0x1d1   : > { %4131 = vmatprep.subr.bf16.mxu1 %v9036_v61  ;;  %v843_v43 = vld [vmem:[#allocation5 + $0xde8] sm:$0xff]  ;;  %v8715_v61 = vcombine.low %v579_v40, %v587_v41  ;;  %v932_v40 = vsub.s32 4, %v10922_v4 }
 0x1d2   : > { %4081 = vmatpush2.bf16.msra.mxu0 %v8779_v3  ;;  %v8972_v51 = vcombine.high %v835_v42, %v843_v43  ;;  %v563_v52 = vld [vmem:[#allocation5 + $0x528] sm:$0xff]  ;;  %v8971_v62 = vcombine.low %v835_v42, %v843_v43 }
 0x1d3   : > { %4082 = vmatprep.subr.bf16.mxu0 %v8764_v7  ;;  %v571_v53 = vld [vmem:[#allocation5 + $0x568] sm:$0xff] }
 0x1d4   : > { %4132 = vmatpush2.bf16.msra.mxu1 %v9035_v6  ;;  %v819_v54 = vld [vmem:[#allocation5 + $0xd28] sm:$0xff]  ;;  %v8700_v0 = vcombine.high %v563_v52, %v571_v53 }
 0x1d5   : > { %4133 = vmatprep.subr.bf16.mxu1 %v9020_v9  ;;  %v827_v56 = vld [vmem:[#allocation5 + $0xd68] sm:$0xff]  ;;  %v8699_v9 = vcombine.low %v563_v52, %v571_v53  ;;  %v764_v52 = vld [vmem:[#allocation5 + $0xb70] sm:$0xff]  ;;  %v10996_v53 = vld [vmem:[#allocation7] sm:$0xff] }
 0x1d6   : > { %4083 = vmatpush2.bf16.msra.mxu0 %v8763_v15  ;;  %v8956_v2 = vcombine.high %v819_v54, %v827_v56  ;;  %v547_v49 = vld [vmem:[#allocation5 + $0x4a8] sm:$0xff]  ;;  %v8955_v12 = vcombine.low %v819_v54, %v827_v56  ;;  %v11001_v54 = vrot.slane %v10996_v53, %v932_v40 }
 0x1d7   : > { %4084 = vmatprep.subr.bf16.mxu0 %v8748_v17  ;;  %v555_v3 = vld [vmem:[#allocation5 + $0x4e8] sm:$0xff] }
 0x1d8   : > { %4134 = vmatpush2.bf16.msra.mxu1 %v9019_v16  ;;  %v803_v6 = vld [vmem:[#allocation5 + $0xca8] sm:$0xff]  ;;  %v8684_v10 = vcombine.high %v547_v49, %v555_v3 }
 0x1d9   : > { %4135 = vmatprep.subr.bf16.mxu1 %v9004_v19  ;;  %v811_v7 = vld [vmem:[#allocation5 + $0xce8] sm:$0xff]  ;;  %v8683_v19 = vcombine.low %v547_v49, %v555_v3  ;;  %v484_v49 = vld [vmem:[#allocation5 + $0x2b0] sm:$0xff] }
 0x1da   : > { %4085 = vmatpush2.bf16.msra.mxu0 %v8747_v25  ;;  %v8940_v11 = vcombine.high %v803_v6, %v811_v7  ;;  %v531_v13 = vld [vmem:[#allocation5 + $0x428] sm:$0xff]  ;;  %v8939_v21 = vcombine.low %v803_v6, %v811_v7  ;;  %v524_v25 = vld [vmem:[#allocation5 + $0x3f0] sm:$0xff] }
 0x1db   : > { %4086 = vmatprep.subr.bf16.mxu0 %v8732_v37  ;;  %v539_v15 = vld [vmem:[#allocation5 + $0x468] sm:$0xff]  ;;  %v780_v37 = vld [vmem:[#allocation5 + $0xbf0] sm:$0xff]  ;;  %v8654_v42 = vcombine.high %v516_v29, %v524_v25  ;;  %v8653_v56 = vcombine.low %v516_v29, %v524_v25 }
 0x1dc   : > { %4136 = vmatpush2.bf16.msra.mxu1 %v9003_v31  ;;  %v787_v16 = vld [vmem:[#allocation5 + $0xc28] sm:$0xff]  ;;  %v8668_v23 = vcombine.high %v531_v13, %v539_v15  ;;  %v772_v31 = vld [vmem:[#allocation5 + $0xbb0] sm:$0xff] }
 0x1dd   : > { %4137 = vmatprep.subr.bf16.mxu1 %v8988_v39  ;;  %v795_v17 = vld [vmem:[#allocation5 + $0xc68] sm:$0xff]  ;;  %v8667_v39 = vcombine.low %v531_v13, %v539_v15  ;;  %v8910_v43 = vcombine.high %v772_v31, %v780_v37  ;;  %v492_v3 = vld [vmem:[#allocation5 + $0x2f0] sm:$0xff] }
 0x1de   : > { %4087 = vmatpush2.bf16.msra.mxu0 %v8731_v44  ;;  %v8924_v28 = vcombine.high %v787_v16, %v795_v17  ;;  %v8923_v41 = vcombine.low %v787_v16, %v795_v17  ;;  %v11481_v44 = vsub.s32 5, %v10922_v4  ;;  %v740_v7 = vld [vmem:[#allocation5 + $0xab0] sm:$0xff]  ;;  %v8622_v16 = vcombine.high %v484_v49, %v492_v3 }
 0x1df   : > { %4088 = vmatprep.subr.bf16.mxu0 %v8716_v50  ;;  %v508_v50 = vld [vmem:[#allocation5 + $0x370] sm:$0xff] }
 0x1e0   : > { %4138 = vmatpush2.bf16.msra.mxu1 %v8987_v47  ;;  %v500_v47 = vld [vmem:[#allocation5 + $0x330] sm:$0xff] }
 0x1e1   : > { %4139 = vmatprep.subr.bf16.mxu1 %v8972_v51  ;;  %v756_v51 = vld [vmem:[#allocation5 + $0xb30] sm:$0xff] }
 0x1e2   : > { %4089 = vmatpush2.bf16.msra.mxu0 %v8715_v61  ;;  %v8909_v61 = vcombine.low %v772_v31, %v780_v37  ;;  %v8893_v15 = vcombine.low %v756_v51, %v764_v52  ;;  %v476_v29 = vld [vmem:[#allocation5 + $0x270] sm:$0xff] }
 0x1e3   : > { %4090 = vmatprep.subr.bf16.mxu0 %v8700_v0  ;;  %v11006_v0 = vrot.slane %v10996_v53, %v11481_v44  ;;  %v724_v31 = vld [vmem:[#allocation5 + $0xa30] sm:$0xff]  ;;  %v709_v44 = vld [vmem:[#allocation5 + $0x9b8] sm:$0xff] }
 0x1e4   : > { %4140 = vmatpush2.bf16.msra.mxu1 %v8971_v62  ;;  %v8638_v62 = vcombine.high %v500_v47, %v508_v50  ;;  %v732_v37 = vld [vmem:[#allocation5 + $0xa70] sm:$0xff] }
 0x1e5   : > { %4141 = vmatprep.subr.bf16.mxu1 %v8956_v2  ;;  %v8894_v2 = vcombine.high %v756_v51, %v764_v52  ;;  %v452_v52 = vld [vmem:[#allocation5 + $0x1b0] sm:$0xff] }
 0x1e6   : > { %4091 = vmatpush2.bf16.msra.mxu0 %v8699_v9  ;;  %v748_v9 = vld [vmem:[#allocation5 + $0xaf0] sm:$0xff] }
 0x1e7   : > { %4092 = vmatprep.subr.bf16.mxu0 %v8684_v10 }
 0x1e8   : > { %4142 = vmatpush2.bf16.msra.mxu1 %v8955_v12 }
 0x1e9   : > { %4143 = vmatprep.subr.bf16.mxu1 %v8940_v11  ;;  %v8637_v11 = vcombine.low %v500_v47, %v508_v50  ;;  %v8877_v50 = vcombine.low %v740_v7, %v748_v9 }
 0x1ea   : > { %4093 = vmatpush2.bf16.msra.mxu0 %v8683_v19 }
 0x1eb   : > { %4094 = vmatprep.subr.bf16.mxu0 %v8668_v23  ;;  %v8878_v23 = vcombine.high %v740_v7, %v748_v9 }
 0x1ec   : > { %4144 = vmatpush2.bf16.msra.mxu1 %v8939_v21 }
 0x1ed   : > { %4145 = vmatprep.subr.bf16.mxu1 %v8924_v28  ;;  %v468_v28 = vld [vmem:[#allocation5 + $0x230] sm:$0xff] }
 0x1ee   : > { %4095 = vmatpush2.bf16.msra.mxu0 %v8667_v39  ;;  %v8606_v51 = vcombine.high %v468_v28, %v476_v29 }
 0x1ef   : > { %4166 = vmatprep.subr.bf16.mxu0 %v8654_v42 }
 0x1f0   : > { %4146 = vmatpush2.bf16.msra.mxu1 %v8923_v41 }
 0x1f1   : > { %4217 = vmatprep.subr.bf16.mxu1 %v8910_v43  ;;  %v3792_v6 = vpop.f32.mrf.mxu0  ;;  %4097 = vmatmul.mubr.bf16.vlgmr.msra.gmra.mxu0 %v10882_v20  ;;  %v8621_v43 = vcombine.low %v484_v49, %v492_v3 }
 0x1f2   : > { %v3793_v12 = vadd.f32 %v3792_v6, %v11001_v54  ;;  %4167 = vmatpush1.bf16.msra.mxu0 %v8653_v56  ;;  %4106 = vmatprep.mubr.bf16.mxu0 %v10888_v32  ;;  %v460_v6 = vld [vmem:[#allocation5 + $0x1f0] sm:$0xff] }
 0x1f3   : > { %v3843_v10 = vpop.f32.mrf.mxu1  ;;  %4148 = vmatmul.mubr.bf16.vlgmr.msra.gmra.mxu1 %v10885_v24  ;;  %v3794_v13 = vpop.f32.mrf.mxu0  ;;  %4168 = vmatprep.subr.bf16.mxu0 %v8638_v62 }
 0x1f4   : > { %4218 = vmatpush1.bf16.msra.mxu1 %v8909_v61  ;;  %v3844_v17 = vadd.f32 %v3843_v10, %v3793_v12  ;;  %v3795_v19 = vadd.f32 %v3794_v13, %v11006_v0  ;;  %4157 = vmatprep.mubr.bf16.mxu1 %v10891_v35  ;;  %v708_v12 = vld [vmem:[#allocation5 + $0x9b0] sm:$0xff]  ;;  %v8605_v13 = vcombine.low %v468_v28, %v476_v29 }
 0x1f5   : > { %v3845_v21 = vpop.f32.mrf.mxu1  ;;  %4219 = vmatprep.subr.bf16.mxu1 %v8894_v2  ;;  %v3796_v25 = vpop.f32.mrf.mxu0  ;;  %v8862_v2 = vcombine.high %v724_v31, %v732_v37  ;;  %v716_v10 = vld [vmem:[#allocation5 + $0x9f0] sm:$0xff] }
 0x1f6   : > { %v3846_v39 = vadd.f32 %v3845_v21, %v3795_v19  ;;  %v3797_v41 = vadd.f32 %v3796_v25, %v11001_v54  ;;  %4169 = vmatpush1.bf16.msra.mxu0 %v8637_v11  ;;  %v4374_v49 = vmax.f32 %v3844_v17, 0.0  ;;  %v8590_v21 = vcombine.high %v452_v52, %v460_v6  ;;  %v436_v17 = vld [vmem:[#allocation5 + $0x130] sm:$0xff] }
 0x1f7   : > { %v3847_v42 = vpop.f32.mrf.mxu1  ;;  %v3798_v47 = vpop.f32.mrf.mxu0  ;;  %4170 = vmatprep.subr.bf16.mxu0 %v8622_v16  ;;  %v8861_v16 = vcombine.low %v724_v31, %v732_v37  ;;  %v8589_v37 = vcombine.low %v452_v52, %v460_v6 }
 0x1f8   : > { %4220 = vmatpush1.bf16.msra.mxu1 %v8893_v15  ;;  %v3848_v56 = vadd.f32 %v3847_v42, %v3797_v41  ;;  %v3799_v61 = vadd.f32 %v3798_v47, %v11006_v0  ;;  %v4375_v15 = vmax.f32 %v3846_v39, 0.0  ;;  %v444_v41 = vld [vmem:[#allocation5 + $0x170] sm:$0xff] }
 0x1f9   : > { %v3849_v62 = vpop.f32.mrf.mxu1  ;;  %4221 = vmatprep.subr.bf16.mxu1 %v8878_v23  ;;  %v3802_v19 = vpop.f32.mrf.mxu0  ;;  %4107 = vmatmul.mubr.bf16.gmra.mxu0 %v10897_v46  ;;  %v8846_v23 = vcombine.high %v708_v12, %v716_v10  ;;  %v692_v39 = vld [vmem:[#allocation5 + $0x930] sm:$0xff] }
 0x1fa   : > { %v4390_v3 = vmax.f32 %v3848_v56, 0.0  ;;  %v3850_v11 = vadd.f32 %v3849_v62, %v3799_v61  ;;  %4171 = vmatpush1.bf16.msra.mxu0 %v8621_v43  ;;  %v3803_v7 = vadd.f32 %v3802_v19, %v11001_v54  ;;  %4198 = vmatprep.mubr.bf16.mxu0 %v10870_v58  ;;  %v700_v47 = vld [vmem:[#allocation5 + $0x970] sm:$0xff]  ;;  %v8574_v61 = vcombine.high %v436_v17, %v444_v41 }
 0x1fb   : > { %v3853_v9 = vpop.f32.mrf.mxu1  ;;  %4158 = vmatmul.mubr.bf16.gmra.mxu1 %v10900_v48  ;;  %4172 = vmatprep.subr.bf16.mxu0 %v8606_v51  ;;  %v3804_v25 = vpop.f32.mrf.mxu0  ;;  %v420_v19 = vld [vmem:[#allocation5 + $0xb0] sm:$0xff]  ;;  %v8829_v52 = vcombine.low %v692_v39, %v700_v47 }
 0x1fc   : > { %4222 = vmatpush1.bf16.msra.mxu1 %v8877_v50  ;;  %v11019_v28 = vpack.c.bf16 %v4390_v3, %v4374_v49  ;;  %v4391_v29 = vmax.f32 %v3850_v11, 0.0  ;;  %v3805_v42 = vadd.f32 %v3804_v25, %v11006_v0  ;;  %v11022_v43 = vadd.f32 %v3853_v9, %v3803_v7  ;;  %4249 = vmatprep.mubr.bf16.mxu1 %v10874_v63  ;;  %v428_v49 = vld [vmem:[#allocation5 + $0xf0] sm:$0xff] }
 0x1fd   : > { %4223 = vmatprep.subr.bf16.mxu1 %v8862_v2  ;;  %v3855_v54 = vpop.f32.mrf.mxu1  ;;  %v3806_v50 = vpop.f32.mrf.mxu0  ;;  %v8845_v0 = vcombine.low %v708_v12, %v716_v10  ;;  %v8830_v2 = vcombine.high %v692_v39, %v700_v47  ;;  %v676_v11 = vld [vmem:[#allocation5 + $0x8b0] sm:$0xff]  ;;  %v8573_v9 = vcombine.low %v436_v17, %v444_v41  ;;  %v8558_v6 = vcombine.high %v420_v19, %v428_v49 }
 0x1fe   : > { %v11026_v31 = vpack.c.bf16 %v4391_v29, %v4375_v15  ;;  %4173 = vmatpush1.bf16.msra.mxu0 %v8605_v13  ;;  %v11028_v51 = vadd.f32 %v3855_v54, %v3805_v42  ;;  %v684_v7 = vld [vmem:[#allocation5 + $0x8f0] sm:$0xff] }
 0x1ff   : > { %v3857_v56 = vpop.f32.mrf.mxu1  ;;  %4174 = vmatprep.subr.bf16.mxu0 %v8590_v21  ;;  %v3807_v62 = vpop.f32.mrf.mxu0  ;;  %v8814_v13 = vcombine.high %v676_v11, %v684_v7  ;;  %v404_v15 = vld [vmem:[#allocation5 + $0x30] sm:$0xff]  ;;  %v8557_v21 = vcombine.low %v420_v19, %v428_v49 }
 0x200   : > { %4224 = vmatpush1.bf16.msra.mxu1 %v8861_v16  ;;  %v412_v16 = vld [vmem:[#allocation5 + $0x70] sm:$0xff] }
 0x201   : > { %4225 = vmatprep.subr.bf16.mxu1 %v8846_v23  ;;  %v3858_v3 = vpop.f32.mrf.mxu1  ;;  %v660_v12 = vld [vmem:[#allocation5 + $0x830] sm:$0xff]  ;;  %v8813_v23 = vcombine.low %v676_v11, %v684_v7  ;;  %v8542_v25 = vcombine.high %v404_v15, %v412_v16  ;;  %v8541_v39 = vcombine.low %v404_v15, %v412_v16 }
 0x202   : > { %4175 = vmatpush1.bf16.msra.mxu0 %v8589_v37  ;;  %v668_v10 = vld [vmem:[#allocation5 + $0x870] sm:$0xff] }
 0x203   : > { %4176 = vmatprep.subr.bf16.mxu0 %v8574_v61  ;;  %v8798_v29 = vcombine.high %v660_v12, %v668_v10  ;;  %v644_v42 = vld [vmem:[#allocation5 + $0x7b0] sm:$0xff]  ;;  %v8797_v47 = vcombine.low %v660_v12, %v668_v10 }
 0x204   : > { %4226 = vmatpush1.bf16.msra.mxu1 %v8845_v0  ;;  %v652_v17 = vld [vmem:[#allocation5 + $0x7f0] sm:$0xff] }
 0x205   : > { %4227 = vmatprep.subr.bf16.mxu1 %v8830_v2  ;;  %v900_v41 = vld [vmem:[#allocation5 + $0xfb0] sm:$0xff]  ;;  %v8782_v50 = vcombine.high %v644_v42, %v652_v17  ;;  %v8781_v2 = vcombine.low %v644_v42, %v652_v17 }
 0x206   : > { %4177 = vmatpush1.bf16.msra.mxu0 %v8573_v9  ;;  %v908_v54 = vld [vmem:[#allocation5 + $0xff0] sm:$0xff] }
 0x207   : > { %4178 = vmatprep.subr.bf16.mxu0 %v8558_v6  ;;  %v9038_v37 = vcombine.high %v900_v41, %v908_v54  ;;  %v628_v56 = vld [vmem:[#allocation5 + $0x730] sm:$0xff]  ;;  %v9037_v19 = vcombine.low %v900_v41, %v908_v54 }
 0x208   : > { %4228 = vmatpush1.bf16.msra.mxu1 %v8829_v52  ;;  %v636_v0 = vld [vmem:[#allocation5 + $0x770] sm:$0xff] }
 0x209   : > { %4229 = vmatprep.subr.bf16.mxu1 %v8814_v13  ;;  %v884_v61 = vld [vmem:[#allocation5 + $0xf30] sm:$0xff]  ;;  %v8766_v49 = vcombine.high %v628_v56, %v636_v0  ;;  %v8765_v6 = vcombine.low %v628_v56, %v636_v0 }
 0x20a   : > { %4179 = vmatpush1.bf16.msra.mxu0 %v8557_v21  ;;  %v892_v62 = vld [vmem:[#allocation5 + $0xf70] sm:$0xff] }
 0x20b   : > { %4180 = vmatprep.subr.bf16.mxu0 %v8542_v25  ;;  %v9022_v3 = vcombine.high %v884_v61, %v892_v62  ;;  %v612_v11 = vld [vmem:[#allocation5 + $0x6b0] sm:$0xff]  ;;  %v9021_v13 = vcombine.low %v884_v61, %v892_v62 }
 0x20c   : > { %4230 = vmatpush1.bf16.msra.mxu1 %v8813_v23  ;;  %v620_v7 = vld [vmem:[#allocation5 + $0x6f0] sm:$0xff] }
 0x20d   : > { %4231 = vmatprep.subr.bf16.mxu1 %v8798_v29  ;;  %v868_v9 = vld [vmem:[#allocation5 + $0xeb0] sm:$0xff]  ;;  %v8750_v15 = vcombine.high %v612_v11, %v620_v7  ;;  %v8749_v25 = vcombine.low %v612_v11, %v620_v7 }
 0x20e   : > { %4181 = vmatpush1.bf16.msra.mxu0 %v8541_v39  ;;  %v876_v52 = vld [vmem:[#allocation5 + $0xef0] sm:$0xff] }
 0x20f   : > { %4182 = vmatprep.subr.bf16.mxu0 %v8782_v50  ;;  %v9006_v16 = vcombine.high %v868_v9, %v876_v52  ;;  %v596_v12 = vld [vmem:[#allocation5 + $0x630] sm:$0xff]  ;;  %v9005_v29 = vcombine.low %v868_v9, %v876_v52 }
 0x210   : > { %4232 = vmatpush1.bf16.msra.mxu1 %v8797_v47  ;;  %v604_v10 = vld [vmem:[#allocation5 + $0x670] sm:$0xff] }
 0x211   : > { %4233 = vmatprep.subr.bf16.mxu1 %v9038_v37  ;;  %v852_v21 = vld [vmem:[#allocation5 + $0xe30] sm:$0xff]  ;;  %v8734_v42 = vcombine.high %v596_v12, %v604_v10  ;;  %v8733_v50 = vcombine.low %v596_v12, %v604_v10 }
 0x212   : > { %4183 = vmatpush2.bf16.msra.mxu0 %v8781_v2  ;;  %v860_v23 = vld [vmem:[#allocation5 + $0xe70] sm:$0xff] }
 0x213   : > { %4184 = vmatprep.subr.bf16.mxu0 %v8766_v49  ;;  %v8990_v17 = vcombine.high %v852_v21, %v860_v23  ;;  %v580_v41 = vld [vmem:[#allocation5 + $0x5b0] sm:$0xff]  ;;  %v8989_v37 = vcombine.low %v852_v21, %v860_v23 }
 0x214   : > { %4234 = vmatpush2.bf16.msra.mxu1 %v9037_v19  ;;  %v588_v54 = vld [vmem:[#allocation5 + $0x5f0] sm:$0xff] }
 0x215   : > { %4235 = vmatprep.subr.bf16.mxu1 %v9022_v3  ;;  %v836_v39 = vld [vmem:[#allocation5 + $0xdb0] sm:$0xff]  ;;  %v8718_v56 = vcombine.high %v580_v41, %v588_v54  ;;  %v8717_v49 = vcombine.low %v580_v41, %v588_v54 }
 0x216   : > { %4185 = vmatpush2.bf16.msra.mxu0 %v8765_v6  ;;  %v844_v47 = vld [vmem:[#allocation5 + $0xdf0] sm:$0xff] }
 0x217   : > { %4186 = vmatprep.subr.bf16.mxu0 %v8750_v15  ;;  %v8974_v0 = vcombine.high %v836_v39, %v844_v47  ;;  %v564_v61 = vld [vmem:[#allocation5 + $0x530] sm:$0xff]  ;;  %v8973_v3 = vcombine.low %v836_v39, %v844_v47  ;;  %v517_v39 = vld [vmem:[#allocation5 + $0x3b8] sm:$0xff] }
 0x218   : > { %4236 = vmatpush2.bf16.msra.mxu1 %v9021_v13  ;;  %v572_v62 = vld [vmem:[#allocation5 + $0x570] sm:$0xff]  ;;  %v525_v47 = vld [vmem:[#allocation5 + $0x3f8] sm:$0xff] }
 0x219   : > { %4237 = vmatprep.subr.bf16.mxu1 %v9006_v16  ;;  %v820_v2 = vld [vmem:[#allocation5 + $0xd30] sm:$0xff]  ;;  %v8702_v11 = vcombine.high %v564_v61, %v572_v62  ;;  %v8701_v15 = vcombine.low %v564_v61, %v572_v62  ;;  %v8656_v62 = vcombine.high %v517_v39, %v525_v47 }
 0x21a   : > { %4187 = vmatpush2.bf16.msra.mxu0 %v8749_v25  ;;  %v828_v19 = vld [vmem:[#allocation5 + $0xd70] sm:$0xff] }
 0x21b   : > { %4188 = vmatprep.subr.bf16.mxu0 %v8734_v42  ;;  %v8958_v7 = vcombine.high %v820_v2, %v828_v19  ;;  %v548_v9 = vld [vmem:[#allocation5 + $0x4b0] sm:$0xff]  ;;  %v8957_v16 = vcombine.low %v820_v2, %v828_v19  ;;  %v11480_v19 = vsub.s32 7, %v10922_v4 }
 0x21c   : > { %4238 = vmatpush2.bf16.msra.mxu1 %v9005_v29  ;;  %v556_v52 = vld [vmem:[#allocation5 + $0x4f0] sm:$0xff] }
 0x21d   : > { %4239 = vmatprep.subr.bf16.mxu1 %v8990_v17  ;;  %v804_v6 = vld [vmem:[#allocation5 + $0xcb0] sm:$0xff]  ;;  %v8686_v12 = vcombine.high %v548_v9, %v556_v52  ;;  %v8685_v42 = vcombine.low %v548_v9, %v556_v52  ;;  %v8655_v52 = vcombine.low %v517_v39, %v525_v47 }
 0x21e   : > { %4189 = vmatpush2.bf16.msra.mxu0 %v8733_v50  ;;  %v812_v13 = vld [vmem:[#allocation5 + $0xcf0] sm:$0xff]  ;;  %v773_v50 = vld [vmem:[#allocation5 + $0xbb8] sm:$0xff] }
 0x21f   : > { %4190 = vmatprep.subr.bf16.mxu0 %v8718_v56  ;;  %v8942_v10 = vcombine.high %v804_v6, %v812_v13  ;;  %v532_v21 = vld [vmem:[#allocation5 + $0x430] sm:$0xff]  ;;  %v8941_v17 = vcombine.low %v804_v6, %v812_v13 }
 0x220   : > { %4240 = vmatpush2.bf16.msra.mxu1 %v8989_v37  ;;  %v540_v23 = vld [vmem:[#allocation5 + $0x470] sm:$0xff]  ;;  %v781_v37 = vld [vmem:[#allocation5 + $0xbf8] sm:$0xff] }
 0x221   : > { %4241 = vmatprep.subr.bf16.mxu1 %v8974_v0  ;;  %v788_v25 = vld [vmem:[#allocation5 + $0xc30] sm:$0xff]  ;;  %v8670_v41 = vcombine.high %v532_v21, %v540_v23  ;;  %v8669_v56 = vcombine.low %v532_v21, %v540_v23  ;;  %v11479_v0 = vsub.s32 6, %v10922_v4  ;;  %v8912_v2 = vcombine.high %v773_v50, %v781_v37  ;;  %v741_v23 = vld [vmem:[#allocation5 + $0xab8] sm:$0xff] }
 0x222   : > { %4191 = vmatpush2.bf16.msra.mxu0 %v8717_v49  ;;  %v796_v29 = vld [vmem:[#allocation5 + $0xc70] sm:$0xff]  ;;  %v501_v49 = vld [vmem:[#allocation5 + $0x338] sm:$0xff]  ;;  %v8911_v6 = vcombine.low %v773_v50, %v781_v37 }
 0x223   : > { %4192 = vmatprep.subr.bf16.mxu0 %v8702_v11  ;;  %v8926_v54 = vcombine.high %v788_v25, %v796_v29  ;;  %v8925_v61 = vcombine.low %v788_v25, %v796_v29  ;;  %v757_v11 = vld [vmem:[#allocation5 + $0xb38] sm:$0xff]  ;;  %v11035_v9 = vrot.slane %v10996_v53, %v11479_v0 }
 0x224   : > { %4242 = vmatpush2.bf16.msra.mxu1 %v8973_v3  ;;  %v509_v3 = vld [vmem:[#allocation5 + $0x378] sm:$0xff] }
 0x225   : > { %4243 = vmatprep.subr.bf16.mxu1 %v8958_v7  ;;  %v765_v7 = vld [vmem:[#allocation5 + $0xb78] sm:$0xff]  ;;  %v8640_v13 = vcombine.high %v501_v49, %v509_v3 }
 0x226   : > { %4193 = vmatpush2.bf16.msra.mxu0 %v8701_v15  ;;  %v11040_v15 = vrot.slane %v10996_v53, %v11480_v19  ;;  %v749_v25 = vld [vmem:[#allocation5 + $0xaf8] sm:$0xff]  ;;  %v8895_v53 = vcombine.low %v757_v11, %v765_v7 }
 0x227   : > { %4194 = vmatprep.subr.bf16.mxu0 %v8686_v12  ;;  %v485_v12 = vld [vmem:[#allocation5 + $0x2b8] sm:$0xff]  ;;  %v8880_v37 = vcombine.high %v741_v23, %v749_v25 }
 0x228   : > { %4244 = vmatpush2.bf16.msra.mxu1 %v8957_v16  ;;  %v8896_v16 = vcombine.high %v757_v11, %v765_v7  ;;  %v461_v19 = vld [vmem:[#allocation5 + $0x1f8] sm:$0xff] }
 0x229   : > { %4245 = vmatprep.subr.bf16.mxu1 %v8942_v10  ;;  %v493_v10 = vld [vmem:[#allocation5 + $0x2f8] sm:$0xff] }
 0x22a   : > { %4195 = vmatpush2.bf16.msra.mxu0 %v8685_v42  ;;  %v8623_v7 = vcombine.low %v485_v12, %v493_v10 }
 0x22b   : > { %4196 = vmatprep.subr.bf16.mxu0 %v8670_v41 }
 0x22c   : > { %4246 = vmatpush2.bf16.msra.mxu1 %v8941_v17  ;;  %v8639_v17 = vcombine.low %v501_v49, %v509_v3 }
 0x22d   : > { %4247 = vmatprep.subr.bf16.mxu1 %v8926_v54  ;;  %v8624_v54 = vcombine.high %v485_v12, %v493_v10 }
 0x22e   : > { %4197 = vmatpush2.bf16.msra.mxu0 %v8669_v56  ;;  %v469_v56 = vld [vmem:[#allocation5 + $0x238] sm:$0xff] }
 0x22f   : > { %4268 = vmatprep.subr.bf16.mxu0 %v8656_v62 }
 0x230   : > { %4248 = vmatpush2.bf16.msra.mxu1 %v8925_v61  ;;  %v477_v61 = vld [vmem:[#allocation5 + $0x278] sm:$0xff] }
 0x231   : > { %4319 = vmatprep.subr.bf16.mxu1 %v8912_v2  ;;  %v3894_v21 = vpop.f32.mrf.mxu0  ;;  %4199 = vmatmul.mubr.bf16.vlgmr.msra.gmra.mxu0 %v10882_v20  ;;  %v725_v2 = vld [vmem:[#allocation5 + $0xa38] sm:$0xff] }
 0x232   : > { %v3895_v29 = vadd.f32 %v3894_v21, %v11035_v9  ;;  %4269 = vmatpush1.bf16.msra.mxu0 %v8655_v52  ;;  %4208 = vmatprep.mubr.bf16.mxu0 %v10888_v32  ;;  %v733_v21 = vld [vmem:[#allocation5 + $0xa78] sm:$0xff] }
 0x233   : > { %v3945_v42 = vpop.f32.mrf.mxu1  ;;  %4250 = vmatmul.mubr.bf16.vlgmr.msra.gmra.mxu1 %v10885_v24  ;;  %v3896_v41 = vpop.f32.mrf.mxu0  ;;  %4270 = vmatprep.subr.bf16.mxu0 %v8640_v13  ;;  %v8608_v13 = vcombine.high %v469_v56, %v477_v61  ;;  %v8864_v0 = vcombine.high %v725_v2, %v733_v21 }
 0x234   : > { %4320 = vmatpush1.bf16.msra.mxu1 %v8911_v6  ;;  %v3946_v39 = vadd.f32 %v3945_v42, %v3895_v29  ;;  %v3897_v47 = vadd.f32 %v3896_v41, %v11040_v15  ;;  %4259 = vmatprep.mubr.bf16.mxu1 %v10891_v35  ;;  %v8879_v6 = vcombine.low %v741_v23, %v749_v25 }
 0x235   : > { %v3947_v50 = vpop.f32.mrf.mxu1  ;;  %4321 = vmatprep.subr.bf16.mxu1 %v8896_v16  ;;  %v3898_v62 = vpop.f32.mrf.mxu0  ;;  %v453_v16 = vld [vmem:[#allocation5 + $0x1b8] sm:$0xff] }
 0x236   : > { %v3948_v49 = vadd.f32 %v3947_v50, %v3897_v47  ;;  %v3899_v3 = vadd.f32 %v3898_v62, %v11035_v9  ;;  %4271 = vmatpush1.bf16.msra.mxu0 %v8639_v17  ;;  %v717_v47 = vld [vmem:[#allocation5 + $0x9f8] sm:$0xff]  ;;  %v8607_v50 = vcombine.low %v469_v56, %v477_v61  ;;  %v4376_v12 = vmax.f32 %v3946_v39, 0.0 }
 0x237   : > { %v3949_v11 = vpop.f32.mrf.mxu1  ;;  %v3900_v52 = vpop.f32.mrf.mxu0  ;;  %4272 = vmatprep.subr.bf16.mxu0 %v8624_v54  ;;  %v8863_v54 = vcombine.low %v725_v2, %v733_v21  ;;  %v437_v39 = vld [vmem:[#allocation5 + $0x138] sm:$0xff]  ;;  %v8591_v21 = vcombine.low %v453_v16, %v461_v19 }
 0x238   : > { %4322 = vmatpush1.bf16.msra.mxu1 %v8895_v53  ;;  %v3950_v29 = vadd.f32 %v3949_v11, %v3899_v3  ;;  %v3901_v42 = vadd.f32 %v3900_v52, %v11040_v15  ;;  %v4377_v53 = vmax.f32 %v3948_v49, 0.0  ;;  %v8848_v3 = vcombine.high %v709_v44, %v717_v47  ;;  %v445_v52 = vld [vmem:[#allocation5 + $0x178] sm:$0xff] }
 0x239   : > { %v3951_v41 = vpop.f32.mrf.mxu1  ;;  %4323 = vmatprep.subr.bf16.mxu1 %v8880_v37  ;;  %v3904_v62 = vpop.f32.mrf.mxu0  ;;  %4209 = vmatmul.mubr.bf16.gmra.mxu0 %v10897_v46  ;;  %v8592_v37 = vcombine.high %v453_v16, %v461_v19  ;;  %v693_v49 = vld [vmem:[#allocation5 + $0x938] sm:$0xff] }
 0x23a   : > { %v4392_v10 = vmax.f32 %v3950_v29, 0.0  ;;  %v3952_v17 = vadd.f32 %v3951_v41, %v3901_v42  ;;  %4273 = vmatpush1.bf16.msra.mxu0 %v8623_v7  ;;  %v3905_v23 = vadd.f32 %v3904_v62, %v11035_v9  ;;  %4300 = vmatprep.mubr.bf16.mxu0 %v10870_v58  ;;  %v8576_v41 = vcombine.high %v437_v39, %v445_v52  ;;  %v421_v58 = vld [vmem:[#allocation5 + $0xb8] sm:$0xff] }
 0x23b   : > { %v3955_v25 = vpop.f32.mrf.mxu1  ;;  %4260 = vmatmul.mubr.bf16.gmra.mxu1 %v10900_v48  ;;  %4274 = vmatprep.subr.bf16.mxu0 %v8608_v13  ;;  %v3906_v11 = vpop.f32.mrf.mxu0 }
 0x23c   : > { %4324 = vmatpush1.bf16.msra.mxu1 %v8879_v6  ;;  %v11053_v56 = vpack.c.bf16 %v4392_v10, %v4376_v12  ;;  %v4393_v61 = vmax.f32 %v3952_v17, 0.0  ;;  %v3907_v7 = vadd.f32 %v3906_v11, %v11040_v15  ;;  %v11056_v29 = vadd.f32 %v3955_v25, %v3905_v23  ;;  %v701_v6 = vld [vmem:[#allocation5 + $0x978] sm:$0xff]  ;;  %4351 = vmatprep.mubr.bf16.mxu1 %v10874_v63 }
 0x23d   : > { %4325 = vmatprep.subr.bf16.mxu1 %v8864_v0  ;;  %v3957_v9 = vpop.f32.mrf.mxu1  ;;  %v3908_v13 = vpop.f32.mrf.mxu0  ;;  %v8847_v15 = vcombine.low %v709_v44, %v717_v47  ;;  %v8832_v12 = vcombine.high %v693_v49, %v701_v6  ;;  %v429_v10 = vld [vmem:[#allocation5 + $0xf8] sm:$0xff]  ;;  %v8575_v63 = vcombine.low %v437_v39, %v445_v52  ;;  %v8831_v19 = vcombine.low %v693_v49, %v701_v6 }
 0x23e   : > { %v11060_v2 = vpack.c.bf16 %v4393_v61, %v4377_v53  ;;  %4275 = vmatpush1.bf16.msra.mxu0 %v8607_v50  ;;  %v11062_v42 = vadd.f32 %v3957_v9, %v3907_v7  ;;  %v677_v23 = vld [vmem:[#allocation5 + $0x8b8] sm:$0xff]  ;;  %v8560_v16 = vcombine.high %v421_v58, %v429_v10 }
 0x23f   : > { %v3959_v0 = vpop.f32.mrf.mxu1  ;;  %4276 = vmatprep.subr.bf16.mxu0 %v8592_v37  ;;  %v3909_v62 = vpop.f32.mrf.mxu0  ;;  %v685_v25 = vld [vmem:[#allocation5 + $0x8f8] sm:$0xff]  ;;  %v8559_v37 = vcombine.low %v421_v58, %v429_v10 }
 0x240   : > { %4326 = vmatpush1.bf16.msra.mxu1 %v8863_v54  ;;  %v8816_v50 = vcombine.high %v677_v23, %v685_v25  ;;  %v405_v53 = vld [vmem:[#allocation5 + $0x38] sm:$0xff] }
 0x241   : > { %4327 = vmatprep.subr.bf16.mxu1 %v8848_v3  ;;  %v3960_v17 = vpop.f32.mrf.mxu1  ;;  %v413_v54 = vld [vmem:[#allocation5 + $0x78] sm:$0xff]  ;;  %v8815_v3 = vcombine.low %v677_v23, %v685_v25 }
 0x242   : > { %4277 = vmatpush1.bf16.msra.mxu0 %v8591_v21  ;;  %v661_v44 = vld [vmem:[#allocation5 + $0x838] sm:$0xff]  ;;  %v8544_v11 = vcombine.high %v405_v53, %v413_v54  ;;  %v8543_v49 = vcombine.low %v405_v53, %v413_v54 }
 0x243   : > { %4278 = vmatprep.subr.bf16.mxu0 %v8576_v41  ;;  %v669_v47 = vld [vmem:[#allocation5 + $0x878] sm:$0xff] }
 0x244   : > { %4328 = vmatpush1.bf16.msra.mxu1 %v8847_v15  ;;  %v8800_v61 = vcombine.high %v661_v44, %v669_v47  ;;  %v645_v7 = vld [vmem:[#allocation5 + $0x7b8] sm:$0xff]  ;;  %v8799_v6 = vcombine.low %v661_v44, %v669_v47 }
 0x245   : > { %4329 = vmatprep.subr.bf16.mxu1 %v8832_v12  ;;  %v653_v39 = vld [vmem:[#allocation5 + $0x7f8] sm:$0xff] }
 0x246   : > { %4279 = vmatpush1.bf16.msra.mxu0 %v8575_v63  ;;  %v901_v52 = vld [vmem:[#allocation5 + $0xfb8] sm:$0xff]  ;;  %v8784_v13 = vcombine.high %v645_v7, %v653_v39  ;;  %v8783_v12 = vcombine.low %v645_v7, %v653_v39 }
 0x247   : > { %4280 = vmatprep.subr.bf16.mxu0 %v8560_v16  ;;  %v909_v9 = vld [vmem:[#allocation5 + $0xff8] sm:$0xff] }
 0x248   : > { %4330 = vmatpush1.bf16.msra.mxu1 %v8831_v19  ;;  %v9040_v21 = vcombine.high %v901_v52, %v909_v9  ;;  %v629_v0 = vld [vmem:[#allocation5 + $0x738] sm:$0xff]  ;;  %v9039_v58 = vcombine.low %v901_v52, %v909_v9 }
 0x249   : > { %4331 = vmatprep.subr.bf16.mxu1 %v8816_v50  ;;  %v637_v15 = vld [vmem:[#allocation5 + $0x778] sm:$0xff] }
 0x24a   : > { %4281 = vmatpush1.bf16.msra.mxu0 %v8559_v37  ;;  %v885_v41 = vld [vmem:[#allocation5 + $0xf38] sm:$0xff]  ;;  %v8768_v10 = vcombine.high %v629_v0, %v637_v15  ;;  %v8767_v16 = vcombine.low %v629_v0, %v637_v15 }
 0x24b   : > { %4282 = vmatprep.subr.bf16.mxu0 %v8544_v11  ;;  %v893_v62 = vld [vmem:[#allocation5 + $0xf78] sm:$0xff] }
 0x24c   : > { %4332 = vmatpush1.bf16.msra.mxu1 %v8815_v3  ;;  %v9024_v17 = vcombine.high %v885_v41, %v893_v62  ;;  %v613_v23 = vld [vmem:[#allocation5 + $0x6b8] sm:$0xff]  ;;  %v9023_v50 = vcombine.low %v885_v41, %v893_v62 }
 0x24d   : > { %4333 = vmatprep.subr.bf16.mxu1 %v8800_v61  ;;  %v621_v25 = vld [vmem:[#allocation5 + $0x6f8] sm:$0xff] }
 0x24e   : > { %4283 = vmatpush1.bf16.msra.mxu0 %v8543_v49  ;;  %v869_v63 = vld [vmem:[#allocation5 + $0xeb8] sm:$0xff]  ;;  %v8752_v53 = vcombine.high %v613_v23, %v621_v25  ;;  %v8751_v11 = vcombine.low %v613_v23, %v621_v25 }
 0x24f   : > { %4284 = vmatprep.subr.bf16.mxu0 %v8784_v13  ;;  %v877_v19 = vld [vmem:[#allocation5 + $0xef8] sm:$0xff] }
 0x250   : > { %4334 = vmatpush1.bf16.msra.mxu1 %v8799_v6  ;;  %v9008_v54 = vcombine.high %v869_v63, %v877_v19  ;;  %v597_v44 = vld [vmem:[#allocation5 + $0x638] sm:$0xff]  ;;  %v9007_v61 = vcombine.low %v869_v63, %v877_v19 }
 0x251   : > { %4335 = vmatprep.subr.bf16.mxu1 %v9040_v21  ;;  %v605_v47 = vld [vmem:[#allocation5 + $0x678] sm:$0xff] }
 0x252   : > { %4285 = vmatpush2.bf16.msra.mxu0 %v8783_v12  ;;  %v853_v37 = vld [vmem:[#allocation5 + $0xe38] sm:$0xff]  ;;  %v8736_v7 = vcombine.high %v597_v44, %v605_v47  ;;  %v8735_v13 = vcombine.low %v597_v44, %v605_v47 }
 0x253   : > { %4286 = vmatprep.subr.bf16.mxu0 %v8768_v10  ;;  %v861_v3 = vld [vmem:[#allocation5 + $0xe78] sm:$0xff] }
 0x254   : > { %4336 = vmatpush2.bf16.msra.mxu1 %v9039_v58  ;;  %v8992_v39 = vcombine.high %v853_v37, %v861_v3  ;;  %v581_v52 = vld [vmem:[#allocation5 + $0x5b8] sm:$0xff]  ;;  %v8991_v21 = vcombine.low %v853_v37, %v861_v3 }
 0x255   : > { %4337 = vmatprep.subr.bf16.mxu1 %v9024_v17  ;;  %v589_v9 = vld [vmem:[#allocation5 + $0x5f8] sm:$0xff] }
 0x256   : > { %4287 = vmatpush2.bf16.msra.mxu0 %v8767_v16  ;;  %v837_v49 = vld [vmem:[#allocation5 + $0xdb8] sm:$0xff]  ;;  %v8720_v0 = vcombine.high %v581_v52, %v589_v9  ;;  %v8719_v10 = vcombine.low %v581_v52, %v589_v9 }
 0x257   : > { %4288 = vmatprep.subr.bf16.mxu0 %v8752_v53  ;;  %v845_v6 = vld [vmem:[#allocation5 + $0xdf8] sm:$0xff] }
 0x258   : > { %4338 = vmatpush2.bf16.msra.mxu1 %v9023_v50  ;;  %v8976_v15 = vcombine.high %v837_v49, %v845_v6  ;;  %v565_v41 = vld [vmem:[#allocation5 + $0x538] sm:$0xff]  ;;  %v8975_v17 = vcombine.low %v837_v49, %v845_v6 }
 0x259   : > { %4339 = vmatprep.subr.bf16.mxu1 %v9008_v54  ;;  %v573_v62 = vld [vmem:[#allocation5 + $0x578] sm:$0xff] }
 0x25a   : > { %4289 = vmatpush2.bf16.msra.mxu0 %v8751_v11  ;;  %v821_v12 = vld [vmem:[#allocation5 + $0xd38] sm:$0xff]  ;;  %v8704_v23 = vcombine.high %v565_v41, %v573_v62  ;;  %v8703_v53 = vcombine.low %v565_v41, %v573_v62  ;;  %v3697_v41 = vadd.f32 %v10979_v26, %v10970_v57 }
 0x25b   : > { %4290 = vmatprep.subr.bf16.mxu0 %v8736_v7  ;;  %v829_v58 = vld [vmem:[#allocation5 + $0xd78] sm:$0xff] }
 0x25c   : > { %4340 = vmatpush2.bf16.msra.mxu1 %v9007_v61  ;;  %v8960_v25 = vcombine.high %v821_v12, %v829_v58  ;;  %v549_v63 = vld [vmem:[#allocation5 + $0x4b8] sm:$0xff]  ;;  %v8959_v54 = vcombine.low %v821_v12, %v829_v58  ;;  %v9676_v12 = vld [vmem:[#allocation8 + $0xe0] ss:$16 sps:$4 sm:$0xff]  }
 0x25d   : > { %4341 = vmatprep.subr.bf16.mxu1 %v8992_v39  ;;  %v557_v19 = vld [vmem:[#allocation5 + $0x4f8] sm:$0xff]  ;;  %v9679_v58 = vld [vmem:[#allocation8 + $0x2e0] ss:$16 sps:$4 sm:$0xff]  }
 0x25e   : > { %4291 = vmatpush2.bf16.msra.mxu0 %v8735_v13  ;;  %v805_v16 = vld [vmem:[#allocation5 + $0xcb8] sm:$0xff]  ;;  %v8688_v44 = vcombine.high %v549_v63, %v557_v19  ;;  %v8687_v7 = vcombine.low %v549_v63, %v557_v19  ;;  %v11064_v13 = vld [vmem:[#allocation7 + $0x8] sm:$0xff]  ;;  %v9682_v63 = vld [vmem:[#allocation8 + $0xc0] ss:$16 sps:$4 sm:$0xff]  }
 0x25f   : > { %4292 = vmatprep.subr.bf16.mxu0 %v8720_v0  ;;  %v813_v50 = vld [vmem:[#allocation5 + $0xcf8] sm:$0xff]  ;;  %v9681_v0 = vld [vmem:[#allocation8 + $0x2e4] ss:$16 sps:$4 sm:$0xff]   ;;  %v949_v62 = vrot.slane %v11064_v13, %v10927_v14 }
 0x260   : > { %4342 = vmatpush2.bf16.msra.mxu1 %v8991_v21  ;;  %v8944_v47 = vcombine.high %v805_v16, %v813_v50  ;;  %v533_v37 = vld [vmem:[#allocation5 + $0x438] sm:$0xff]  ;;  %v8943_v39 = vcombine.low %v805_v16, %v813_v50  ;;  %v9678_v21 = vld [vmem:[#allocation8 + $0xe4] ss:$16 sps:$4 sm:$0xff]   ;;  %v9685_v16 = vld [vmem:[#allocation8 + $0x2c0] ss:$16 sps:$4 sm:$0xff]  }
 0x261   : > { %4343 = vmatprep.subr.bf16.mxu1 %v8976_v15  ;;  %v541_v3 = vld [vmem:[#allocation5 + $0x478] sm:$0xff]  ;;  %v3595_v15 = vadd.f32 %v10945_v60, %v10936_v33  ;;  %v3748_v60 = vadd.f32 %v10981_v34, %v3697_v41  ;;  %v9690_v50 = vld [vmem:[#allocation8 + $0xa4] ss:$16 sps:$4 sm:$0xff]  }
 0x262   : > { %4293 = vmatpush2.bf16.msra.mxu0 %v8719_v10  ;;  %v789_v11 = vld [vmem:[#allocation5 + $0xc38] sm:$0xff]  ;;  %v8672_v52 = vcombine.high %v533_v37, %v541_v3  ;;  %v8671_v49 = vcombine.low %v533_v37, %v541_v3  ;;  %v9684_v10 = vld [vmem:[#allocation8 + $0xc4] ss:$16 sps:$4 sm:$0xff]  }
 0x263   : > { %4294 = vmatprep.subr.bf16.mxu0 %v8704_v23  ;;  %v797_v61 = vld [vmem:[#allocation5 + $0xc78] sm:$0xff]  ;;  %v9687_v23 = vld [vmem:[#allocation8 + $0x2c4] ss:$16 sps:$4 sm:$0xff]   ;;  %v3646_v33 = vadd.f32 %v10947_v5, %v3595_v15 }
 0x264   : > { %4344 = vmatpush2.bf16.msra.mxu1 %v8975_v17  ;;  %v8928_v9 = vcombine.high %v789_v11, %v797_v61  ;;  %v8927_v6 = vcombine.low %v789_v11, %v797_v61  ;;  %v11074_v17 = vrot.slane %v11064_v13, %v10930_v22  ;;  %v9693_v34 = vld [vmem:[#allocation8 + $0x2a4] ss:$16 sps:$4 sm:$0xff]   ;;  %v9688_v11 = vld [vmem:[#allocation8 + $0xa0] ss:$16 sps:$4 sm:$0xff]   ;;  %v4371_v61 = vmax.f32 %v10943_v55, 0.0 }
 0x265   : > { %4345 = vmatprep.subr.bf16.mxu1 %v8960_v25 }
 0x266   : > { %4295 = vmatpush2.bf16.msra.mxu0 %v8703_v53 }
 0x267   : > { %4296 = vmatprep.subr.bf16.mxu0 %v8688_v44  ;;  %v4389_v44 = vmax.f32 %v3748_v60, 0.0 }
 0x268   : > { %4346 = vmatpush2.bf16.msra.mxu1 %v8959_v54 }
 0x269   : > { %4347 = vmatprep.subr.bf16.mxu1 %v8944_v47 }
 0x26a   : > { %4297 = vmatpush2.bf16.msra.mxu0 %v8687_v7  ;;  %v4373_v7 = vmax.f32 %v10977_v18, 0.0 }
 0x26b   : > { %4298 = vmatprep.subr.bf16.mxu0 %v8672_v52  ;;  %v9691_v52 = vld [vmem:[#allocation8 + $0x2a0] ss:$16 sps:$4 sm:$0xff]  }
 0x26c   : > { %4348 = vmatpush2.bf16.msra.mxu1 %v8943_v39 }
 0x26d   : > { %4349 = vmatprep.subr.bf16.mxu1 %v8928_v9 }
 0x26e   : > { %4299 = vmatpush2.bf16.msra.mxu0 %v8671_v49 }
 0x26f   : > { %7534 = vmatprep.subr.bf16.mxu0 %v9678_v21  ;;  %v11089_v21 = vpack.c.bf16 %v4389_v44, %v4373_v7  ;;  %v9711_v44 = vld [vmem:[#allocation8 + $0x244] ss:$16 sps:$4 sm:$0xff]  }
 0x270   : > { %4350 = vmatpush2.bf16.msra.mxu1 %v8927_v6  ;;  %v9696_v6 = vld [vmem:[#allocation8 + $0x84] ss:$16 sps:$4 sm:$0xff]  }
 0x271   : > { %7585 = vmatprep.subr.bf16.mxu1 %v9681_v0  ;;  %v3996_v57 = vpop.f32.mrf.mxu0  ;;  %4301 = vmatmul.mubr.bf16.vlgmr.msra.gmra.mxu0 %v10882_v20  ;;  %v4387_v20 = vmax.f32 %v3646_v33, 0.0  ;;  %v9699_v0 = vld [vmem:[#allocation8 + $0x284] ss:$16 sps:$4 sm:$0xff]  }
 0x272   : > { %v3997_v26 = vadd.f32 %v3996_v57, %v949_v62  ;;  %7535 = vmatpush1.bf16.msra.mxu0 %v9676_v12  ;;  %4310 = vmatprep.mubr.bf16.mxu0 %v10888_v32  ;;  %v9694_v12 = vld [vmem:[#allocation8 + $0x80] ss:$16 sps:$4 sm:$0xff]   ;;  %v9702_v33 = vld [vmem:[#allocation8 + $0x64] ss:$16 sps:$4 sm:$0xff]  }
 0x273   : > { %v4047_v25 = vpop.f32.mrf.mxu1  ;;  %4352 = vmatmul.mubr.bf16.vlgmr.msra.gmra.mxu1 %v10885_v24  ;;  %v3998_v19 = vpop.f32.mrf.mxu0  ;;  %7536 = vmatprep.subr.bf16.mxu0 %v9684_v10  ;;  %v9720_v7 = vld [vmem:[#allocation8 + $0x4] ss:$16 sps:$4 sm:$0xff]  }
 0x274   : > { %7586 = vmatpush1.bf16.msra.mxu1 %v9679_v58  ;;  %v4048_v53 = vadd.f32 %v4047_v25, %v3997_v26  ;;  %v3999_v54 = vadd.f32 %v3998_v19, %v11074_v17  ;;  %4361 = vmatprep.mubr.bf16.mxu1 %v10891_v35  ;;  %v11087_v35 = vpack.c.bf16 %v4387_v20, %v4371_v61  ;;  %v9705_v25 = vld [vmem:[#allocation8 + $0x264] ss:$16 sps:$4 sm:$0xff]   ;;  %v9715_v61 = vld [vmem:[#allocation8 + $0x220] ss:$16 sps:$4 sm:$0xff]  }
 0x275   : > { %v4049_v5 = vpop.f32.mrf.mxu1  ;;  %7587 = vmatprep.subr.bf16.mxu1 %v9687_v23  ;;  %v4000_v47 = vpop.f32.mrf.mxu0 }
 0x276   : > { %v4050_v24 = vadd.f32 %v4049_v5, %v3999_v54  ;;  %v4001_v37 = vadd.f32 %v4000_v47, %v949_v62  ;;  %7537 = vmatpush1.bf16.msra.mxu0 %v9682_v63  ;;  %v4378_v15 = vmax.f32 %v4048_v53, 0.0  ;;  %v9703_v5 = vld [vmem:[#allocation8 + $0x260] ss:$16 sps:$4 sm:$0xff]  }
 0x277   : > { %v4051_v3 = vpop.f32.mrf.mxu1  ;;  %v4002_v39 = vpop.f32.mrf.mxu0  ;;  %7538 = vmatprep.subr.bf16.mxu0 %v9690_v50  ;;  %v9700_v50 = vld [vmem:[#allocation8 + $0x60] ss:$16 sps:$4 sm:$0xff]  }
 0x278   : > { %7588 = vmatpush1.bf16.msra.mxu1 %v9685_v16  ;;  %v4052_v32 = vadd.f32 %v4051_v3, %v4001_v37  ;;  %v4003_v9 = vadd.f32 %v4002_v39, %v11074_v17  ;;  %v4379_v23 = vmax.f32 %v4050_v24, 0.0  ;;  %v9706_v47 = vld [vmem:[#allocation8 + $0x40] ss:$16 sps:$4 sm:$0xff]   ;;  %v9714_v37 = vld [vmem:[#allocation8 + $0x24] ss:$16 sps:$4 sm:$0xff]  }
 0x279   : > { %v4053_v49 = vpop.f32.mrf.mxu1  ;;  %7589 = vmatprep.subr.bf16.mxu1 %v9693_v34  ;;  %4311 = vmatmul.mubr.bf16.gmra.mxu0 %v10897_v46  ;;  %v4006_v55 = vpop.f32.mrf.mxu0  ;;  %v9697_v46 = vld [vmem:[#allocation8 + $0x280] ss:$16 sps:$4 sm:$0xff]   ;;  %v9708_v34 = vld [vmem:[#allocation8 + $0x44] ss:$16 sps:$4 sm:$0xff]  }
 0x27a   : > { %v4394_v18 = vmax.f32 %v4052_v32, 0.0  ;;  %v4054_v41 = vadd.f32 %v4053_v49, %v4003_v9  ;;  %7539 = vmatpush1.bf16.msra.mxu0 %v9688_v11  ;;  %v4007_v58 = vadd.f32 %v4006_v55, %v949_v62  ;;  %7566 = vmatprep.mubr.bf16.mxu0 %v11087_v35  ;;  %v9709_v24 = vld [vmem:[#allocation8 + $0x240] ss:$16 sps:$4 sm:$0xff]   ;;  %v9717_v3 = vld [vmem:[#allocation8 + $0x224] ss:$16 sps:$4 sm:$0xff]  }
 0x27b   : > { %4362 = vmatmul.mubr.bf16.gmra.mxu1 %v10900_v48  ;;  %v4057_v10 = vpop.f32.mrf.mxu1  ;;  %v4008_v60 = vpop.f32.mrf.mxu0  ;;  %7540 = vmatprep.subr.bf16.mxu0 %v9696_v6  ;;  %v9712_v11 = vld [vmem:[#allocation8 + $0x20] ss:$16 sps:$4 sm:$0xff]   ;;  %v9723_v39 = vld [vmem:[#allocation8 + $0x204] ss:$16 sps:$4 sm:$0xff]  }
 0x27c   : > { %7590 = vmatpush1.bf16.msra.mxu1 %v9691_v52  ;;  %v11093_v57 = vpack.c.bf16 %v4394_v18, %v4378_v15  ;;  %v4395_v26 = vmax.f32 %v4054_v41, 0.0  ;;  %7617 = vmatprep.mubr.bf16.mxu1 %v11089_v21  ;;  %v4009_v48 = vadd.f32 %v4008_v60, %v11074_v17  ;;  %v11097_v63 = vadd.f32 %v4057_v10, %v4007_v58  ;;  %v9718_v52 = vld [vmem:[#allocation8] ss:$16 sps:$4 sm:$0xff]   ;;  %v9726_v9 = vld [vmem:[#allocation8 + $0x1e4] ss:$16 sps:$4 sm:$0xff]  }
 0x27d   : > { %v4059_v62 = vpop.f32.mrf.mxu1  ;;  %7591 = vmatprep.subr.bf16.mxu1 %v9699_v0  ;;  %v4010_v19 = vpop.f32.mrf.mxu0  ;;  %v9721_v32 = vld [vmem:[#allocation8 + $0x200] ss:$16 sps:$4 sm:$0xff]   ;;  %v9729_v49 = vld [vmem:[#allocation8 + $0x3e4] ss:$16 sps:$4 sm:$0xff]  }
 0x27e   : > { %v11099_v16 = vpack.c.bf16 %v4395_v26, %v4379_v23  ;;  %7541 = vmatpush1.bf16.msra.mxu0 %v9694_v12  ;;  %v11101_v53 = vadd.f32 %v4059_v62, %v4009_v48  ;;  %v9724_v6 = vld [vmem:[#allocation8 + $0x1e0] ss:$16 sps:$4 sm:$0xff]   ;;  %v9732_v55 = vld [vmem:[#allocation8 + $0x1c4] ss:$16 sps:$4 sm:$0xff]  }
 0x27f   : > { %v4061_v54 = vpop.f32.mrf.mxu1  ;;  %7542 = vmatprep.subr.bf16.mxu0 %v9702_v33  ;;  %v4011_v20 = vpop.f32.mrf.mxu0  ;;  %v9727_v0 = vld [vmem:[#allocation8 + $0x3e0] ss:$16 sps:$4 sm:$0xff]   ;;  %v9735_v15 = vld [vmem:[#allocation8 + $0x3c4] ss:$16 sps:$4 sm:$0xff]  }
 0x280   : > { %7592 = vmatpush1.bf16.msra.mxu1 %v9697_v46  ;;  %v9730_v18 = vld [vmem:[#allocation8 + $0x1c0] ss:$16 sps:$4 sm:$0xff]   ;;  %v9738_v12 = vld [vmem:[#allocation8 + $0x1a4] ss:$16 sps:$4 sm:$0xff]  }
 0x281   : > { %7593 = vmatprep.subr.bf16.mxu1 %v9705_v25  ;;  %v4062_v17 = vpop.f32.mrf.mxu1  ;;  %v9733_v41 = vld [vmem:[#allocation8 + $0x3c0] ss:$16 sps:$4 sm:$0xff]   ;;  %v9741_v58 = vld [vmem:[#allocation8 + $0x3a4] ss:$16 sps:$4 sm:$0xff]  }
 0x282   : > { %7543 = vmatpush1.bf16.msra.mxu0 %v9700_v50  ;;  %v9736_v10 = vld [vmem:[#allocation8 + $0x1a0] ss:$16 sps:$4 sm:$0xff]   ;;  %v9744_v46 = vld [vmem:[#allocation8 + $0x184] ss:$16 sps:$4 sm:$0xff]  }
 0x283   : > { %7544 = vmatprep.subr.bf16.mxu0 %v9708_v34  ;;  %v9739_v23 = vld [vmem:[#allocation8 + $0x3a0] ss:$16 sps:$4 sm:$0xff]   ;;  %v9747_v33 = vld [vmem:[#allocation8 + $0x384] ss:$16 sps:$4 sm:$0xff]  }
 0x284   : > { %7594 = vmatpush1.bf16.msra.mxu1 %v9703_v5  ;;  %v9742_v60 = vld [vmem:[#allocation8 + $0x180] ss:$16 sps:$4 sm:$0xff]   ;;  %v9750_v25 = vld [vmem:[#allocation8 + $0x164] ss:$16 sps:$4 sm:$0xff]  }
 0x285   : > { %7595 = vmatprep.subr.bf16.mxu1 %v9711_v44  ;;  %v9745_v26 = vld [vmem:[#allocation8 + $0x380] ss:$16 sps:$4 sm:$0xff]   ;;  %v9753_v48 = vld [vmem:[#allocation8 + $0x364] ss:$16 sps:$4 sm:$0xff]  }
 0x286   : > { %7545 = vmatpush1.bf16.msra.mxu0 %v9706_v47  ;;  %v9748_v62 = vld [vmem:[#allocation8 + $0x160] ss:$16 sps:$4 sm:$0xff]   ;;  %v9756_v50 = vld [vmem:[#allocation8 + $0x144] ss:$16 sps:$4 sm:$0xff]  }
 0x287   : > { %7546 = vmatprep.subr.bf16.mxu0 %v9714_v37  ;;  %v9751_v19 = vld [vmem:[#allocation8 + $0x360] ss:$16 sps:$4 sm:$0xff]   ;;  %v9759_v54 = vld [vmem:[#allocation8 + $0x344] ss:$16 sps:$4 sm:$0xff]  }
 0x288   : > { %7596 = vmatpush1.bf16.msra.mxu1 %v9709_v24  ;;  %v9754_v5 = vld [vmem:[#allocation8 + $0x140] ss:$16 sps:$4 sm:$0xff]   ;;  %v9762_v20 = vld [vmem:[#allocation8 + $0x124] ss:$16 sps:$4 sm:$0xff]  }
 0x289   : > { %7597 = vmatprep.subr.bf16.mxu1 %v9717_v3  ;;  %v9757_v34 = vld [vmem:[#allocation8 + $0x340] ss:$16 sps:$4 sm:$0xff]   ;;  %v9765_v44 = vld [vmem:[#allocation8 + $0x324] ss:$16 sps:$4 sm:$0xff]  }
 0x28a   : > { %7547 = vmatpush1.bf16.msra.mxu0 %v9712_v11  ;;  %v9760_v17 = vld [vmem:[#allocation8 + $0x120] ss:$16 sps:$4 sm:$0xff]   ;;  %v9768_v24 = vld [vmem:[#allocation8 + $0x104] ss:$16 sps:$4 sm:$0xff]  }
 0x28b   : > { %7548 = vmatprep.subr.bf16.mxu0 %v9720_v7  ;;  %v9763_v47 = vld [vmem:[#allocation8 + $0x320] ss:$16 sps:$4 sm:$0xff]   ;;  %v9771_v37 = vld [vmem:[#allocation8 + $0x304] ss:$16 sps:$4 sm:$0xff]   ;;  %v4403_v7 = vmax.f32 %v10958_v36, 0.0 }
 0x28c   : > { %7598 = vmatpush1.bf16.msra.mxu1 %v9715_v61  ;;  %v9766_v3 = vld [vmem:[#allocation8 + $0x100] ss:$16 sps:$4 sm:$0xff]   ;;  %v9774_v61 = vld [vmem:[#allocation8 + $0x4e4] ss:$16 sps:$4 sm:$0xff]  }
 0x28d   : > { %7599 = vmatprep.subr.bf16.mxu1 %v9723_v39  ;;  %v9769_v11 = vld [vmem:[#allocation8 + $0x300] ss:$16 sps:$4 sm:$0xff]   ;;  %v9777_v39 = vld [vmem:[#allocation8 + $0x6e4] ss:$16 sps:$4 sm:$0xff]  }
 0x28e   : > { %7549 = vmatpush1.bf16.msra.mxu0 %v9718_v52  ;;  %v4405_v52 = vmax.f32 %v10992_v8, 0.0  ;;  %v9780_v36 = vld [vmem:[#allocation8 + $0x4c4] ss:$16 sps:$4 sm:$0xff]  }
 0x28f   : > { %7550 = vmatprep.subr.bf16.mxu0 %v9726_v9  ;;  %v9772_v9 = vld [vmem:[#allocation8 + $0x4e0] ss:$16 sps:$4 sm:$0xff]   ;;  %v9783_v8 = vld [vmem:[#allocation8 + $0x6c4] ss:$16 sps:$4 sm:$0xff]  }
 0x290   : > { %7600 = vmatpush1.bf16.msra.mxu1 %v9721_v32  ;;  %v957_v32 = vrot.slane %v11064_v13, %v10961_v38 }
 0x291   : > { %7601 = vmatprep.subr.bf16.mxu1 %v9729_v49  ;;  %v11107_v49 = vpack.c.bf16 %v4403_v7, %v4403_v7 }
 0x292   : > { %7551 = vmatpush2.bf16.msra.mxu0 %v9724_v6  ;;  %v9775_v6 = vld [vmem:[#allocation8 + $0x6e0] ss:$16 sps:$4 sm:$0xff]  }
 0x293   : > { %7552 = vmatprep.subr.bf16.mxu0 %v9732_v55  ;;  %v11113_v55 = vpack.c.bf16 %v4405_v52, %v4405_v52 }
 0x294   : > { %7602 = vmatpush2.bf16.msra.mxu1 %v9727_v0  ;;  %v11111_v0 = vrot.slane %v11064_v13, %v10964_v45 }
 0x295   : > { %7603 = vmatprep.subr.bf16.mxu1 %v9735_v15 }
 0x296   : > { %7553 = vmatpush2.bf16.msra.mxu0 %v9730_v18 }
 0x297   : > { %7554 = vmatprep.subr.bf16.mxu0 %v9738_v12  ;;  %v4402_v12 = vmax.f32 %v10954_v30, 0.0 }
 0x298   : > { %7604 = vmatpush2.bf16.msra.mxu1 %v9733_v41 }
 0x299   : > { %7605 = vmatprep.subr.bf16.mxu1 %v9741_v58 }
 0x29a   : > { %7555 = vmatpush2.bf16.msra.mxu0 %v9736_v10  ;;  %v9778_v10 = vld [vmem:[#allocation8 + $0x4c0] ss:$16 sps:$4 sm:$0xff]  }
 0x29b   : > { %7556 = vmatprep.subr.bf16.mxu0 %v9744_v46 }
 0x29c   : > { %7606 = vmatpush2.bf16.msra.mxu1 %v9739_v23  ;;  %v4404_v23 = vmax.f32 %v10988_v1, 0.0  ;;  %v9784_v1 = vld [vmem:[#allocation8 + $0x4a0] ss:$16 sps:$4 sm:$0xff]  }
 0x29d   : > { %7607 = vmatprep.subr.bf16.mxu1 %v9747_v33 }
 0x29e   : > { %7557 = vmatpush2.bf16.msra.mxu0 %v9742_v60 }
 0x29f   : > { %7558 = vmatprep.subr.bf16.mxu0 %v9750_v25  ;;  %v9786_v25 = vld [vmem:[#allocation8 + $0x4a4] ss:$16 sps:$4 sm:$0xff]  }
 0x2a0   : > { %7608 = vmatpush2.bf16.msra.mxu1 %v9745_v26  ;;  %v9781_v26 = vld [vmem:[#allocation8 + $0x6c0] ss:$16 sps:$4 sm:$0xff]  }
 0x2a1   : > { %7609 = vmatprep.subr.bf16.mxu1 %v9753_v48 }
 0x2a2   : > { %7559 = vmatpush2.bf16.msra.mxu0 %v9748_v62  ;;  %v9789_v62 = vld [vmem:[#allocation8 + $0x6a4] ss:$16 sps:$4 sm:$0xff]  }
 0x2a3   : > { %7560 = vmatprep.subr.bf16.mxu0 %v9756_v50 }
 0x2a4   : > { %7610 = vmatpush2.bf16.msra.mxu1 %v9751_v19 }
 0x2a5   : > { %7611 = vmatprep.subr.bf16.mxu1 %v9759_v54  ;;  %v11124_v54 = vpack.c.bf16 %v4402_v12, %v4402_v12 }
 0x2a6   : > { %7561 = vmatpush2.bf16.msra.mxu0 %v9754_v5 }
 0x2a7   : > { %7562 = vmatprep.subr.bf16.mxu0 %v9762_v20 }
 0x2a8   : > { %7612 = vmatpush2.bf16.msra.mxu1 %v9757_v34  ;;  %v11128_v34 = vpack.c.bf16 %v4404_v23, %v4404_v23 }
 0x2a9   : > { %7613 = vmatprep.subr.bf16.mxu1 %v9765_v44 }
 0x2aa   : > { %7563 = vmatpush2.bf16.msra.mxu0 %v9760_v17  ;;  %v9787_v17 = vld [vmem:[#allocation8 + $0x6a0] ss:$16 sps:$4 sm:$0xff]  }
 0x2ab   : > { %7564 = vmatprep.subr.bf16.mxu0 %v9768_v24  ;;  %v9795_v24 = vld [vmem:[#allocation8 + $0x684] ss:$16 sps:$4 sm:$0xff]  }
 0x2ac   : > { %7614 = vmatpush2.bf16.msra.mxu1 %v9763_v47  ;;  %v9792_v47 = vld [vmem:[#allocation8 + $0x484] ss:$16 sps:$4 sm:$0xff]  }
 0x2ad   : > { %7615 = vmatprep.subr.bf16.mxu1 %v9771_v37 }
 0x2ae   : > { %7565 = vmatpush2.bf16.msra.mxu0 %v9766_v3 }
 0x2af   : > { %7636 = vmatprep.subr.bf16.mxu0 %v9774_v61 }
 0x2b0   : > { %7616 = vmatpush2.bf16.msra.mxu1 %v9769_v11 }
 0x2b1   : > { %7687 = vmatprep.subr.bf16.mxu1 %v9777_v39  ;;  %v4098_v15 = vpop.f32.mrf.mxu0  ;;  %7567 = vmatmul.mubr.bf16.vlgmr.msra.gmra.mxu0 %v10951_v27  ;;  %v9790_v39 = vld [vmem:[#allocation8 + $0x480] ss:$16 sps:$4 sm:$0xff]  }
 0x2b2   : > { %v4099_v18 = vadd.f32 %v4098_v15, %v957_v32  ;;  %7576 = vmatprep.mubr.bf16.mxu0 %v11107_v49  ;;  %7637 = vmatpush1.bf16.msra.mxu0 %v9772_v9 }
 0x2b3   : > { %v4149_v41 = vpop.f32.mrf.mxu1  ;;  %7618 = vmatmul.mubr.bf16.vlgmr.msra.gmra.mxu1 %v10985_v59  ;;  %v4100_v58 = vpop.f32.mrf.mxu0  ;;  %7638 = vmatprep.subr.bf16.mxu0 %v9780_v36  ;;  %v9798_v36 = vld [vmem:[#allocation8 + $0x464] ss:$16 sps:$4 sm:$0xff]  }
 0x2b4   : > { %7627 = vmatprep.mubr.bf16.mxu1 %v11113_v55  ;;  %v4150_v46 = vadd.f32 %v4149_v41, %v4099_v18  ;;  %7688 = vmatpush1.bf16.msra.mxu1 %v9775_v6  ;;  %v4101_v33 = vadd.f32 %v4100_v58, %v11111_v0  ;;  %v9793_v6 = vld [vmem:[#allocation8 + $0x680] ss:$16 sps:$4 sm:$0xff]   ;;  %v9801_v41 = vld [vmem:[#allocation8 + $0x664] ss:$16 sps:$4 sm:$0xff]  }
 0x2b5   : > { %v4151_v60 = vpop.f32.mrf.mxu1  ;;  %v4102_v48 = vpop.f32.mrf.mxu0  ;;  %7689 = vmatprep.subr.bf16.mxu1 %v9783_v8 }
 0x2b6   : > { %v11122_v19 = vadd.f32 %v4151_v60, %v4101_v33  ;;  %v4103_v30 = vadd.f32 %v4102_v48, %v957_v32  ;;  %7639 = vmatpush1.bf16.msra.mxu0 %v9778_v10  ;;  %v4380_v3 = vmax.f32 %v4150_v46, 0.0  ;;  %v9796_v10 = vld [vmem:[#allocation8 + $0x460] ss:$16 sps:$4 sm:$0xff]   ;;  %v9804_v33 = vld [vmem:[#allocation8 + $0x444] ss:$16 sps:$4 sm:$0xff]  }
 0x2b7   : > { %v4153_v50 = vpop.f32.mrf.mxu1  ;;  %v11126_v5 = vpop.f32.mrf.mxu0  ;;  %7640 = vmatprep.subr.bf16.mxu0 %v9786_v25  ;;  %v9799_v46 = vld [vmem:[#allocation8 + $0x660] ss:$16 sps:$4 sm:$0xff]  }
 0x2b8   : > { %v4154_v20 = vadd.f32 %v4153_v50, %v4103_v30  ;;  %7690 = vmatpush1.bf16.msra.mxu1 %v9781_v26  ;;  %v9807_v26 = vld [vmem:[#allocation8 + $0x644] ss:$16 sps:$4 sm:$0xff]   ;;  %v9802_v25 = vld [vmem:[#allocation8 + $0x440] ss:$16 sps:$4 sm:$0xff]  }
 0x2b9   : > { %v11130_v44 = vpop.f32.mrf.mxu1  ;;  %7577 = vmatmul.mubr.bf16.gmra.mxu0 %v11124_v54  ;;  %7691 = vmatprep.subr.bf16.mxu1 %v9789_v62  ;;  %v4108_v37 = vpop.f32.mrf.mxu0  ;;  %v9805_v48 = vld [vmem:[#allocation8 + $0x640] ss:$16 sps:$4 sm:$0xff]   ;;  %v9810_v62 = vld [vmem:[#allocation8 + $0x424] ss:$16 sps:$4 sm:$0xff]  }
 0x2ba   : > { %v4396_v11 = vmax.f32 %v4154_v20, 0.0  ;;  %7668 = vmatprep.mubr.bf16.mxu0 %v11026_v31  ;;  %v4109_v61 = vadd.f32 %v4108_v37, %v957_v32  ;;  %7641 = vmatpush1.bf16.msra.mxu0 %v9784_v1  ;;  %v9813_v30 = vld [vmem:[#allocation8 + $0x624] ss:$16 sps:$4 sm:$0xff]   ;;  %v9808_v50 = vld [vmem:[#allocation8 + $0x420] ss:$16 sps:$4 sm:$0xff]  }
 0x2bb   : > { %7628 = vmatmul.mubr.bf16.gmra.mxu1 %v11128_v34  ;;  %v4159_v7 = vpop.f32.mrf.mxu1  ;;  %v4110_v52 = vpop.f32.mrf.mxu0  ;;  %7642 = vmatprep.subr.bf16.mxu0 %v9792_v47  ;;  %v9811_v1 = vld [vmem:[#allocation8 + $0x620] ss:$16 sps:$4 sm:$0xff]   ;;  %v9816_v20 = vld [vmem:[#allocation8 + $0x404] ss:$16 sps:$4 sm:$0xff]  }
 0x2bc   : > { %7719 = vmatprep.mubr.bf16.mxu1 %v11060_v2  ;;  %v11136_v9 = vpack.c.bf16 %v4396_v11, %v4380_v3  ;;  %7692 = vmatpush1.bf16.msra.mxu1 %v9787_v17  ;;  %v4111_v15 = vadd.f32 %v4110_v52, %v11111_v0  ;;  %v11139_v8 = vadd.f32 %v4159_v7, %v4109_v61  ;;  %v9819_v17 = vld [vmem:[#allocation8 + $0x604] ss:$16 sps:$4 sm:$0xff]   ;;  %v9814_v47 = vld [vmem:[#allocation8 + $0x400] ss:$16 sps:$4 sm:$0xff]  }
 0x2bd   : > { %v4161_v18 = vpop.f32.mrf.mxu1  ;;  %7693 = vmatprep.subr.bf16.mxu1 %v9795_v24  ;;  %v4112_v32 = vpop.f32.mrf.mxu0  ;;  %v9817_v24 = vld [vmem:[#allocation8 + $0x600] ss:$16 sps:$4 sm:$0xff]   ;;  %v9822_v37 = vld [vmem:[#allocation8 + $0x5e4] ss:$16 sps:$4 sm:$0xff]  }
 0x2be   : > { %v11141_v12 = vadd.f32 %v4161_v18, %v4111_v15  ;;  %7643 = vmatpush1.bf16.msra.mxu0 %v9790_v39  ;;  %v9825_v3 = vld [vmem:[#allocation8 + $0x7e4] ss:$16 sps:$4 sm:$0xff]   ;;  %v9820_v11 = vld [vmem:[#allocation8 + $0x5e0] ss:$16 sps:$4 sm:$0xff]  }
 0x2bf   : > { %v4163_v58 = vpop.f32.mrf.mxu1  ;;  %v4113_v23 = vpop.f32.mrf.mxu0  ;;  %7644 = vmatprep.subr.bf16.mxu0 %v9798_v36  ;;  %v9823_v61 = vld [vmem:[#allocation8 + $0x7e0] ss:$16 sps:$4 sm:$0xff]   ;;  %v9828_v7 = vld [vmem:[#allocation8 + $0x5c4] ss:$16 sps:$4 sm:$0xff]  }
 0x2c0   : > { %7694 = vmatpush1.bf16.msra.mxu1 %v9793_v6  ;;  %v9831_v39 = vld [vmem:[#allocation8 + $0x7c4] ss:$16 sps:$4 sm:$0xff]   ;;  %v9826_v52 = vld [vmem:[#allocation8 + $0x5c0] ss:$16 sps:$4 sm:$0xff]  }
 0x2c1   : > { %v4164_v60 = vpop.f32.mrf.mxu1  ;;  %7695 = vmatprep.subr.bf16.mxu1 %v9801_v41  ;;  %v9829_v6 = vld [vmem:[#allocation8 + $0x7c0] ss:$16 sps:$4 sm:$0xff]   ;;  %v9834_v36 = vld [vmem:[#allocation8 + $0x5a4] ss:$16 sps:$4 sm:$0xff]  }
 0x2c2   : > { %7645 = vmatpush1.bf16.msra.mxu0 %v9796_v10  ;;  %v9837_v15 = vld [vmem:[#allocation8 + $0x7a4] ss:$16 sps:$4 sm:$0xff]   ;;  %v9832_v18 = vld [vmem:[#allocation8 + $0x5a0] ss:$16 sps:$4 sm:$0xff]  }
 0x2c3   : > { %7646 = vmatprep.subr.bf16.mxu0 %v9804_v33  ;;  %v9835_v41 = vld [vmem:[#allocation8 + $0x7a0] ss:$16 sps:$4 sm:$0xff]   ;;  %v9840_v32 = vld [vmem:[#allocation8 + $0x584] ss:$16 sps:$4 sm:$0xff]  }
 0x2c4   : > { %7696 = vmatpush1.bf16.msra.mxu1 %v9799_v46  ;;  %v9843_v58 = vld [vmem:[#allocation8 + $0x784] ss:$16 sps:$4 sm:$0xff]   ;;  %v9838_v10 = vld [vmem:[#allocation8 + $0x580] ss:$16 sps:$4 sm:$0xff]  }
 0x2c5   : > { %7697 = vmatprep.subr.bf16.mxu1 %v9807_v26  ;;  %v9841_v23 = vld [vmem:[#allocation8 + $0x780] ss:$16 sps:$4 sm:$0xff]   ;;  %v9846_v46 = vld [vmem:[#allocation8 + $0x564] ss:$16 sps:$4 sm:$0xff]  }
 0x2c6   : > { %7647 = vmatpush1.bf16.msra.mxu0 %v9802_v25  ;;  %v9849_v33 = vld [vmem:[#allocation8 + $0x764] ss:$16 sps:$4 sm:$0xff]   ;;  %v9844_v60 = vld [vmem:[#allocation8 + $0x560] ss:$16 sps:$4 sm:$0xff]  }
 0x2c7   : > { %7648 = vmatprep.subr.bf16.mxu0 %v9810_v62  ;;  %v9847_v26 = vld [vmem:[#allocation8 + $0x760] ss:$16 sps:$4 sm:$0xff]   ;;  %v9852_v25 = vld [vmem:[#allocation8 + $0x544] ss:$16 sps:$4 sm:$0xff]  }
 0x2c8   : > { %7698 = vmatpush1.bf16.msra.mxu1 %v9805_v48  ;;  %v9855_v48 = vld [vmem:[#allocation8 + $0x744] ss:$16 sps:$4 sm:$0xff]   ;;  %v9850_v62 = vld [vmem:[#allocation8 + $0x540] ss:$16 sps:$4 sm:$0xff]  }
 0x2c9   : > { %7699 = vmatprep.subr.bf16.mxu1 %v9813_v30  ;;  %v9853_v30 = vld [vmem:[#allocation8 + $0x740] ss:$16 sps:$4 sm:$0xff]  }
 0x2ca   : > { %7649 = vmatpush1.bf16.msra.mxu0 %v9808_v50  ;;  %v9858_v50 = vld [vmem:[#allocation8 + $0x524] ss:$16 sps:$4 sm:$0xff]  }
 0x2cb   : > { %7650 = vmatprep.subr.bf16.mxu0 %v9816_v20  ;;  %v9856_v20 = vld [vmem:[#allocation8 + $0x520] ss:$16 sps:$4 sm:$0xff]  }
 0x2cc   : > { %7700 = vmatpush1.bf16.msra.mxu1 %v9811_v1  ;;  %v9861_v1 = vld [vmem:[#allocation8 + $0x724] ss:$16 sps:$4 sm:$0xff]  }
 0x2cd   : > { %7701 = vmatprep.subr.bf16.mxu1 %v9819_v17  ;;  %v9859_v17 = vld [vmem:[#allocation8 + $0x720] ss:$16 sps:$4 sm:$0xff]  }
 0x2ce   : > { %7651 = vmatpush1.bf16.msra.mxu0 %v9814_v47  ;;  %v9864_v47 = vld [vmem:[#allocation8 + $0x504] ss:$16 sps:$4 sm:$0xff]  }
 0x2cf   : > { %7652 = vmatprep.subr.bf16.mxu0 %v9822_v37  ;;  %v9862_v37 = vld [vmem:[#allocation8 + $0x500] ss:$16 sps:$4 sm:$0xff]  }
 0x2d0   : > { %7702 = vmatpush1.bf16.msra.mxu1 %v9817_v24  ;;  %v9867_v24 = vld [vmem:[#allocation8 + $0x704] ss:$16 sps:$4 sm:$0xff]  }
 0x2d1   : > { %7703 = vmatprep.subr.bf16.mxu1 %v9825_v3  ;;  %v9865_v3 = vld [vmem:[#allocation8 + $0x700] ss:$16 sps:$4 sm:$0xff]  }
 0x2d2   : > { %7653 = vmatpush2.bf16.msra.mxu0 %v9820_v11  ;;  %v9870_v11 = vld [vmem:[#allocation8 + $0x8e4] ss:$16 sps:$4 sm:$0xff]  }
 0x2d3   : > { %7654 = vmatprep.subr.bf16.mxu0 %v9828_v7  ;;  %v9873_v7 = vld [vmem:[#allocation8 + $0xae4] ss:$16 sps:$4 sm:$0xff]  }
 0x2d4   : > { %7704 = vmatpush2.bf16.msra.mxu1 %v9823_v61  ;;  %v4407_v61 = vmax.f32 %v11028_v51, 0.0 }
 0x2d5   : > { %7705 = vmatprep.subr.bf16.mxu1 %v9831_v39  ;;  %v4409_v39 = vmax.f32 %v11062_v42, 0.0  ;;  %v9871_v42 = vld [vmem:[#allocation8 + $0xae0] ss:$16 sps:$4 sm:$0xff]  }
 0x2d6   : > { %7655 = vmatpush2.bf16.msra.mxu0 %v9826_v52  ;;  %v4105_v52 = vadd.f32 %v11126_v5, %v11111_v0  ;;  %v11155_v51 = vpack.c.bf16 %v4407_v61, %v4407_v61  ;;  %v9883_v61 = vld [vmem:[#allocation8 + $0xaa0] ss:$16 sps:$4 sm:$0xff]  }
 0x2d7   : > { %7656 = vmatprep.subr.bf16.mxu0 %v9834_v36  ;;  %v9868_v36 = vld [vmem:[#allocation8 + $0x8e0] ss:$16 sps:$4 sm:$0xff]   ;;  %v11157_v0 = vpack.c.bf16 %v4409_v39, %v4409_v39 }
 0x2d8   : > { %7706 = vmatpush2.bf16.msra.mxu1 %v9829_v6  ;;  %v965_v6 = vrot.slane %v11064_v13, %v932_v40  ;;  %v4156_v5 = vadd.f32 %v11130_v44, %v4105_v52  ;;  %v9874_v44 = vld [vmem:[#allocation8 + $0x8c0] ss:$16 sps:$4 sm:$0xff]  }
 0x2d9   : > { %7707 = vmatprep.subr.bf16.mxu1 %v9837_v15  ;;  %v11498_v15 = vsub.s32 5, %v10922_v4 }
 0x2da   : > { %7657 = vmatpush2.bf16.msra.mxu0 %v9832_v18 }
 0x2db   : > { %7658 = vmatprep.subr.bf16.mxu0 %v9840_v32  ;;  %v11153_v18 = vrot.slane %v11064_v13, %v11498_v15  ;;  %v9876_v32 = vld [vmem:[#allocation8 + $0x8c4] ss:$16 sps:$4 sm:$0xff]  }
 0x2dc   : > { %7708 = vmatpush2.bf16.msra.mxu1 %v9835_v41 }
 0x2dd   : > { %7709 = vmatprep.subr.bf16.mxu1 %v9843_v58 }
 0x2de   : > { %7659 = vmatpush2.bf16.msra.mxu0 %v9838_v10  ;;  %v9879_v10 = vld [vmem:[#allocation8 + $0xac4] ss:$16 sps:$4 sm:$0xff]  }
 0x2df   : > { %7660 = vmatprep.subr.bf16.mxu0 %v9846_v46 }
 0x2e0   : > { %7710 = vmatpush2.bf16.msra.mxu1 %v9841_v23  ;;  %v4406_v23 = vmax.f32 %v11022_v43, 0.0 }
 0x2e1   : > { %7711 = vmatprep.subr.bf16.mxu1 %v9849_v33 }
 0x2e2   : > { %7661 = vmatpush2.bf16.msra.mxu0 %v9844_v60 }
 0x2e3   : > { %7662 = vmatprep.subr.bf16.mxu0 %v9852_v25 }
 0x2e4   : > { %7712 = vmatpush2.bf16.msra.mxu1 %v9847_v26  ;;  %v4408_v26 = vmax.f32 %v11056_v29, 0.0 }
 0x2e5   : > { %7713 = vmatprep.subr.bf16.mxu1 %v9855_v48  ;;  %v9877_v48 = vld [vmem:[#allocation8 + $0xac0] ss:$16 sps:$4 sm:$0xff]  }
 0x2e6   : > { %7663 = vmatpush2.bf16.msra.mxu0 %v9850_v62  ;;  %v9882_v62 = vld [vmem:[#allocation8 + $0x8a4] ss:$16 sps:$4 sm:$0xff]  }
 0x2e7   : > { %7664 = vmatprep.subr.bf16.mxu0 %v9858_v50 }
 0x2e8   : > { %7714 = vmatpush2.bf16.msra.mxu1 %v9853_v30  ;;  %v4397_v30 = vmax.f32 %v4156_v5, 0.0 }
 0x2e9   : > { %7715 = vmatprep.subr.bf16.mxu1 %v9861_v1 }
 0x2ea   : > { %7665 = vmatpush2.bf16.msra.mxu0 %v9856_v20  ;;  %v9885_v20 = vld [vmem:[#allocation8 + $0xaa4] ss:$16 sps:$4 sm:$0xff]  }
 0x2eb   : > { %7666 = vmatprep.subr.bf16.mxu0 %v9864_v47  ;;  %v11171_v47 = vpack.c.bf16 %v4406_v23, %v4406_v23  ;;  %v9894_v23 = vld [vmem:[#allocation8 + $0x864] ss:$16 sps:$4 sm:$0xff]  }
 0x2ec   : > { %7716 = vmatpush2.bf16.msra.mxu1 %v9859_v17 }
 0x2ed   : > { %7717 = vmatprep.subr.bf16.mxu1 %v9867_v24  ;;  %v4381_v24 = vmax.f32 %v11122_v19, 0.0  ;;  %v9891_v19 = vld [vmem:[#allocation8 + $0xa84] ss:$16 sps:$4 sm:$0xff]  }
 0x2ee   : > { %7667 = vmatpush2.bf16.msra.mxu0 %v9862_v37 }
 0x2ef   : > { %7738 = vmatprep.subr.bf16.mxu0 %v9870_v11  ;;  %v11176_v11 = vpack.c.bf16 %v4408_v26, %v4408_v26  ;;  %v11178_v52 = vpack.c.bf16 %v4397_v30, %v4381_v24  ;;  %v9900_v30 = vld [vmem:[#allocation8 + $0x844] ss:$16 sps:$4 sm:$0xff]  }
 0x2f0   : > { %7718 = vmatpush2.bf16.msra.mxu1 %v9865_v3  ;;  %v9880_v3 = vld [vmem:[#allocation8 + $0x8a0] ss:$16 sps:$4 sm:$0xff]   ;;  %v9906_v24 = vld [vmem:[#allocation8 + $0x824] ss:$16 sps:$4 sm:$0xff]  }
 0x2f1   : > { %v4200_v41 = vpop.f32.mrf.mxu0  ;;  %7789 = vmatprep.subr.bf16.mxu1 %v9873_v7  ;;  %7669 = vmatmul.mubr.bf16.vlgmr.msra.gmra.mxu0 %v11019_v28  ;;  %v9888_v7 = vld [vmem:[#allocation8 + $0x884] ss:$16 sps:$4 sm:$0xff]  }
 0x2f2   : > { %v4201_v40 = vadd.f32 %v4200_v41, %v965_v6  ;;  %7678 = vmatprep.mubr.bf16.mxu0 %v11155_v51  ;;  %7739 = vmatpush1.bf16.msra.mxu0 %v9868_v36 }
 0x2f3   : > { %v4251_v58 = vpop.f32.mrf.mxu1  ;;  %7720 = vmatmul.mubr.bf16.vlgmr.msra.gmra.mxu1 %v11053_v56  ;;  %v4202_v13 = vpop.f32.mrf.mxu0  ;;  %7740 = vmatprep.subr.bf16.mxu0 %v9876_v32 }
 0x2f4   : > { %v4252_v46 = vadd.f32 %v4251_v58, %v4201_v40  ;;  %7729 = vmatprep.mubr.bf16.mxu1 %v11157_v0  ;;  %v4203_v33 = vadd.f32 %v4202_v13, %v11153_v18  ;;  %7790 = vmatpush1.bf16.msra.mxu1 %v9871_v42  ;;  %v9886_v40 = vld [vmem:[#allocation8 + $0x880] ss:$16 sps:$4 sm:$0xff]  }
 0x2f5   : > { %v4253_v60 = vpop.f32.mrf.mxu1  ;;  %v4204_v25 = vpop.f32.mrf.mxu0  ;;  %7791 = vmatprep.subr.bf16.mxu1 %v9879_v10 }
 0x2f6   : > { %v11167_v50 = vadd.f32 %v4253_v60, %v4203_v33  ;;  %v4205_v1 = vadd.f32 %v4204_v25, %v965_v6  ;;  %7741 = vmatpush1.bf16.msra.mxu0 %v9874_v44  ;;  %v4382_v36 = vmax.f32 %v4252_v46, 0.0  ;;  %v9897_v33 = vld [vmem:[#allocation8 + $0xa64] ss:$16 sps:$4 sm:$0xff]   ;;  %v9892_v25 = vld [vmem:[#allocation8 + $0x860] ss:$16 sps:$4 sm:$0xff]  }
 0x2f7   : > { %v4255_v43 = vpop.f32.mrf.mxu1  ;;  %v11169_v17 = vpop.f32.mrf.mxu0  ;;  %7742 = vmatprep.subr.bf16.mxu0 %v9882_v62  ;;  %v9895_v62 = vld [vmem:[#allocation8 + $0xa60] ss:$16 sps:$4 sm:$0xff]  }
 0x2f8   : > { %v4256_v37 = vadd.f32 %v4255_v43, %v4205_v1  ;;  %7792 = vmatpush1.bf16.msra.mxu1 %v9877_v48  ;;  %v9903_v1 = vld [vmem:[#allocation8 + $0xa44] ss:$16 sps:$4 sm:$0xff]   ;;  %v9898_v43 = vld [vmem:[#allocation8 + $0x840] ss:$16 sps:$4 sm:$0xff]  }
 0x2f9   : > { %v11174_v29 = vpop.f32.mrf.mxu1  ;;  %v4210_v39 = vpop.f32.mrf.mxu0  ;;  %7679 = vmatmul.mubr.bf16.gmra.mxu0 %v11171_v47  ;;  %7793 = vmatprep.subr.bf16.mxu1 %v9885_v20  ;;  %v9901_v20 = vld [vmem:[#allocation8 + $0xa40] ss:$16 sps:$4 sm:$0xff]  }
 0x2fa   : > { %v4398_v15 = vmax.f32 %v4256_v37, 0.0  ;;  %v4211_v41 = vadd.f32 %v4210_v39, %v965_v6  ;;  %7770 = vmatprep.mubr.bf16.mxu0 %v11099_v16  ;;  %7743 = vmatpush1.bf16.msra.mxu0 %v9880_v3  ;;  %v9889_v6 = vld [vmem:[#allocation8 + $0xa80] ss:$16 sps:$4 sm:$0xff]   ;;  %v9909_v37 = vld [vmem:[#allocation8 + $0xa24] ss:$16 sps:$4 sm:$0xff]  }
 0x2fb   : > { %v4261_v42 = vpop.f32.mrf.mxu1  ;;  %7730 = vmatmul.mubr.bf16.gmra.mxu1 %v11176_v11  ;;  %v4212_v32 = vpop.f32.mrf.mxu0  ;;  %7744 = vmatprep.subr.bf16.mxu0 %v9888_v7  ;;  %v9904_v3 = vld [vmem:[#allocation8 + $0x820] ss:$16 sps:$4 sm:$0xff]   ;;  %v9912_v7 = vld [vmem:[#allocation8 + $0x804] ss:$16 sps:$4 sm:$0xff]  }
 0x2fc   : > { %v11183_v5 = vpack.c.bf16 %v4398_v15, %v4382_v36  ;;  %7821 = vmatprep.mubr.bf16.mxu1 %v11178_v52  ;;  %v4213_v58 = vadd.f32 %v4212_v32, %v11153_v18  ;;  %v11187_v10 = vadd.f32 %v4261_v42, %v4211_v41  ;;  %7794 = vmatpush1.bf16.msra.mxu1 %v9883_v61  ;;  %v9907_v61 = vld [vmem:[#allocation8 + $0xa20] ss:$16 sps:$4 sm:$0xff]   ;;  %v9915_v39 = vld [vmem:[#allocation8 + $0xa04] ss:$16 sps:$4 sm:$0xff]  }
 0x2fd   : > { %v4263_v13 = vpop.f32.mrf.mxu1  ;;  %v4214_v46 = vpop.f32.mrf.mxu0  ;;  %7795 = vmatprep.subr.bf16.mxu1 %v9891_v19  ;;  %v9910_v36 = vld [vmem:[#allocation8 + $0x800] ss:$16 sps:$4 sm:$0xff]   ;;  %v9918_v19 = vld [vmem:[#allocation8 + $0x9e4] ss:$16 sps:$4 sm:$0xff]  }
 0x2fe   : > { %v11189_v60 = vadd.f32 %v4263_v13, %v4213_v58  ;;  %7745 = vmatpush1.bf16.msra.mxu0 %v9886_v40  ;;  %v9913_v15 = vld [vmem:[#allocation8 + $0xa00] ss:$16 sps:$4 sm:$0xff]   ;;  %v9921_v41 = vld [vmem:[#allocation8 + $0xbe4] ss:$16 sps:$4 sm:$0xff]  }
 0x2ff   : > { %v4265_v44 = vpop.f32.mrf.mxu1  ;;  %v4215_v26 = vpop.f32.mrf.mxu0  ;;  %7746 = vmatprep.subr.bf16.mxu0 %v9894_v23  ;;  %v9916_v42 = vld [vmem:[#allocation8 + $0x9e0] ss:$16 sps:$4 sm:$0xff]   ;;  %v9924_v40 = vld [vmem:[#allocation8 + $0x9c4] ss:$16 sps:$4 sm:$0xff]  }
 0x300   : > { %7796 = vmatpush1.bf16.msra.mxu1 %v9889_v6  ;;  %v9919_v32 = vld [vmem:[#allocation8 + $0xbe0] ss:$16 sps:$4 sm:$0xff]   ;;  %v9927_v58 = vld [vmem:[#allocation8 + $0xbc4] ss:$16 sps:$4 sm:$0xff]  }
 0x301   : > { %v4266_v48 = vpop.f32.mrf.mxu1  ;;  %7797 = vmatprep.subr.bf16.mxu1 %v9897_v33  ;;  %v9922_v13 = vld [vmem:[#allocation8 + $0x9c0] ss:$16 sps:$4 sm:$0xff]   ;;  %v9930_v23 = vld [vmem:[#allocation8 + $0x9a4] ss:$16 sps:$4 sm:$0xff]  }
 0x302   : > { %7747 = vmatpush1.bf16.msra.mxu0 %v9892_v25  ;;  %v9925_v6 = vld [vmem:[#allocation8 + $0xbc0] ss:$16 sps:$4 sm:$0xff]   ;;  %v9933_v46 = vld [vmem:[#allocation8 + $0xba4] ss:$16 sps:$4 sm:$0xff]  }
 0x303   : > { %7748 = vmatprep.subr.bf16.mxu0 %v9900_v30  ;;  %v9928_v33 = vld [vmem:[#allocation8 + $0x9a0] ss:$16 sps:$4 sm:$0xff]   ;;  %v9936_v26 = vld [vmem:[#allocation8 + $0x984] ss:$16 sps:$4 sm:$0xff]  }
 0x304   : > { %7798 = vmatpush1.bf16.msra.mxu1 %v9895_v62  ;;  %v9931_v44 = vld [vmem:[#allocation8 + $0xba0] ss:$16 sps:$4 sm:$0xff]   ;;  %v9939_v25 = vld [vmem:[#allocation8 + $0xb84] ss:$16 sps:$4 sm:$0xff]  }
 0x305   : > { %7799 = vmatprep.subr.bf16.mxu1 %v9903_v1  ;;  %v9934_v48 = vld [vmem:[#allocation8 + $0x980] ss:$16 sps:$4 sm:$0xff]   ;;  %v9942_v30 = vld [vmem:[#allocation8 + $0x964] ss:$16 sps:$4 sm:$0xff]  }
 0x306   : > { %7749 = vmatpush1.bf16.msra.mxu0 %v9898_v43  ;;  %v9937_v62 = vld [vmem:[#allocation8 + $0xb80] ss:$16 sps:$4 sm:$0xff]   ;;  %v9945_v1 = vld [vmem:[#allocation8 + $0xb64] ss:$16 sps:$4 sm:$0xff]  }
 0x307   : > { %7750 = vmatprep.subr.bf16.mxu0 %v9906_v24  ;;  %v9940_v43 = vld [vmem:[#allocation8 + $0x960] ss:$16 sps:$4 sm:$0xff]   ;;  %v9948_v24 = vld [vmem:[#allocation8 + $0x944] ss:$16 sps:$4 sm:$0xff]  }
 0x308   : > { %7800 = vmatpush1.bf16.msra.mxu1 %v9901_v20  ;;  %v9943_v20 = vld [vmem:[#allocation8 + $0xb60] ss:$16 sps:$4 sm:$0xff]  }
 0x309   : > { %7801 = vmatprep.subr.bf16.mxu1 %v9909_v37  ;;  %v9951_v37 = vld [vmem:[#allocation8 + $0xb44] ss:$16 sps:$4 sm:$0xff]  }
 0x30a   : > { %7751 = vmatpush1.bf16.msra.mxu0 %v9904_v3  ;;  %v9946_v3 = vld [vmem:[#allocation8 + $0x940] ss:$16 sps:$4 sm:$0xff]  }
 0x30b   : > { %7752 = vmatprep.subr.bf16.mxu0 %v9912_v7  ;;  %v9954_v7 = vld [vmem:[#allocation8 + $0x924] ss:$16 sps:$4 sm:$0xff]  }
 0x30c   : > { %7802 = vmatpush1.bf16.msra.mxu1 %v9907_v61  ;;  %v9949_v61 = vld [vmem:[#allocation8 + $0xb40] ss:$16 sps:$4 sm:$0xff]  }
 0x30d   : > { %7803 = vmatprep.subr.bf16.mxu1 %v9915_v39  ;;  %v9957_v39 = vld [vmem:[#allocation8 + $0xb24] ss:$16 sps:$4 sm:$0xff]  }
 0x30e   : > { %7753 = vmatpush1.bf16.msra.mxu0 %v9910_v36  ;;  %v9952_v36 = vld [vmem:[#allocation8 + $0x920] ss:$16 sps:$4 sm:$0xff]  }
 0x30f   : > { %7754 = vmatprep.subr.bf16.mxu0 %v9918_v19  ;;  %v9960_v19 = vld [vmem:[#allocation8 + $0x904] ss:$16 sps:$4 sm:$0xff]  }
 0x310   : > { %7804 = vmatpush1.bf16.msra.mxu1 %v9913_v15  ;;  %v9955_v15 = vld [vmem:[#allocation8 + $0xb20] ss:$16 sps:$4 sm:$0xff]  }
 0x311   : > { %7805 = vmatprep.subr.bf16.mxu1 %v9921_v41  ;;  %v9963_v41 = vld [vmem:[#allocation8 + $0xb04] ss:$16 sps:$4 sm:$0xff]  }
 0x312   : > { %7755 = vmatpush2.bf16.msra.mxu0 %v9916_v42  ;;  %v9958_v42 = vld [vmem:[#allocation8 + $0x900] ss:$16 sps:$4 sm:$0xff]  }
 0x313   : > { %7756 = vmatprep.subr.bf16.mxu0 %v9924_v40  ;;  %v9966_v40 = vld [vmem:[#allocation8 + $0xce4] ss:$16 sps:$4 sm:$0xff]  }
 0x314   : > { %7806 = vmatpush2.bf16.msra.mxu1 %v9919_v32  ;;  %v9961_v32 = vld [vmem:[#allocation8 + $0xb00] ss:$16 sps:$4 sm:$0xff]  }
 0x315   : > { %7807 = vmatprep.subr.bf16.mxu1 %v9927_v58  ;;  %v4411_v58 = vmax.f32 %v11101_v53, 0.0 }
 0x316   : > { %7757 = vmatpush2.bf16.msra.mxu0 %v9922_v13  ;;  %v4207_v13 = vadd.f32 %v11169_v17, %v11153_v18 }
 0x317   : > { %7758 = vmatprep.subr.bf16.mxu0 %v9930_v23  ;;  %v4413_v23 = vmax.f32 %v11141_v12, 0.0  ;;  %v11204_v53 = vpack.c.bf16 %v4411_v58, %v4411_v58  ;;  %v9967_v12 = vld [vmem:[#allocation8 + $0xee0] ss:$16 sps:$4 sm:$0xff]  }
 0x318   : > { %7808 = vmatpush2.bf16.msra.mxu1 %v9925_v6  ;;  %v9969_v6 = vld [vmem:[#allocation8 + $0xee4] ss:$16 sps:$4 sm:$0xff]   ;;  %v4258_v18 = vadd.f32 %v11174_v29, %v4207_v13  ;;  %v4410_v29 = vmax.f32 %v11097_v63, 0.0  ;;  %v4383_v63 = vmax.f32 %v11167_v50, 0.0 }
 0x319   : > { %7809 = vmatprep.subr.bf16.mxu1 %v9933_v46  ;;  %v11195_v46 = vld [vmem:[#allocation7 + $0x8] sm:$0xff] }
 0x31a   : > { %7759 = vmatpush2.bf16.msra.mxu0 %v9928_v33  ;;  %v11499_v33 = vsub.s32 7, %v10922_v4 }
 0x31b   : > { %7760 = vmatprep.subr.bf16.mxu0 %v9936_v26 }
 0x31c   : > { %7810 = vmatpush2.bf16.msra.mxu1 %v9931_v44  ;;  %v11200_v44 = vrot.slane %v11195_v46, %v11499_v33  ;;  %v9979_v33 = vld [vmem:[#allocation8 + $0xea0] ss:$16 sps:$4 sm:$0xff]  }
 0x31d   : > { %7811 = vmatprep.subr.bf16.mxu1 %v9939_v25  ;;  %v9964_v25 = vld [vmem:[#allocation8 + $0xce0] ss:$16 sps:$4 sm:$0xff]  }
 0x31e   : > { %7761 = vmatpush2.bf16.msra.mxu0 %v9934_v48  ;;  %v9972_v48 = vld [vmem:[#allocation8 + $0xcc4] ss:$16 sps:$4 sm:$0xff]  }
 0x31f   : > { %7762 = vmatprep.subr.bf16.mxu0 %v9942_v30 }
 0x320   : > { %7812 = vmatpush2.bf16.msra.mxu1 %v9937_v62  ;;  %v11209_v62 = vpack.c.bf16 %v4413_v23, %v4413_v23 }
 0x321   : > { %7813 = vmatprep.subr.bf16.mxu1 %v9945_v1  ;;  %v9975_v1 = vld [vmem:[#allocation8 + $0xec4] ss:$16 sps:$4 sm:$0xff]  }
 0x322   : > { %7763 = vmatpush2.bf16.msra.mxu0 %v9940_v43 }
 0x323   : > { %7764 = vmatprep.subr.bf16.mxu0 %v9948_v24 }
 0x324   : > { %7814 = vmatpush2.bf16.msra.mxu1 %v9943_v20 }
 0x325   : > { %7815 = vmatprep.subr.bf16.mxu1 %v9951_v37  ;;  %v9970_v37 = vld [vmem:[#allocation8 + $0xcc0] ss:$16 sps:$4 sm:$0xff]  }
 0x326   : > { %7765 = vmatpush2.bf16.msra.mxu0 %v9946_v3  ;;  %v4412_v3 = vmax.f32 %v11139_v8, 0.0  ;;  %v9976_v8 = vld [vmem:[#allocation8 + $0xca0] ss:$16 sps:$4 sm:$0xff]  }
 0x327   : > { %7766 = vmatprep.subr.bf16.mxu0 %v9954_v7 }
 0x328   : > { %7816 = vmatpush2.bf16.msra.mxu1 %v9949_v61  ;;  %v4399_v61 = vmax.f32 %v4258_v18, 0.0  ;;  %v11228_v13 = vpack.c.bf16 %v4412_v3, %v4412_v3  ;;  %v9987_v18 = vld [vmem:[#allocation8 + $0xe84] ss:$16 sps:$4 sm:$0xff]  }
 0x329   : > { %7817 = vmatprep.subr.bf16.mxu1 %v9957_v39  ;;  %v9973_v39 = vld [vmem:[#allocation8 + $0xec0] ss:$16 sps:$4 sm:$0xff]   ;;  %v9990_v3 = vld [vmem:[#allocation8 + $0xc64] ss:$16 sps:$4 sm:$0xff]  }
 0x32a   : > { %7767 = vmatpush2.bf16.msra.mxu0 %v9952_v36  ;;  %v9978_v36 = vld [vmem:[#allocation8 + $0xca4] ss:$16 sps:$4 sm:$0xff]  }
 0x32b   : > { %7768 = vmatprep.subr.bf16.mxu0 %v9960_v19  ;;  %v9981_v19 = vld [vmem:[#allocation8 + $0xea4] ss:$16 sps:$4 sm:$0xff]  }
 0x32c   : > { %7818 = vmatpush2.bf16.msra.mxu1 %v9955_v15 }
 0x32d   : > { %7819 = vmatprep.subr.bf16.mxu1 %v9963_v41 }
 0x32e   : > { %7769 = vmatpush2.bf16.msra.mxu0 %v9958_v42 }
 0x32f   : > { %7840 = vmatprep.subr.bf16.mxu0 %v9966_v40  ;;  %v11224_v40 = vpack.c.bf16 %v4410_v29, %v4410_v29 }
 0x330   : > { %7820 = vmatpush2.bf16.msra.mxu1 %v9961_v32 }
 0x331   : > { %v11202_v26 = vpop.f32.mrf.mxu0  ;;  %7891 = vmatprep.subr.bf16.mxu1 %v9969_v6  ;;  %7771 = vmatmul.mubr.bf16.vlgmr.msra.gmra.mxu0 %v11093_v57  ;;  %v11230_v6 = vpack.c.bf16 %v4399_v61, %v4383_v63  ;;  %v9991_v63 = vld [vmem:[#allocation8 + $0xe60] ss:$16 sps:$4 sm:$0xff]  }
 0x332   : > { %7780 = vmatprep.mubr.bf16.mxu0 %v11204_v53  ;;  %7841 = vmatpush1.bf16.msra.mxu0 %v9964_v25  ;;  %v9984_v25 = vld [vmem:[#allocation8 + $0xc84] ss:$16 sps:$4 sm:$0xff]  }
 0x333   : > { %v11207_v17 = vpop.f32.mrf.mxu1  ;;  %v4304_v30 = vpop.f32.mrf.mxu0  ;;  %7822 = vmatmul.mubr.bf16.vlgmr.msra.gmra.mxu1 %v11136_v9  ;;  %7842 = vmatprep.subr.bf16.mxu0 %v9972_v48 }
 0x334   : > { %v4305_v43 = vadd.f32 %v4304_v30, %v11200_v44  ;;  %7831 = vmatprep.mubr.bf16.mxu1 %v11209_v62  ;;  %7892 = vmatpush1.bf16.msra.mxu1 %v9967_v12 }
 0x335   : > { %v4355_v20 = vpop.f32.mrf.mxu1  ;;  %v11217_v24 = vpop.f32.mrf.mxu0  ;;  %7893 = vmatprep.subr.bf16.mxu1 %v9975_v1 }
 0x336   : > { %v4356_v41 = vadd.f32 %v4355_v20, %v4305_v43  ;;  %7843 = vmatpush1.bf16.msra.mxu0 %v9970_v37  ;;  %v9982_v43 = vld [vmem:[#allocation8 + $0xc80] ss:$16 sps:$4 sm:$0xff]  }
 0x337   : > { %v11220_v7 = vpop.f32.mrf.mxu1  ;;  %v4308_v15 = vpop.f32.mrf.mxu0  ;;  %7844 = vmatprep.subr.bf16.mxu0 %v9978_v36  ;;  %v9985_v37 = vld [vmem:[#allocation8 + $0xe80] ss:$16 sps:$4 sm:$0xff]  }
 0x338   : > { %v4309_v42 = vadd.f32 %v4308_v15, %v11200_v44  ;;  %7894 = vmatpush1.bf16.msra.mxu1 %v9973_v39  ;;  %v4385_v48 = vmax.f32 %v4356_v41, 0.0  ;;  %v9993_v39 = vld [vmem:[#allocation8 + $0xe64] ss:$16 sps:$4 sm:$0xff]  }
 0x339   : > { %v4359_v32 = vpop.f32.mrf.mxu1  ;;  %v11226_v58 = vpop.f32.mrf.mxu0  ;;  %7781 = vmatmul.mubr.bf16.gmra.mxu0 %v11224_v40  ;;  %7895 = vmatprep.subr.bf16.mxu1 %v9981_v19  ;;  %v9988_v19 = vld [vmem:[#allocation8 + $0xc60] ss:$16 sps:$4 sm:$0xff]   ;;  %v9996_v41 = vld [vmem:[#allocation8 + $0xc44] ss:$16 sps:$4 sm:$0xff]  }
 0x33a   : > { %v4360_v23 = vadd.f32 %v4359_v32, %v4309_v42  ;;  %7872 = vmatprep.mubr.bf16.mxu0 %v11230_v6  ;;  %7845 = vmatpush1.bf16.msra.mxu0 %v9976_v8  ;;  %v9999_v42 = vld [vmem:[#allocation8 + $0xe44] ss:$16 sps:$4 sm:$0xff]   ;;  %v9994_v32 = vld [vmem:[#allocation8 + $0xc40] ss:$16 sps:$4 sm:$0xff]  }
 0x33b   : > { %v11232_v50 = vpop.f32.mrf.mxu1  ;;  %v11235_v12 = vpop.f32.mrf.mxu0  ;;  %7832 = vmatmul.mubr.bf16.gmra.mxu1 %v11228_v13  ;;  %7846 = vmatprep.subr.bf16.mxu0 %v9984_v25  ;;  %v9997_v8 = vld [vmem:[#allocation8 + $0xe40] ss:$16 sps:$4 sm:$0xff]  }
 0x33c   : > { %v4401_v30 = vmax.f32 %v4360_v23, 0.0  ;;  %7896 = vmatpush1.bf16.msra.mxu1 %v9979_v33  ;;  %v10002_v23 = vld [vmem:[#allocation8 + $0xc24] ss:$16 sps:$4 sm:$0xff]   ;;  %v10000_v25 = vld [vmem:[#allocation8 + $0xc20] ss:$16 sps:$4 sm:$0xff]  }
 0x33d   : > { %v11239_v1 = vpop.f32.mrf.mxu1  ;;  %v4316_v20 = vpop.f32.mrf.mxu0  ;;  %7897 = vmatprep.subr.bf16.mxu1 %v9987_v18  ;;  %v10005_v33 = vld [vmem:[#allocation8 + $0xe24] ss:$16 sps:$4 sm:$0xff]   ;;  %v10003_v18 = vld [vmem:[#allocation8 + $0xe20] ss:$16 sps:$4 sm:$0xff]  }
 0x33e   : > { %v11241_v29 = vpack.c.bf16 %v4401_v30, %v4385_v48  ;;  %7847 = vmatpush1.bf16.msra.mxu0 %v9982_v43  ;;  %v10008_v48 = vld [vmem:[#allocation8 + $0xc04] ss:$16 sps:$4 sm:$0xff]   ;;  %v10006_v43 = vld [vmem:[#allocation8 + $0xc00] ss:$16 sps:$4 sm:$0xff]  }
 0x33f   : > { %v4367_v61 = vpop.f32.mrf.mxu1  ;;  %v4317_v36 = vpop.f32.mrf.mxu0  ;;  %7848 = vmatprep.subr.bf16.mxu0 %v9990_v3  ;;  %v10011_v30 = vld [vmem:[#allocation8 + $0xe04] ss:$16 sps:$4 sm:$0xff]   ;;  %v10009_v20 = vld [vmem:[#allocation8 + $0xe00] ss:$16 sps:$4 sm:$0xff]  }
 0x340   : > { %7923 = vmatprep.mubr.bf16.mxu1 %v11241_v29  ;;  %7898 = vmatpush1.bf16.msra.mxu1 %v9985_v37  ;;  %v10014_v37 = vld [vmem:[#allocation8 + $0xde4] ss:$16 sps:$4 sm:$0xff]   ;;  %v10012_v61 = vld [vmem:[#allocation8 + $0xde0] ss:$16 sps:$4 sm:$0xff]  }
 0x341   : > { %v4368_v15 = vpop.f32.mrf.mxu1  ;;  %7899 = vmatprep.subr.bf16.mxu1 %v9993_v39  ;;  %v10017_v3 = vld [vmem:[#allocation8 + $0xfe4] ss:$16 sps:$4 sm:$0xff]   ;;  %v10015_v39 = vld [vmem:[#allocation8 + $0xfe0] ss:$16 sps:$4 sm:$0xff]  }
 0x342   : > { %7849 = vmatpush1.bf16.msra.mxu0 %v9988_v19  ;;  %v10020_v36 = vld [vmem:[#allocation8 + $0xdc4] ss:$16 sps:$4 sm:$0xff]   ;;  %v10018_v19 = vld [vmem:[#allocation8 + $0xdc0] ss:$16 sps:$4 sm:$0xff]  }
 0x343   : > { %7850 = vmatprep.subr.bf16.mxu0 %v9996_v41  ;;  %v10023_v15 = vld [vmem:[#allocation8 + $0xfc4] ss:$16 sps:$4 sm:$0xff]  }
 0x344   : > { %7900 = vmatpush1.bf16.msra.mxu1 %v9991_v63  ;;  %v10021_v63 = vld [vmem:[#allocation8 + $0xfc0] ss:$16 sps:$4 sm:$0xff]   ;;  %v10026_v41 = vld [vmem:[#allocation8 + $0xda4] ss:$16 sps:$4 sm:$0xff]  }
 0x345   : > { %7901 = vmatprep.subr.bf16.mxu1 %v9999_v42  ;;  %v10029_v42 = vld [vmem:[#allocation8 + $0xfa4] ss:$16 sps:$4 sm:$0xff]  }
 0x346   : > { %7851 = vmatpush1.bf16.msra.mxu0 %v9994_v32  ;;  %v10024_v32 = vld [vmem:[#allocation8 + $0xda0] ss:$16 sps:$4 sm:$0xff]  }
 0x347   : > { %7852 = vmatprep.subr.bf16.mxu0 %v10002_v23  ;;  %v10032_v23 = vld [vmem:[#allocation8 + $0xd84] ss:$16 sps:$4 sm:$0xff]  }
 0x348   : > { %7902 = vmatpush1.bf16.msra.mxu1 %v9997_v8  ;;  %v10027_v8 = vld [vmem:[#allocation8 + $0xfa0] ss:$16 sps:$4 sm:$0xff]  }
 0x349   : > { %7903 = vmatprep.subr.bf16.mxu1 %v10005_v33  ;;  %v10035_v33 = vld [vmem:[#allocation8 + $0xf84] ss:$16 sps:$4 sm:$0xff]  }
 0x34a   : > { %7853 = vmatpush1.bf16.msra.mxu0 %v10000_v25  ;;  %v10030_v25 = vld [vmem:[#allocation8 + $0xd80] ss:$16 sps:$4 sm:$0xff]  }
 0x34b   : > { %7854 = vmatprep.subr.bf16.mxu0 %v10008_v48  ;;  %v10038_v48 = vld [vmem:[#allocation8 + $0xd64] ss:$16 sps:$4 sm:$0xff]  }
 0x34c   : > { %7904 = vmatpush1.bf16.msra.mxu1 %v10003_v18  ;;  %v10033_v18 = vld [vmem:[#allocation8 + $0xf80] ss:$16 sps:$4 sm:$0xff]  }
 0x34d   : > { %7905 = vmatprep.subr.bf16.mxu1 %v10011_v30  ;;  %v10041_v30 = vld [vmem:[#allocation8 + $0xf64] ss:$16 sps:$4 sm:$0xff]  }
 0x34e   : > { %7855 = vmatpush1.bf16.msra.mxu0 %v10006_v43  ;;  %v10036_v43 = vld [vmem:[#allocation8 + $0xd60] ss:$16 sps:$4 sm:$0xff]  }
 0x34f   : > { %7856 = vmatprep.subr.bf16.mxu0 %v10014_v37  ;;  %v10044_v37 = vld [vmem:[#allocation8 + $0xd44] ss:$16 sps:$4 sm:$0xff]  }
 0x350   : > { %7906 = vmatpush1.bf16.msra.mxu1 %v10009_v20  ;;  %v10039_v20 = vld [vmem:[#allocation8 + $0xf60] ss:$16 sps:$4 sm:$0xff]  }
 0x351   : > { %7907 = vmatprep.subr.bf16.mxu1 %v10017_v3  ;;  %v10047_v3 = vld [vmem:[#allocation8 + $0xf44] ss:$16 sps:$4 sm:$0xff]  }
 0x352   : > { %7857 = vmatpush2.bf16.msra.mxu0 %v10012_v61  ;;  %v11500_v61 = vsub.s32 6, %v10922_v4  ;;  %v10051_v4 = vld [vmem:[#allocation8 + $0xf20] ss:$16 sps:$4 sm:$0xff]  }
 0x353   : > { %7858 = vmatprep.subr.bf16.mxu0 %v10020_v36  ;;  %v10042_v36 = vld [vmem:[#allocation8 + $0xd40] ss:$16 sps:$4 sm:$0xff]  }
 0x354   : > { %7908 = vmatpush2.bf16.msra.mxu1 %v10015_v39  ;;  %v973_v39 = vrot.slane %v11195_v46, %v11500_v61  ;;  %v10056_v46 = vld [vmem:[#allocation8 + $0xd04] ss:$16 sps:$4 sm:$0xff]  }
 0x355   : > { %7909 = vmatprep.subr.bf16.mxu1 %v10023_v15  ;;  %v10045_v15 = vld [vmem:[#allocation8 + $0xf40] ss:$16 sps:$4 sm:$0xff]  }
 0x356   : > { %7859 = vmatpush2.bf16.msra.mxu0 %v10018_v19  ;;  %v10050_v19 = vld [vmem:[#allocation8 + $0xd24] ss:$16 sps:$4 sm:$0xff]  }
 0x357   : > { %7860 = vmatprep.subr.bf16.mxu0 %v10026_v41  ;;  %v4315_v41 = vadd.f32 %v11235_v12, %v11200_v44  ;;  %v4415_v44 = vmax.f32 %v11189_v60, 0.0  ;;  %v10062_v12 = vld [vmem:[#allocation8 + $0xec] ss:$16 sps:$4 sm:$0xff]   ;;  %v10063_v60 = vld [vmem:[#allocation8 + $0x2e8] ss:$16 sps:$4 sm:$0xff]  }
 0x358   : > { %7910 = vmatpush2.bf16.msra.mxu1 %v10021_v63  ;;  %v4307_v63 = vadd.f32 %v11217_v24, %v973_v39 }
 0x359   : > { %7911 = vmatprep.subr.bf16.mxu1 %v10029_v42  ;;  %v10053_v42 = vld [vmem:[#allocation8 + $0xf24] ss:$16 sps:$4 sm:$0xff]  }
 0x35a   : > { %7861 = vmatpush2.bf16.msra.mxu0 %v10024_v32  ;;  %v4303_v32 = vadd.f32 %v11202_v26, %v973_v39  ;;  %v10057_v26 = vld [vmem:[#allocation8 + $0xf00] ss:$16 sps:$4 sm:$0xff]  }
 0x35b   : > { %7862 = vmatprep.subr.bf16.mxu0 %v10032_v23  ;;  %v4358_v23 = vadd.f32 %v11220_v7, %v4307_v63  ;;  %v10065_v7 = vld [vmem:[#allocation8 + $0x2ec] ss:$16 sps:$4 sm:$0xff]  }
 0x35c   : > { %7912 = vmatpush2.bf16.msra.mxu1 %v10027_v8  ;;  %v10048_v8 = vld [vmem:[#allocation8 + $0xd20] ss:$16 sps:$4 sm:$0xff]   ;;  %v4354_v24 = vadd.f32 %v11207_v17, %v4303_v32 }
 0x35d   : > { %7913 = vmatprep.subr.bf16.mxu1 %v10035_v33  ;;  %v4366_v33 = vadd.f32 %v11239_v1, %v4315_v41  ;;  %v10071_v41 = vld [vmem:[#allocation8 + $0x2cc] ss:$16 sps:$4 sm:$0xff]  }
 0x35e   : > { %7863 = vmatpush2.bf16.msra.mxu0 %v10030_v25  ;;  %v10059_v25 = vld [vmem:[#allocation8 + $0xf04] ss:$16 sps:$4 sm:$0xff]  }
 0x35f   : > { %7864 = vmatprep.subr.bf16.mxu0 %v10038_v48  ;;  %v4400_v48 = vmax.f32 %v4358_v23, 0.0 }
 0x360   : > { %7914 = vmatpush2.bf16.msra.mxu1 %v10033_v18  ;;  %v10054_v18 = vld [vmem:[#allocation8 + $0xd00] ss:$16 sps:$4 sm:$0xff]  }
 0x361   : > { %7915 = vmatprep.subr.bf16.mxu1 %v10041_v30  ;;  %v4313_v30 = vadd.f32 %v11226_v58, %v973_v39 }
 0x362   : > { %7865 = vmatpush2.bf16.msra.mxu0 %v10036_v43  ;;  %v4417_v43 = vmax.f32 %v4366_v33, 0.0 }
 0x363   : > { %7866 = vmatprep.subr.bf16.mxu0 %v10044_v37  ;;  %v11256_v37 = vpack.c.bf16 %v4415_v44, %v4415_v44 }
 0x364   : > { %7916 = vmatpush2.bf16.msra.mxu1 %v10039_v20  ;;  %v4384_v20 = vmax.f32 %v4354_v24, 0.0  ;;  %v10074_v24 = vld [vmem:[#allocation8 + $0xac] ss:$16 sps:$4 sm:$0xff]  }
 0x365   : > { %7917 = vmatprep.subr.bf16.mxu1 %v10047_v3  ;;  %v10060_v3 = vld [vmem:[#allocation8 + $0xe8] ss:$16 sps:$4 sm:$0xff]  }
 0x366   : > { %7867 = vmatpush2.bf16.msra.mxu0 %v10042_v36  ;;  %v11258_v61 = vpack.c.bf16 %v4400_v48, %v4384_v20  ;;  %v4364_v36 = vadd.f32 %v11232_v50, %v4313_v30  ;;  %v4414_v50 = vmax.f32 %v11187_v10, 0.0  ;;  %v10072_v30 = vld [vmem:[#allocation8 + $0xa8] ss:$16 sps:$4 sm:$0xff]  }
 0x367   : > { %7868 = vmatprep.subr.bf16.mxu0 %v10050_v19  ;;  %v10068_v19 = vld [vmem:[#allocation8 + $0xcc] ss:$16 sps:$4 sm:$0xff]  }
 0x368   : > { %7918 = vmatpush2.bf16.msra.mxu1 %v10045_v15  ;;  %v11261_v15 = vpack.c.bf16 %v4417_v43, %v4417_v43  ;;  %v4416_v23 = vmax.f32 %v4364_v36, 0.0  ;;  %v11276_v10 = vpack.c.bf16 %v4414_v50, %v4414_v50  ;;  %v10075_v43 = vld [vmem:[#allocation8 + $0x2a8] ss:$16 sps:$4 sm:$0xff]   ;;  %v10086_v50 = vld [vmem:[#allocation8 + $0x6c] ss:$16 sps:$4 sm:$0xff]  }
 0x369   : > { %7919 = vmatprep.subr.bf16.mxu1 %v10053_v42 }
 0x36a   : > { %7869 = vmatpush2.bf16.msra.mxu0 %v10048_v8 }
 0x36b   : > { %7870 = vmatprep.subr.bf16.mxu0 %v10056_v46  ;;  %v10069_v46 = vld [vmem:[#allocation8 + $0x2c8] ss:$16 sps:$4 sm:$0xff]  }
 0x36c   : > { %7920 = vmatpush2.bf16.msra.mxu1 %v10051_v4  ;;  %v10066_v4 = vld [vmem:[#allocation8 + $0xc8] ss:$16 sps:$4 sm:$0xff]  }
 0x36d   : > { %7921 = vmatprep.subr.bf16.mxu1 %v10059_v25 }
 0x36e   : > { %7871 = vmatpush2.bf16.msra.mxu0 %v10054_v18  ;;  %v10077_v18 = vld [vmem:[#allocation8 + $0x2ac] ss:$16 sps:$4 sm:$0xff]  }
 0x36f   : > { %7942 = vmatprep.subr.bf16.mxu0 %v10062_v12 }
 0x370   : > { %7922 = vmatpush2.bf16.msra.mxu1 %v10057_v26 }
 0x371   : > { %v7568_v1 = vpop.f32.mrf.mxu0  ;;  %7993 = vmatprep.subr.bf16.mxu1 %v10065_v7  ;;  %7873 = vmatmul.mubr.bf16.vlgmr.msra.gmra.mxu0 %v11183_v5  ;;  %v11278_v7 = vpack.c.bf16 %v4416_v23, %v4416_v23  ;;  %v10092_v23 = vld [vmem:[#allocation8 + $0x4c] ss:$16 sps:$4 sm:$0xff]  }
 0x372   : > { %7882 = vmatprep.mubr.bf16.mxu0 %v11256_v37  ;;  %7943 = vmatpush1.bf16.msra.mxu0 %v10060_v3 }
 0x373   : > { %v7619_v17 = vpop.f32.mrf.mxu1  ;;  %v7570_v39 = vpop.f32.mrf.mxu0  ;;  %7924 = vmatmul.mubr.bf16.vlgmr.msra.gmra.mxu1 %v11258_v61  ;;  %7944 = vmatprep.subr.bf16.mxu0 %v10068_v19 }
 0x374   : > { %v11263_v58 = vadd.f32 %v7619_v17, %v7568_v1  ;;  %7994 = vmatpush1.bf16.msra.mxu1 %v10063_v60  ;;  %7933 = vmatprep.mubr.bf16.mxu1 %v11261_v15  ;;  %v10080_v17 = vld [vmem:[#allocation8 + $0x8c] ss:$16 sps:$4 sm:$0xff]  }
 0x375   : > { %v7621_v63 = vpop.f32.mrf.mxu1  ;;  %v7572_v32 = vpop.f32.mrf.mxu0  ;;  %7995 = vmatprep.subr.bf16.mxu1 %v10071_v41  ;;  %v10083_v60 = vld [vmem:[#allocation8 + $0x28c] ss:$16 sps:$4 sm:$0xff]   ;;  %v10081_v41 = vld [vmem:[#allocation8 + $0x288] ss:$16 sps:$4 sm:$0xff]  }
 0x376   : > { %v11268_v42 = vadd.f32 %v7621_v63, %v7570_v39  ;;  %7945 = vmatpush1.bf16.msra.mxu0 %v10066_v4  ;;  %v10078_v63 = vld [vmem:[#allocation8 + $0x88] ss:$16 sps:$4 sm:$0xff]  }
 0x377   : > { %v7623_v8 = vpop.f32.mrf.mxu1  ;;  %v7574_v25 = vpop.f32.mrf.mxu0  ;;  %7946 = vmatprep.subr.bf16.mxu0 %v10074_v24  ;;  %v10090_v24 = vld [vmem:[#allocation8 + $0x48] ss:$16 sps:$4 sm:$0xff]  }
 0x378   : > { %v11272_v33 = vadd.f32 %v7623_v8, %v7572_v32  ;;  %7996 = vmatpush1.bf16.msra.mxu1 %v10069_v46  ;;  %v10089_v8 = vld [vmem:[#allocation8 + $0x26c] ss:$16 sps:$4 sm:$0xff]   ;;  %v10084_v46 = vld [vmem:[#allocation8 + $0x68] ss:$16 sps:$4 sm:$0xff]  }
 0x379   : > { %v7625_v44 = vpop.f32.mrf.mxu1  ;;  %v7578_v12 = vpop.f32.mrf.mxu0  ;;  %7997 = vmatprep.subr.bf16.mxu1 %v10077_v18  ;;  %7883 = vmatmul.mubr.bf16.gmra.mxu0 %v11276_v10  ;;  %v10093_v18 = vld [vmem:[#allocation8 + $0x248] ss:$16 sps:$4 sm:$0xff]  }
 0x37a   : > { %v11274_v26 = vadd.f32 %v7625_v44, %v7574_v25  ;;  %7974 = vmatprep.mubr.bf16.mxu0 %v11087_v35  ;;  %7947 = vmatpush1.bf16.msra.mxu0 %v10072_v30  ;;  %v10087_v35 = vld [vmem:[#allocation8 + $0x268] ss:$16 sps:$4 sm:$0xff]   ;;  %v10095_v25 = vld [vmem:[#allocation8 + $0x24c] ss:$16 sps:$4 sm:$0xff]  }
 0x37b   : > { %v7629_v48 = vpop.f32.mrf.mxu1  ;;  %v7580_v1 = vpop.f32.mrf.mxu0  ;;  %7934 = vmatmul.mubr.bf16.gmra.mxu1 %v11278_v7  ;;  %7948 = vmatprep.subr.bf16.mxu0 %v10080_v17  ;;  %v10101_v44 = vld [vmem:[#allocation8 + $0x22c] ss:$16 sps:$4 sm:$0xff]   ;;  %v10105_v17 = vld [vmem:[#allocation8 + $0x208] ss:$16 sps:$4 sm:$0xff]  }
 0x37c   : > { %v11280_v20 = vadd.f32 %v7629_v48, %v7578_v12  ;;  %7998 = vmatpush1.bf16.msra.mxu1 %v10075_v43  ;;  %8025 = vmatprep.mubr.bf16.mxu1 %v11089_v21  ;;  %v10098_v21 = vld [vmem:[#allocation8 + $0x2c] ss:$16 sps:$4 sm:$0xff]   ;;  %v10096_v12 = vld [vmem:[#allocation8 + $0x28] ss:$16 sps:$4 sm:$0xff]  }
 0x37d   : > { %v7631_v3 = vpop.f32.mrf.mxu1  ;;  %v7582_v39 = vpop.f32.mrf.mxu0  ;;  %7999 = vmatprep.subr.bf16.mxu1 %v10083_v60  ;;  %v10099_v48 = vld [vmem:[#allocation8 + $0x228] ss:$16 sps:$4 sm:$0xff]   ;;  %v10104_v30 = vld [vmem:[#allocation8 + $0xc] ss:$16 sps:$4 sm:$0xff]  }
 0x37e   : > { %v11285_v36 = vadd.f32 %v7631_v3, %v7580_v1  ;;  %7949 = vmatpush1.bf16.msra.mxu0 %v10078_v63  ;;  %v10107_v43 = vld [vmem:[#allocation8 + $0x20c] ss:$16 sps:$4 sm:$0xff]   ;;  %v10102_v1 = vld [vmem:[#allocation8 + $0x8] ss:$16 sps:$4 sm:$0xff]  }
 0x37f   : > { %v7633_v19 = vpop.f32.mrf.mxu1  ;;  %v7583_v32 = vpop.f32.mrf.mxu0  ;;  %7950 = vmatprep.subr.bf16.mxu0 %v10086_v50  ;;  %v10110_v3 = vld [vmem:[#allocation8 + $0x1ec] ss:$16 sps:$4 sm:$0xff]   ;;  %v10108_v39 = vld [vmem:[#allocation8 + $0x1e8] ss:$16 sps:$4 sm:$0xff]  }
 0x380   : > { %8000 = vmatpush1.bf16.msra.mxu1 %v10081_v41  ;;  %v10113_v60 = vld [vmem:[#allocation8 + $0x3ec] ss:$16 sps:$4 sm:$0xff]   ;;  %v10111_v19 = vld [vmem:[#allocation8 + $0x3e8] ss:$16 sps:$4 sm:$0xff]  }
 0x381   : > { %v7634_v4 = vpop.f32.mrf.mxu1  ;;  %8001 = vmatprep.subr.bf16.mxu1 %v10089_v8  ;;  %v10116_v63 = vld [vmem:[#allocation8 + $0x1cc] ss:$16 sps:$4 sm:$0xff]   ;;  %v10114_v32 = vld [vmem:[#allocation8 + $0x1c8] ss:$16 sps:$4 sm:$0xff]  }
 0x382   : > { %7951 = vmatpush1.bf16.msra.mxu0 %v10084_v46  ;;  %v10119_v41 = vld [vmem:[#allocation8 + $0x3cc] ss:$16 sps:$4 sm:$0xff]   ;;  %v10117_v50 = vld [vmem:[#allocation8 + $0x3c8] ss:$16 sps:$4 sm:$0xff]  }
 0x383   : > { %7952 = vmatprep.subr.bf16.mxu0 %v10092_v23  ;;  %v10122_v8 = vld [vmem:[#allocation8 + $0x1ac] ss:$16 sps:$4 sm:$0xff]   ;;  %v10120_v46 = vld [vmem:[#allocation8 + $0x1a8] ss:$16 sps:$4 sm:$0xff]  }
 0x384   : > { %8002 = vmatpush1.bf16.msra.mxu1 %v10087_v35  ;;  %v10125_v4 = vld [vmem:[#allocation8 + $0x3ac] ss:$16 sps:$4 sm:$0xff]   ;;  %v10123_v35 = vld [vmem:[#allocation8 + $0x3a8] ss:$16 sps:$4 sm:$0xff]  }
 0x385   : > { %8003 = vmatprep.subr.bf16.mxu1 %v10095_v25  ;;  %v10128_v23 = vld [vmem:[#allocation8 + $0x18c] ss:$16 sps:$4 sm:$0xff]  }
 0x386   : > { %7953 = vmatpush1.bf16.msra.mxu0 %v10090_v24  ;;  %v10131_v25 = vld [vmem:[#allocation8 + $0x38c] ss:$16 sps:$4 sm:$0xff]   ;;  %v10126_v24 = vld [vmem:[#allocation8 + $0x188] ss:$16 sps:$4 sm:$0xff]  }
 0x387   : > { %7954 = vmatprep.subr.bf16.mxu0 %v10098_v21  ;;  %v10134_v21 = vld [vmem:[#allocation8 + $0x16c] ss:$16 sps:$4 sm:$0xff]  }
 0x388   : > { %8004 = vmatpush1.bf16.msra.mxu1 %v10093_v18  ;;  %v10129_v18 = vld [vmem:[#allocation8 + $0x388] ss:$16 sps:$4 sm:$0xff]  }
 0x389   : > { %8005 = vmatprep.subr.bf16.mxu1 %v10101_v44  ;;  %v10137_v44 = vld [vmem:[#allocation8 + $0x36c] ss:$16 sps:$4 sm:$0xff]  }
 0x38a   : > { %7955 = vmatpush1.bf16.msra.mxu0 %v10096_v12  ;;  %v10132_v12 = vld [vmem:[#allocation8 + $0x168] ss:$16 sps:$4 sm:$0xff]  }
 0x38b   : > { %7956 = vmatprep.subr.bf16.mxu0 %v10104_v30  ;;  %v10140_v30 = vld [vmem:[#allocation8 + $0x14c] ss:$16 sps:$4 sm:$0xff]  }
 0x38c   : > { %8006 = vmatpush1.bf16.msra.mxu1 %v10099_v48  ;;  %v10135_v48 = vld [vmem:[#allocation8 + $0x368] ss:$16 sps:$4 sm:$0xff]  }
 0x38d   : > { %8007 = vmatprep.subr.bf16.mxu1 %v10107_v43  ;;  %v10143_v43 = vld [vmem:[#allocation8 + $0x34c] ss:$16 sps:$4 sm:$0xff]  }
 0x38e   : > { %7957 = vmatpush1.bf16.msra.mxu0 %v10102_v1  ;;  %v10138_v1 = vld [vmem:[#allocation8 + $0x148] ss:$16 sps:$4 sm:$0xff]  }
 0x38f   : > { %7958 = vmatprep.subr.bf16.mxu0 %v10110_v3  ;;  %v10146_v3 = vld [vmem:[#allocation8 + $0x12c] ss:$16 sps:$4 sm:$0xff]  }
 0x390   : > { %8008 = vmatpush1.bf16.msra.mxu1 %v10105_v17  ;;  %v10141_v17 = vld [vmem:[#allocation8 + $0x348] ss:$16 sps:$4 sm:$0xff]  }
 0x391   : > { %8009 = vmatprep.subr.bf16.mxu1 %v10113_v60  ;;  %v10149_v60 = vld [vmem:[#allocation8 + $0x32c] ss:$16 sps:$4 sm:$0xff]  }
 0x392   : > { %7959 = vmatpush2.bf16.msra.mxu0 %v10108_v39  ;;  %v10144_v39 = vld [vmem:[#allocation8 + $0x128] ss:$16 sps:$4 sm:$0xff]  }
 0x393   : > { %7960 = vmatprep.subr.bf16.mxu0 %v10116_v63  ;;  %v10152_v63 = vld [vmem:[#allocation8 + $0x10c] ss:$16 sps:$4 sm:$0xff]  }
 0x394   : > { %8010 = vmatpush2.bf16.msra.mxu1 %v10111_v19  ;;  %v10147_v19 = vld [vmem:[#allocation8 + $0x328] ss:$16 sps:$4 sm:$0xff]  }
 0x395   : > { %8011 = vmatprep.subr.bf16.mxu1 %v10119_v41  ;;  %v10155_v41 = vld [vmem:[#allocation8 + $0x30c] ss:$16 sps:$4 sm:$0xff]  }
 0x396   : > { %7961 = vmatpush2.bf16.msra.mxu0 %v10114_v32  ;;  %v10150_v32 = vld [vmem:[#allocation8 + $0x108] ss:$16 sps:$4 sm:$0xff]  }
 0x397   : > { %7962 = vmatprep.subr.bf16.mxu0 %v10122_v8  ;;  %v10158_v8 = vld [vmem:[#allocation8 + $0x4ec] ss:$16 sps:$4 sm:$0xff]  }
 0x398   : > { %8012 = vmatpush2.bf16.msra.mxu1 %v10117_v50  ;;  %v10153_v50 = vld [vmem:[#allocation8 + $0x308] ss:$16 sps:$4 sm:$0xff]  }
 0x399   : > { %8013 = vmatprep.subr.bf16.mxu1 %v10125_v4  ;;  %v10161_v4 = vld [vmem:[#allocation8 + $0x6ec] ss:$16 sps:$4 sm:$0xff]  }
 0x39a   : > { %7963 = vmatpush2.bf16.msra.mxu0 %v10120_v46 }
 0x39b   : > { %7964 = vmatprep.subr.bf16.mxu0 %v10128_v23 }
 0x39c   : > { %8014 = vmatpush2.bf16.msra.mxu1 %v10123_v35 }
 0x39d   : > { %8015 = vmatprep.subr.bf16.mxu1 %v10131_v25  ;;  %v10156_v25 = vld [vmem:[#allocation8 + $0x4e8] ss:$16 sps:$4 sm:$0xff]  }
 0x39e   : > { %7965 = vmatpush2.bf16.msra.mxu0 %v10126_v24  ;;  %v10159_v24 = vld [vmem:[#allocation8 + $0x6e8] ss:$16 sps:$4 sm:$0xff]  }
 0x39f   : > { %7966 = vmatprep.subr.bf16.mxu0 %v10134_v21  ;;  %v10164_v21 = vld [vmem:[#allocation8 + $0x4cc] ss:$16 sps:$4 sm:$0xff]  }
 0x3a0   : > { %8016 = vmatpush2.bf16.msra.mxu1 %v10129_v18 }
 0x3a1   : > { %8017 = vmatprep.subr.bf16.mxu1 %v10137_v44  ;;  %v10167_v44 = vld [vmem:[#allocation8 + $0x6cc] ss:$16 sps:$4 sm:$0xff]  }
 0x3a2   : > { %7967 = vmatpush2.bf16.msra.mxu0 %v10132_v12 }
 0x3a3   : > { %7968 = vmatprep.subr.bf16.mxu0 %v10140_v30 }
 0x3a4   : > { %8018 = vmatpush2.bf16.msra.mxu1 %v10135_v48 }
 0x3a5   : > { %8019 = vmatprep.subr.bf16.mxu1 %v10143_v43 }
 0x3a6   : > { %7969 = vmatpush2.bf16.msra.mxu0 %v10138_v1 }
 0x3a7   : > { %7970 = vmatprep.subr.bf16.mxu0 %v10146_v3  ;;  %v10162_v3 = vld [vmem:[#allocation8 + $0x4c8] ss:$16 sps:$4 sm:$0xff]  }
 0x3a8   : > { %8020 = vmatpush2.bf16.msra.mxu1 %v10141_v17 }
 0x3a9   : > { %8021 = vmatprep.subr.bf16.mxu1 %v10149_v60  ;;  %v10165_v60 = vld [vmem:[#allocation8 + $0x6c8] ss:$16 sps:$4 sm:$0xff]  }
 0x3aa   : > { %7971 = vmatpush2.bf16.msra.mxu0 %v10144_v39 }
 0x3ab   : > { %7972 = vmatprep.subr.bf16.mxu0 %v10152_v63 }
 0x3ac   : > { %8022 = vmatpush2.bf16.msra.mxu1 %v10147_v19 }
 0x3ad   : > { %8023 = vmatprep.subr.bf16.mxu1 %v10155_v41 }
 0x3ae   : > { %7973 = vmatpush2.bf16.msra.mxu0 %v10150_v32  ;;  %v10168_v32 = vld [vmem:[#allocation8 + $0x4a8] ss:$16 sps:$4 sm:$0xff]  }
 0x3af   : > { %8044 = vmatprep.subr.bf16.mxu0 %v10158_v8 }
 0x3b0   : > { %8024 = vmatpush2.bf16.msra.mxu1 %v10153_v50  ;;  %v10171_v50 = vld [vmem:[#allocation8 + $0x6a8] ss:$16 sps:$4 sm:$0xff]  }
 0x3b1   : > { %v7670_v46 = vpop.f32.mrf.mxu0  ;;  %8095 = vmatprep.subr.bf16.mxu1 %v10161_v4  ;;  %7975 = vmatmul.mubr.bf16.vlgmr.msra.gmra.mxu0 %v10951_v27  ;;  %v10176_v4 = vld [vmem:[#allocation8 + $0x48c] ss:$16 sps:$4 sm:$0xff]  }
 0x3b2   : > { %v7671_v35 = vadd.f32 %v7670_v46, %v11263_v58  ;;  %7984 = vmatprep.mubr.bf16.mxu0 %v11107_v49  ;;  %8045 = vmatpush1.bf16.msra.mxu0 %v10156_v25  ;;  %v10179_v46 = vld [vmem:[#allocation8 + $0x68c] ss:$16 sps:$4 sm:$0xff]  }
 0x3b3   : > { %v7721_v23 = vpop.f32.mrf.mxu1  ;;  %v7672_v18 = vpop.f32.mrf.mxu0  ;;  %8026 = vmatmul.mubr.bf16.vlgmr.msra.gmra.mxu1 %v10985_v59  ;;  %8046 = vmatprep.subr.bf16.mxu0 %v10164_v21  ;;  %v10170_v59 = vld [vmem:[#allocation8 + $0x4ac] ss:$16 sps:$4 sm:$0xff]   ;;  %v10177_v21 = vld [vmem:[#allocation8 + $0x688] ss:$16 sps:$4 sm:$0xff]  }
 0x3b4   : > { %v11289_v12 = vadd.f32 %v7721_v23, %v7671_v35  ;;  %v7673_v48 = vadd.f32 %v7672_v18, %v11268_v42  ;;  %8035 = vmatprep.mubr.bf16.mxu1 %v11113_v55  ;;  %8096 = vmatpush1.bf16.msra.mxu1 %v10159_v24  ;;  %v10173_v42 = vld [vmem:[#allocation8 + $0x6ac] ss:$16 sps:$4 sm:$0xff]   ;;  %v10174_v18 = vld [vmem:[#allocation8 + $0x488] ss:$16 sps:$4 sm:$0xff]  }
 0x3b5   : > { %v7723_v30 = vpop.f32.mrf.mxu1  ;;  %v7674_v58 = vpop.f32.mrf.mxu0  ;;  %8097 = vmatprep.subr.bf16.mxu1 %v10167_v44  ;;  %v10182_v44 = vld [vmem:[#allocation8 + $0x46c] ss:$16 sps:$4 sm:$0xff]  }
 0x3b6   : > { %v11296_v43 = vadd.f32 %v7723_v30, %v7673_v48  ;;  %v7675_v1 = vadd.f32 %v7674_v58, %v11272_v33  ;;  %8047 = vmatpush1.bf16.msra.mxu0 %v10162_v3  ;;  %v10191_v30 = vld [vmem:[#allocation8 + $0x64c] ss:$16 sps:$4 sm:$0xff]   ;;  %v10186_v58 = vld [vmem:[#allocation8 + $0x448] ss:$16 sps:$4 sm:$0xff]  }
 0x3b7   : > { %v7725_v17 = vpop.f32.mrf.mxu1  ;;  %v7676_v27 = vpop.f32.mrf.mxu0  ;;  %8048 = vmatprep.subr.bf16.mxu0 %v10170_v59  ;;  %v10197_v3 = vld [vmem:[#allocation8 + $0x62c] ss:$16 sps:$4 sm:$0xff]  }
 0x3b8   : > { %v11299_v39 = vadd.f32 %v7725_v17, %v7675_v1  ;;  %v7677_v49 = vadd.f32 %v7676_v27, %v11274_v26  ;;  %8098 = vmatpush1.bf16.msra.mxu1 %v10165_v60  ;;  %v10189_v1 = vld [vmem:[#allocation8 + $0x648] ss:$16 sps:$4 sm:$0xff]   ;;  %v10194_v17 = vld [vmem:[#allocation8 + $0x42c] ss:$16 sps:$4 sm:$0xff]  }
 0x3b9   : > { %v7727_v55 = vpop.f32.mrf.mxu1  ;;  %v7680_v19 = vpop.f32.mrf.mxu0  ;;  %8099 = vmatprep.subr.bf16.mxu1 %v10173_v42  ;;  %7985 = vmatmul.mubr.bf16.gmra.mxu0 %v11124_v54  ;;  %v10192_v60 = vld [vmem:[#allocation8 + $0x428] ss:$16 sps:$4 sm:$0xff]   ;;  %v10200_v59 = vld [vmem:[#allocation8 + $0x40c] ss:$16 sps:$4 sm:$0xff]  }
 0x3ba   : > { %v11302_v63 = vadd.f32 %v7727_v55, %v7677_v49  ;;  %v7681_v33 = vadd.f32 %v7680_v19, %v11280_v20  ;;  %8076 = vmatprep.mubr.bf16.mxu0 %v11026_v31  ;;  %8049 = vmatpush1.bf16.msra.mxu0 %v10168_v32  ;;  %v10183_v31 = vld [vmem:[#allocation8 + $0x668] ss:$16 sps:$4 sm:$0xff]   ;;  %v10203_v42 = vld [vmem:[#allocation8 + $0x60c] ss:$16 sps:$4 sm:$0xff]  }
 0x3bb   : > { %v7731_v41 = vpop.f32.mrf.mxu1  ;;  %v7682_v8 = vpop.f32.mrf.mxu0  ;;  %8036 = vmatmul.mubr.bf16.gmra.mxu1 %v11128_v34  ;;  %8050 = vmatprep.subr.bf16.mxu0 %v10176_v4  ;;  %v10185_v34 = vld [vmem:[#allocation8 + $0x66c] ss:$16 sps:$4 sm:$0xff]   ;;  %v10195_v27 = vld [vmem:[#allocation8 + $0x628] ss:$16 sps:$4 sm:$0xff]  }
 0x3bc   : > { %v11305_v35 = vadd.f32 %v7731_v41, %v7681_v33  ;;  %v7683_v26 = vadd.f32 %v7682_v8, %v11285_v36  ;;  %8127 = vmatprep.mubr.bf16.mxu1 %v11060_v2  ;;  %8100 = vmatpush1.bf16.msra.mxu1 %v10171_v50  ;;  %v10180_v36 = vld [vmem:[#allocation8 + $0x468] ss:$16 sps:$4 sm:$0xff]   ;;  %v10188_v2 = vld [vmem:[#allocation8 + $0x44c] ss:$16 sps:$4 sm:$0xff]  }
 0x3bd   : > { %v7733_v23 = vpop.f32.mrf.mxu1  ;;  %v7684_v20 = vpop.f32.mrf.mxu0  ;;  %8101 = vmatprep.subr.bf16.mxu1 %v10179_v46  ;;  %v10198_v49 = vld [vmem:[#allocation8 + $0x408] ss:$16 sps:$4 sm:$0xff]   ;;  %v10206_v19 = vld [vmem:[#allocation8 + $0x5ec] ss:$16 sps:$4 sm:$0xff]  }
 0x3be   : > { %v11312_v25 = vadd.f32 %v7733_v23, %v7683_v26  ;;  %8051 = vmatpush1.bf16.msra.mxu0 %v10174_v18  ;;  %v10201_v55 = vld [vmem:[#allocation8 + $0x608] ss:$16 sps:$4 sm:$0xff]   ;;  %v10209_v33 = vld [vmem:[#allocation8 + $0x7ec] ss:$16 sps:$4 sm:$0xff]  }
 0x3bf   : > { %v7735_v24 = vpop.f32.mrf.mxu1  ;;  %v7685_v54 = vpop.f32.mrf.mxu0  ;;  %8052 = vmatprep.subr.bf16.mxu0 %v10182_v44  ;;  %v10204_v41 = vld [vmem:[#allocation8 + $0x5e8] ss:$16 sps:$4 sm:$0xff]   ;;  %v10212_v50 = vld [vmem:[#allocation8 + $0x5cc] ss:$16 sps:$4 sm:$0xff]  }
 0x3c0   : > { %8102 = vmatpush1.bf16.msra.mxu1 %v10177_v21  ;;  %v10207_v32 = vld [vmem:[#allocation8 + $0x7e8] ss:$16 sps:$4 sm:$0xff]   ;;  %v10215_v8 = vld [vmem:[#allocation8 + $0x7cc] ss:$16 sps:$4 sm:$0xff]  }
 0x3c1   : > { %v7736_v48 = vpop.f32.mrf.mxu1  ;;  %8103 = vmatprep.subr.bf16.mxu1 %v10185_v34  ;;  %v10210_v4 = vld [vmem:[#allocation8 + $0x5c8] ss:$16 sps:$4 sm:$0xff]   ;;  %v10218_v26 = vld [vmem:[#allocation8 + $0x5ac] ss:$16 sps:$4 sm:$0xff]  }
 0x3c2   : > { %8053 = vmatpush1.bf16.msra.mxu0 %v10180_v36  ;;  %v10213_v46 = vld [vmem:[#allocation8 + $0x7c8] ss:$16 sps:$4 sm:$0xff]   ;;  %v10221_v23 = vld [vmem:[#allocation8 + $0x7ac] ss:$16 sps:$4 sm:$0xff]  }
 0x3c3   : > { %8054 = vmatprep.subr.bf16.mxu0 %v10188_v2  ;;  %v10216_v20 = vld [vmem:[#allocation8 + $0x5a8] ss:$16 sps:$4 sm:$0xff]   ;;  %v10224_v18 = vld [vmem:[#allocation8 + $0x58c] ss:$16 sps:$4 sm:$0xff]  }
 0x3c4   : > { %8104 = vmatpush1.bf16.msra.mxu1 %v10183_v31  ;;  %v10219_v24 = vld [vmem:[#allocation8 + $0x7a8] ss:$16 sps:$4 sm:$0xff]   ;;  %v10227_v21 = vld [vmem:[#allocation8 + $0x78c] ss:$16 sps:$4 sm:$0xff]  }
 0x3c5   : > { %8105 = vmatprep.subr.bf16.mxu1 %v10191_v30  ;;  %v10222_v54 = vld [vmem:[#allocation8 + $0x588] ss:$16 sps:$4 sm:$0xff]   ;;  %v10230_v34 = vld [vmem:[#allocation8 + $0x56c] ss:$16 sps:$4 sm:$0xff]  }
 0x3c6   : > { %8055 = vmatpush1.bf16.msra.mxu0 %v10186_v58  ;;  %v10225_v44 = vld [vmem:[#allocation8 + $0x788] ss:$16 sps:$4 sm:$0xff]   ;;  %v10233_v48 = vld [vmem:[#allocation8 + $0x76c] ss:$16 sps:$4 sm:$0xff]  }
 0x3c7   : > { %8056 = vmatprep.subr.bf16.mxu0 %v10194_v17  ;;  %v10228_v36 = vld [vmem:[#allocation8 + $0x568] ss:$16 sps:$4 sm:$0xff]   ;;  %v10236_v2 = vld [vmem:[#allocation8 + $0x54c] ss:$16 sps:$4 sm:$0xff]  }
 0x3c8   : > { %8106 = vmatpush1.bf16.msra.mxu1 %v10189_v1  ;;  %v10231_v31 = vld [vmem:[#allocation8 + $0x768] ss:$16 sps:$4 sm:$0xff]   ;;  %v10239_v30 = vld [vmem:[#allocation8 + $0x74c] ss:$16 sps:$4 sm:$0xff]  }
 0x3c9   : > { %8107 = vmatprep.subr.bf16.mxu1 %v10197_v3  ;;  %v10234_v58 = vld [vmem:[#allocation8 + $0x548] ss:$16 sps:$4 sm:$0xff]   ;;  %v10242_v17 = vld [vmem:[#allocation8 + $0x52c] ss:$16 sps:$4 sm:$0xff]  }
 0x3ca   : > { %8057 = vmatpush1.bf16.msra.mxu0 %v10192_v60  ;;  %v10237_v1 = vld [vmem:[#allocation8 + $0x748] ss:$16 sps:$4 sm:$0xff]   ;;  %v10245_v3 = vld [vmem:[#allocation8 + $0x72c] ss:$16 sps:$4 sm:$0xff]  }
 0x3cb   : > { %8058 = vmatprep.subr.bf16.mxu0 %v10200_v59  ;;  %v10240_v60 = vld [vmem:[#allocation8 + $0x528] ss:$16 sps:$4 sm:$0xff]   ;;  %v10248_v59 = vld [vmem:[#allocation8 + $0x50c] ss:$16 sps:$4 sm:$0xff]  }
 0x3cc   : > { %8108 = vmatpush1.bf16.msra.mxu1 %v10195_v27  ;;  %v10243_v27 = vld [vmem:[#allocation8 + $0x728] ss:$16 sps:$4 sm:$0xff]  }
 0x3cd   : > { %8109 = vmatprep.subr.bf16.mxu1 %v10203_v42  ;;  %v10251_v42 = vld [vmem:[#allocation8 + $0x70c] ss:$16 sps:$4 sm:$0xff]  }
 0x3ce   : > { %8059 = vmatpush1.bf16.msra.mxu0 %v10198_v49  ;;  %v10246_v49 = vld [vmem:[#allocation8 + $0x508] ss:$16 sps:$4 sm:$0xff]  }
 0x3cf   : > { %8060 = vmatprep.subr.bf16.mxu0 %v10206_v19  ;;  %v10254_v19 = vld [vmem:[#allocation8 + $0x8ec] ss:$16 sps:$4 sm:$0xff]  }
 0x3d0   : > { %8110 = vmatpush1.bf16.msra.mxu1 %v10201_v55  ;;  %v10249_v55 = vld [vmem:[#allocation8 + $0x708] ss:$16 sps:$4 sm:$0xff]  }
 0x3d1   : > { %8111 = vmatprep.subr.bf16.mxu1 %v10209_v33  ;;  %v10257_v33 = vld [vmem:[#allocation8 + $0xaec] ss:$16 sps:$4 sm:$0xff]  }
 0x3d2   : > { %8061 = vmatpush2.bf16.msra.mxu0 %v10204_v41 }
 0x3d3   : > { %8062 = vmatprep.subr.bf16.mxu0 %v10212_v50  ;;  %v10252_v50 = vld [vmem:[#allocation8 + $0x8e8] ss:$16 sps:$4 sm:$0xff]  }
 0x3d4   : > { %8112 = vmatpush2.bf16.msra.mxu1 %v10207_v32 }
 0x3d5   : > { %8113 = vmatprep.subr.bf16.mxu1 %v10215_v8  ;;  %v10255_v8 = vld [vmem:[#allocation8 + $0xae8] ss:$16 sps:$4 sm:$0xff]  }
 0x3d6   : > { %8063 = vmatpush2.bf16.msra.mxu0 %v10210_v4 }
 0x3d7   : > { %8064 = vmatprep.subr.bf16.mxu0 %v10218_v26  ;;  %v10263_v26 = vld [vmem:[#allocation8 + $0xacc] ss:$16 sps:$4 sm:$0xff]  }
 0x3d8   : > { %8114 = vmatpush2.bf16.msra.mxu1 %v10213_v46  ;;  %v10260_v46 = vld [vmem:[#allocation8 + $0x8cc] ss:$16 sps:$4 sm:$0xff]  }
 0x3d9   : > { %8115 = vmatprep.subr.bf16.mxu1 %v10221_v23 }
 0x3da   : > { %8065 = vmatpush2.bf16.msra.mxu0 %v10216_v20 }
 0x3db   : > { %8066 = vmatprep.subr.bf16.mxu0 %v10224_v18  ;;  %v10258_v18 = vld [vmem:[#allocation8 + $0x8c8] ss:$16 sps:$4 sm:$0xff]  }
 0x3dc   : > { %8116 = vmatpush2.bf16.msra.mxu1 %v10219_v24 }
 0x3dd   : > { %8117 = vmatprep.subr.bf16.mxu1 %v10227_v21  ;;  %v10261_v21 = vld [vmem:[#allocation8 + $0xac8] ss:$16 sps:$4 sm:$0xff]  }
 0x3de   : > { %8067 = vmatpush2.bf16.msra.mxu0 %v10222_v54 }
 0x3df   : > { %8068 = vmatprep.subr.bf16.mxu0 %v10230_v34 }
 0x3e0   : > { %8118 = vmatpush2.bf16.msra.mxu1 %v10225_v44 }
 0x3e1   : > { %8119 = vmatprep.subr.bf16.mxu1 %v10233_v48  ;;  %v10267_v48 = vld [vmem:[#allocation8 + $0xaa8] ss:$16 sps:$4 sm:$0xff]  }
 0x3e2   : > { %8069 = vmatpush2.bf16.msra.mxu0 %v10228_v36 }
 0x3e3   : > { %8070 = vmatprep.subr.bf16.mxu0 %v10236_v2  ;;  %v10275_v2 = vld [vmem:[#allocation8 + $0xa8c] ss:$16 sps:$4 sm:$0xff]  }
 0x3e4   : > { %8120 = vmatpush2.bf16.msra.mxu1 %v10231_v31  ;;  %v10272_v31 = vld [vmem:[#allocation8 + $0x88c] ss:$16 sps:$4 sm:$0xff]  }
 0x3e5   : > { %8121 = vmatprep.subr.bf16.mxu1 %v10239_v30 }
 0x3e6   : > { %8071 = vmatpush2.bf16.msra.mxu0 %v10234_v58 }
 0x3e7   : > { %8072 = vmatprep.subr.bf16.mxu0 %v10242_v17  ;;  %v10270_v17 = vld [vmem:[#allocation8 + $0x888] ss:$16 sps:$4 sm:$0xff]  }
 0x3e8   : > { %8122 = vmatpush2.bf16.msra.mxu1 %v10237_v1 }
 0x3e9   : > { %8123 = vmatprep.subr.bf16.mxu1 %v10245_v3  ;;  %v10273_v3 = vld [vmem:[#allocation8 + $0xa88] ss:$16 sps:$4 sm:$0xff]  }
 0x3ea   : > { %8073 = vmatpush2.bf16.msra.mxu0 %v10240_v60 }
 0x3eb   : > { %8074 = vmatprep.subr.bf16.mxu0 %v10248_v59  ;;  %v10281_v59 = vld [vmem:[#allocation8 + $0xa6c] ss:$16 sps:$4 sm:$0xff]  }
 0x3ec   : > { %8124 = vmatpush2.bf16.msra.mxu1 %v10243_v27  ;;  %v10278_v27 = vld [vmem:[#allocation8 + $0x86c] ss:$16 sps:$4 sm:$0xff]  }
 0x3ed   : > { %8125 = vmatprep.subr.bf16.mxu1 %v10251_v42  ;;  %v10279_v42 = vld [vmem:[#allocation8 + $0xa68] ss:$16 sps:$4 sm:$0xff]  }
 0x3ee   : > { %8075 = vmatpush2.bf16.msra.mxu0 %v10246_v49  ;;  %v10282_v49 = vld [vmem:[#allocation8 + $0x848] ss:$16 sps:$4 sm:$0xff]  }
 0x3ef   : > { %8146 = vmatprep.subr.bf16.mxu0 %v10254_v19  ;;  %v10290_v19 = vld [vmem:[#allocation8 + $0x82c] ss:$16 sps:$4 sm:$0xff]  }
 0x3f0   : > { %8126 = vmatpush2.bf16.msra.mxu1 %v10249_v55  ;;  %v10285_v55 = vld [vmem:[#allocation8 + $0xa48] ss:$16 sps:$4 sm:$0xff]  }
 0x3f1   : > { %v11314_v41 = vpop.f32.mrf.mxu0  ;;  %8197 = vmatprep.subr.bf16.mxu1 %v10257_v33  ;;  %8077 = vmatmul.mubr.bf16.vlgmr.msra.gmra.mxu0 %v11019_v28  ;;  %v10266_v28 = vld [vmem:[#allocation8 + $0x8ac] ss:$16 sps:$4 sm:$0xff]  }
 0x3f2   : > { %8086 = vmatprep.mubr.bf16.mxu0 %v11155_v51  ;;  %8147 = vmatpush1.bf16.msra.mxu0 %v10252_v50  ;;  %v10293_v33 = vld [vmem:[#allocation8 + $0xa2c] ss:$16 sps:$4 sm:$0xff]   ;;  %v10288_v50 = vld [vmem:[#allocation8 + $0x828] ss:$16 sps:$4 sm:$0xff]  }
 0x3f3   : > { %v11316_v32 = vpop.f32.mrf.mxu1  ;;  %v11318_v4 = vpop.f32.mrf.mxu0  ;;  %8128 = vmatmul.mubr.bf16.vlgmr.msra.gmra.mxu1 %v11053_v56  ;;  %8148 = vmatprep.subr.bf16.mxu0 %v10260_v46  ;;  %v10269_v56 = vld [vmem:[#allocation8 + $0xaac] ss:$16 sps:$4 sm:$0xff]  }
 0x3f4   : > { %8137 = vmatprep.mubr.bf16.mxu1 %v11157_v0  ;;  %8198 = vmatpush1.bf16.msra.mxu1 %v10255_v8  ;;  %v10264_v0 = vld [vmem:[#allocation8 + $0x8a8] ss:$16 sps:$4 sm:$0xff]   ;;  %v10296_v46 = vld [vmem:[#allocation8 + $0x80c] ss:$16 sps:$4 sm:$0xff]  }
 0x3f5   : > { %v11322_v23 = vpop.f32.mrf.mxu1  ;;  %v11326_v20 = vpop.f32.mrf.mxu0  ;;  %8199 = vmatprep.subr.bf16.mxu1 %v10263_v26  ;;  %v10291_v8 = vld [vmem:[#allocation8 + $0xa28] ss:$16 sps:$4 sm:$0xff]   ;;  %v10299_v26 = vld [vmem:[#allocation8 + $0xa0c] ss:$16 sps:$4 sm:$0xff]  }
 0x3f6   : > { %8149 = vmatpush1.bf16.msra.mxu0 %v10258_v18  ;;  %v10294_v18 = vld [vmem:[#allocation8 + $0x808] ss:$16 sps:$4 sm:$0xff]  }
 0x3f7   : > { %v11328_v24 = vpop.f32.mrf.mxu1  ;;  %v11330_v54 = vpop.f32.mrf.mxu0  ;;  %8150 = vmatprep.subr.bf16.mxu0 %v10266_v28  ;;  %v10302_v28 = vld [vmem:[#allocation8 + $0x9ec] ss:$16 sps:$4 sm:$0xff]  }
 0x3f8   : > { %8200 = vmatpush1.bf16.msra.mxu1 %v10261_v21  ;;  %v10297_v21 = vld [vmem:[#allocation8 + $0xa08] ss:$16 sps:$4 sm:$0xff]  }
 0x3f9   : > { %v11332_v44 = vpop.f32.mrf.mxu1  ;;  %v11334_v34 = vpop.f32.mrf.mxu0  ;;  %8201 = vmatprep.subr.bf16.mxu1 %v10269_v56  ;;  %8087 = vmatmul.mubr.bf16.gmra.mxu0 %v11171_v47  ;;  %v10305_v56 = vld [vmem:[#allocation8 + $0xbec] ss:$16 sps:$4 sm:$0xff]  }
 0x3fa   : > { %8178 = vmatprep.mubr.bf16.mxu0 %v11099_v16  ;;  %8151 = vmatpush1.bf16.msra.mxu0 %v10264_v0  ;;  %v10284_v16 = vld [vmem:[#allocation8 + $0x84c] ss:$16 sps:$4 sm:$0xff]   ;;  %v10300_v0 = vld [vmem:[#allocation8 + $0x9e8] ss:$16 sps:$4 sm:$0xff]  }
 0x3fb   : > { %v11336_v51 = vpop.f32.mrf.mxu1  ;;  %v11338_v36 = vpop.f32.mrf.mxu0  ;;  %8138 = vmatmul.mubr.bf16.gmra.mxu1 %v11176_v11  ;;  %8152 = vmatprep.subr.bf16.mxu0 %v10272_v31  ;;  %v10276_v11 = vld [vmem:[#allocation8 + $0x868] ss:$16 sps:$4 sm:$0xff]   ;;  %v10308_v31 = vld [vmem:[#allocation8 + $0x9cc] ss:$16 sps:$4 sm:$0xff]  }
 0x3fc   : > { %8229 = vmatprep.mubr.bf16.mxu1 %v11178_v52  ;;  %8202 = vmatpush1.bf16.msra.mxu1 %v10267_v48  ;;  %v10287_v52 = vld [vmem:[#allocation8 + $0xa4c] ss:$16 sps:$4 sm:$0xff]   ;;  %v10303_v48 = vld [vmem:[#allocation8 + $0xbe8] ss:$16 sps:$4 sm:$0xff]  }
 0x3fd   : > { %v11342_v30 = vpop.f32.mrf.mxu1  ;;  %v7786_v58 = vpop.f32.mrf.mxu0  ;;  %8203 = vmatprep.subr.bf16.mxu1 %v10275_v2  ;;  %v10311_v2 = vld [vmem:[#allocation8 + $0xbcc] ss:$16 sps:$4 sm:$0xff]  }
 0x3fe   : > { %8153 = vmatpush1.bf16.msra.mxu0 %v10270_v17  ;;  %v10306_v58 = vld [vmem:[#allocation8 + $0x9c8] ss:$16 sps:$4 sm:$0xff]   ;;  %v10314_v17 = vld [vmem:[#allocation8 + $0x9ac] ss:$16 sps:$4 sm:$0xff]  }
 0x3ff   : > { %v7837_v1 = vpop.f32.mrf.mxu1  ;;  %v7787_v60 = vpop.f32.mrf.mxu0  ;;  %8154 = vmatprep.subr.bf16.mxu0 %v10278_v27  ;;  %v10315_v27 = vld [vmem:[#allocation8 + $0xba8] ss:$16 sps:$4 sm:$0xff]  }
 0x400   : > { %8204 = vmatpush1.bf16.msra.mxu1 %v10273_v3  ;;  %v10309_v1 = vld [vmem:[#allocation8 + $0xbc8] ss:$16 sps:$4 sm:$0xff]   ;;  %v10317_v3 = vld [vmem:[#allocation8 + $0xbac] ss:$16 sps:$4 sm:$0xff]  }
 0x401   : > { %v7838_v47 = vpop.f32.mrf.mxu1  ;;  %8205 = vmatprep.subr.bf16.mxu1 %v10281_v59  ;;  %v10312_v60 = vld [vmem:[#allocation8 + $0x9a8] ss:$16 sps:$4 sm:$0xff]   ;;  %v10320_v59 = vld [vmem:[#allocation8 + $0x98c] ss:$16 sps:$4 sm:$0xff]  }
 0x402   : > { %8155 = vmatpush1.bf16.msra.mxu0 %v10276_v11  ;;  %v10323_v47 = vld [vmem:[#allocation8 + $0xb8c] ss:$16 sps:$4 sm:$0xff]   ;;  %v10318_v11 = vld [vmem:[#allocation8 + $0x988] ss:$16 sps:$4 sm:$0xff]  }
 0x403   : > { %8156 = vmatprep.subr.bf16.mxu0 %v10284_v16  ;;  %v10326_v16 = vld [vmem:[#allocation8 + $0x96c] ss:$16 sps:$4 sm:$0xff]  }
 0x404   : > { %8206 = vmatpush1.bf16.msra.mxu1 %v10279_v42  ;;  %v10321_v42 = vld [vmem:[#allocation8 + $0xb88] ss:$16 sps:$4 sm:$0xff]  }
 0x405   : > { %8207 = vmatprep.subr.bf16.mxu1 %v10287_v52  ;;  %v10329_v52 = vld [vmem:[#allocation8 + $0xb6c] ss:$16 sps:$4 sm:$0xff]  }
 0x406   : > { %8157 = vmatpush1.bf16.msra.mxu0 %v10282_v49  ;;  %v10324_v49 = vld [vmem:[#allocation8 + $0x968] ss:$16 sps:$4 sm:$0xff]  }
 0x407   : > { %8158 = vmatprep.subr.bf16.mxu0 %v10290_v19  ;;  %v10332_v19 = vld [vmem:[#allocation8 + $0x94c] ss:$16 sps:$4 sm:$0xff]  }
 0x408   : > { %8208 = vmatpush1.bf16.msra.mxu1 %v10285_v55  ;;  %v10327_v55 = vld [vmem:[#allocation8 + $0xb68] ss:$16 sps:$4 sm:$0xff]  }
 0x409   : > { %8209 = vmatprep.subr.bf16.mxu1 %v10293_v33  ;;  %v10335_v33 = vld [vmem:[#allocation8 + $0xb4c] ss:$16 sps:$4 sm:$0xff]  }
 0x40a   : > { %8159 = vmatpush1.bf16.msra.mxu0 %v10288_v50  ;;  %v10330_v50 = vld [vmem:[#allocation8 + $0x948] ss:$16 sps:$4 sm:$0xff]  }
 0x40b   : > { %8160 = vmatprep.subr.bf16.mxu0 %v10296_v46  ;;  %v10338_v46 = vld [vmem:[#allocation8 + $0x92c] ss:$16 sps:$4 sm:$0xff]  }
 0x40c   : > { %8210 = vmatpush1.bf16.msra.mxu1 %v10291_v8  ;;  %v10333_v8 = vld [vmem:[#allocation8 + $0xb48] ss:$16 sps:$4 sm:$0xff]  }
 0x40d   : > { %8211 = vmatprep.subr.bf16.mxu1 %v10299_v26  ;;  %v10341_v26 = vld [vmem:[#allocation8 + $0xb2c] ss:$16 sps:$4 sm:$0xff]  }
 0x40e   : > { %8161 = vmatpush1.bf16.msra.mxu0 %v10294_v18  ;;  %v10336_v18 = vld [vmem:[#allocation8 + $0x928] ss:$16 sps:$4 sm:$0xff]  }
 0x40f   : > { %8162 = vmatprep.subr.bf16.mxu0 %v10302_v28  ;;  %v10344_v28 = vld [vmem:[#allocation8 + $0x90c] ss:$16 sps:$4 sm:$0xff]  }
 0x410   : > { %8212 = vmatpush1.bf16.msra.mxu1 %v10297_v21  ;;  %v10339_v21 = vld [vmem:[#allocation8 + $0xb28] ss:$16 sps:$4 sm:$0xff]  }
 0x411   : > { %8213 = vmatprep.subr.bf16.mxu1 %v10305_v56  ;;  %v10347_v56 = vld [vmem:[#allocation8 + $0xb0c] ss:$16 sps:$4 sm:$0xff]  }
 0x412   : > { %8163 = vmatpush2.bf16.msra.mxu0 %v10300_v0  ;;  %v7773_v0 = vadd.f32 %v11314_v41, %v11289_v12  ;;  %v7779_v12 = vadd.f32 %v11330_v54, %v11302_v63  ;;  %v10359_v54 = vld [vmem:[#allocation8 + $0xecc] ss:$16 sps:$4 sm:$0xff]  }
 0x413   : > { %8164 = vmatprep.subr.bf16.mxu0 %v10308_v31  ;;  %v10345_v31 = vld [vmem:[#allocation8 + $0xb08] ss:$16 sps:$4 sm:$0xff]  }
 0x414   : > { %8214 = vmatpush2.bf16.msra.mxu1 %v10303_v48  ;;  %v10342_v48 = vld [vmem:[#allocation8 + $0x908] ss:$16 sps:$4 sm:$0xff]  }
 0x415   : > { %8215 = vmatprep.subr.bf16.mxu1 %v10311_v2  ;;  %v7775_v2 = vadd.f32 %v11318_v4, %v11296_v43 }
 0x416   : > { %8165 = vmatpush2.bf16.msra.mxu0 %v10306_v58  ;;  %v10350_v58 = vld [vmem:[#allocation8 + $0xcec] ss:$16 sps:$4 sm:$0xff]  }
 0x417   : > { %8166 = vmatprep.subr.bf16.mxu0 %v10314_v17  ;;  %v11350_v17 = vld [vmem:[#allocation10] sm:$0xf]  ;;  %v7826_v4 = vadd.f32 %v11322_v23, %v7775_v2 }
 0x418   : > { %8216 = vmatpush2.bf16.msra.mxu1 %v10309_v1  ;;  %v10353_v1 = vld [vmem:[#allocation8 + $0xeec] ss:$16 sps:$4 sm:$0xff]   ;;  %v11359_v43 = vrot.slane %v11350_v17, %v10927_v14  ;;  %v7783_v14 = vadd.f32 %v11334_v34, %v11305_v35 }
 0x419   : > { %8217 = vmatprep.subr.bf16.mxu1 %v10317_v3  ;;  %v7777_v3 = vadd.f32 %v11326_v20, %v11299_v39  ;;  %v11364_v39 = vrot.slane %v11350_v17, %v10930_v22  ;;  %v10356_v20 = vld [vmem:[#allocation8 + $0xccc] ss:$16 sps:$4 sm:$0xff]   ;;  %v7785_v22 = vadd.f32 %v11338_v36, %v11312_v25 }
 0x41a   : > { %8167 = vmatpush2.bf16.msra.mxu0 %v10312_v60  ;;  %v7824_v60 = vadd.f32 %v11316_v32, %v7773_v0  ;;  %v10365_v25 = vld [vmem:[#allocation8 + $0xeac] ss:$16 sps:$4 sm:$0xff]  }
 0x41b   : > { %8168 = vmatprep.subr.bf16.mxu0 %v10320_v59  ;;  %v7828_v63 = vadd.f32 %v11328_v24, %v7777_v3 }
 0x41c   : > { %8218 = vmatpush2.bf16.msra.mxu1 %v10315_v27 }
 0x41d   : > { %8219 = vmatprep.subr.bf16.mxu1 %v10323_v47  ;;  %v10348_v47 = vld [vmem:[#allocation8 + $0xce8] ss:$16 sps:$4 sm:$0xff]  }
 0x41e   : > { %8169 = vmatpush2.bf16.msra.mxu0 %v10318_v11  ;;  %v10351_v11 = vld [vmem:[#allocation8 + $0xee8] ss:$16 sps:$4 sm:$0xff]  }
 0x41f   : > { %8170 = vmatprep.subr.bf16.mxu0 %v10326_v16 }
 0x420   : > { %8220 = vmatpush2.bf16.msra.mxu1 %v10321_v42 }
 0x421   : > { %8221 = vmatprep.subr.bf16.mxu1 %v10329_v52  ;;  %v7830_v52 = vadd.f32 %v11332_v44, %v7779_v12 }
 0x422   : > { %8171 = vmatpush2.bf16.msra.mxu0 %v10324_v49  ;;  %v10354_v49 = vld [vmem:[#allocation8 + $0xcc8] ss:$16 sps:$4 sm:$0xff]  }
 0x423   : > { %8172 = vmatprep.subr.bf16.mxu0 %v10332_v19  ;;  %v10362_v19 = vld [vmem:[#allocation8 + $0xcac] ss:$16 sps:$4 sm:$0xff]  }
 0x424   : > { %8222 = vmatpush2.bf16.msra.mxu1 %v10327_v55  ;;  %v10357_v55 = vld [vmem:[#allocation8 + $0xec8] ss:$16 sps:$4 sm:$0xff]  }
 0x425   : > { %8223 = vmatprep.subr.bf16.mxu1 %v10335_v33 }
 0x426   : > { %8173 = vmatpush2.bf16.msra.mxu0 %v10330_v50 }
 0x427   : > { %8174 = vmatprep.subr.bf16.mxu0 %v10338_v46 }
 0x428   : > { %8224 = vmatpush2.bf16.msra.mxu1 %v10333_v8  ;;  %v7836_v8 = vadd.f32 %v11342_v30, %v7785_v22  ;;  %v10393_v22 = vld [vmem:[#allocation8 + $0xe08] ss:$16 sps:$4 sm:$0xff]  }
 0x429   : > { %8225 = vmatprep.subr.bf16.mxu1 %v10341_v26 }
 0x42a   : > { %8175 = vmatpush2.bf16.msra.mxu0 %v10336_v18 }
 0x42b   : > { %8176 = vmatprep.subr.bf16.mxu0 %v10344_v28  ;;  %v10360_v28 = vld [vmem:[#allocation8 + $0xca8] ss:$16 sps:$4 sm:$0xff]  }
 0x42c   : > { %8226 = vmatpush2.bf16.msra.mxu1 %v10339_v21 }
 0x42d   : > { %8227 = vmatprep.subr.bf16.mxu1 %v10347_v56  ;;  %v10363_v56 = vld [vmem:[#allocation8 + $0xea8] ss:$16 sps:$4 sm:$0xff]  }
 0x42e   : > { %8177 = vmatpush2.bf16.msra.mxu0 %v10342_v48  ;;  %v10368_v48 = vld [vmem:[#allocation8 + $0xc8c] ss:$16 sps:$4 sm:$0xff]  }
 0x42f   : > { %8248 = vmatprep.subr.bf16.mxu0 %v10350_v58 }
 0x430   : > { %8228 = vmatpush2.bf16.msra.mxu1 %v10345_v31  ;;  %v10371_v31 = vld [vmem:[#allocation8 + $0xe8c] ss:$16 sps:$4 sm:$0xff]  }
 0x431   : > { %v7874_v41 = vpop.f32.mrf.mxu0  ;;  %8299 = vmatprep.subr.bf16.mxu1 %v10353_v1  ;;  %8179 = vmatmul.mubr.bf16.vlgmr.msra.gmra.mxu0 %v11093_v57 }
 0x432   : > { %v7875_v27 = vadd.f32 %v7874_v41, %v7824_v60  ;;  %8188 = vmatprep.mubr.bf16.mxu0 %v11204_v53  ;;  %8249 = vmatpush1.bf16.msra.mxu0 %v10348_v47  ;;  %v7834_v53 = vadd.f32 %v11336_v51, %v7783_v14  ;;  %v10372_v47 = vld [vmem:[#allocation8 + $0xc68] ss:$16 sps:$4 sm:$0xff]   ;;  %v10389_v14 = vld [vmem:[#allocation8 + $0xe2c] ss:$16 sps:$4 sm:$0xff]  }
 0x433   : > { %v7925_v59 = vpop.f32.mrf.mxu1  ;;  %v7876_v32 = vpop.f32.mrf.mxu0  ;;  %8230 = vmatmul.mubr.bf16.vlgmr.msra.gmra.mxu1 %v11136_v9  ;;  %8250 = vmatprep.subr.bf16.mxu0 %v10356_v20  ;;  %v10381_v20 = vld [vmem:[#allocation8 + $0xe48] ss:$16 sps:$4 sm:$0xff]  }
 0x434   : > { %v7926_v42 = vadd.f32 %v7925_v59, %v7875_v27  ;;  %v7877_v23 = vadd.f32 %v7876_v32, %v7826_v4  ;;  %8239 = vmatprep.mubr.bf16.mxu1 %v11209_v62  ;;  %8300 = vmatpush1.bf16.msra.mxu1 %v10351_v11  ;;  %v10366_v4 = vld [vmem:[#allocation8 + $0xc88] ss:$16 sps:$4 sm:$0xff]   ;;  %v10374_v27 = vld [vmem:[#allocation8 + $0xc6c] ss:$16 sps:$4 sm:$0xff]  }
 0x435   : > { %v7927_v16 = vpop.f32.mrf.mxu1  ;;  %v7878_v24 = vpop.f32.mrf.mxu0  ;;  %8301 = vmatprep.subr.bf16.mxu1 %v10359_v54  ;;  %v10377_v59 = vld [vmem:[#allocation8 + $0xe6c] ss:$16 sps:$4 sm:$0xff]   ;;  %v10378_v32 = vld [vmem:[#allocation8 + $0xc48] ss:$16 sps:$4 sm:$0xff]  }
 0x436   : > { %v8350_v35 = vadd.f32 %v7926_v42, %v11359_v43  ;;  %v7928_v57 = vadd.f32 %v7927_v16, %v7877_v23  ;;  %v7879_v34 = vadd.f32 %v7878_v24, %v7828_v63  ;;  %8251 = vmatpush1.bf16.msra.mxu0 %v10354_v49  ;;  %v10380_v11 = vld [vmem:[#allocation8 + $0xc4c] ss:$16 sps:$4 sm:$0xff]   ;;  %v10387_v42 = vld [vmem:[#allocation8 + $0xe28] ss:$16 sps:$4 sm:$0xff]  }
 0x437   : > { %v7929_v9 = vpop.f32.mrf.mxu1  ;;  %v7880_v44 = vpop.f32.mrf.mxu0  ;;  %8252 = vmatprep.subr.bf16.mxu0 %v10362_v19  ;;  %v10383_v63 = vld [vmem:[#allocation8 + $0xe4c] ss:$16 sps:$4 sm:$0xff]  }
 0x438   : > { %8362 = vst [vmem:[%s11380_s26] sm:$0xff] %v8350_v35  ;;  %v8351_v62 = vadd.f32 %v7928_v57, %v11364_v39  ;;  %v7930_v36 = vadd.f32 %v7929_v9, %v7879_v34  ;;  %v7881_v33 = vadd.f32 %v7880_v44, %v7830_v52  ;;  %8302 = vmatpush1.bf16.msra.mxu1 %v10357_v55  ;;  %v10386_v54 = vld [vmem:[#allocation8 + $0xc2c] ss:$16 sps:$4 sm:$0xff]   ;;  %v10390_v52 = vld [vmem:[#allocation8 + $0xc08] ss:$16 sps:$4 sm:$0xff]  }
 0x439   : > { %v7931_v50 = vpop.f32.mrf.mxu1  ;;  %v7884_v46 = vpop.f32.mrf.mxu0  ;;  %8303 = vmatprep.subr.bf16.mxu1 %v10365_v25  ;;  %8189 = vmatmul.mubr.bf16.gmra.mxu0 %v11224_v40  ;;  %v10369_v40 = vld [vmem:[#allocation8 + $0xe88] ss:$16 sps:$4 sm:$0xff]   ;;  %v10392_v23 = vld [vmem:[#allocation8 + $0xc0c] ss:$16 sps:$4 sm:$0xff]  }
 0x43a   : > { %8363 = vst [vmem:[%s11380_s26 + $0x8] sm:$0xff] %v8351_v62  ;;  %v8354_v26 = vadd.f32 %v7930_v36, %v11359_v43  ;;  %v7932_v51 = vadd.f32 %v7931_v50, %v7881_v33  ;;  %v7885_v18 = vadd.f32 %v7884_v46, %v7834_v53  ;;  %8280 = vmatprep.mubr.bf16.mxu0 %v11230_v6  ;;  %v10395_v16 = vld [vmem:[#allocation8 + $0xe0c] ss:$16 sps:$4 sm:$0xff]   ;;  %v10396_v57 = vld [vmem:[#allocation8 + $0xde8] ss:$16 sps:$4 sm:$0xff]  }
 0x43b   : > { %v7935_v21 = vpop.f32.mrf.mxu1  ;;  %v7886_v0 = vpop.f32.mrf.mxu0  ;;  %8240 = vmatmul.mubr.bf16.gmra.mxu1 %v11228_v13  ;;  %8253 = vmatpush1.bf16.msra.mxu0 %v10360_v28  ;;  %v10398_v24 = vld [vmem:[#allocation8 + $0xdec] ss:$16 sps:$4 sm:$0xff]   ;;  %v10399_v34 = vld [vmem:[#allocation8 + $0xfe8] ss:$16 sps:$4 sm:$0xff]  }
 0x43c   : > { %8366 = vst [vmem:[%s11380_s26 + $0x20] sm:$0xff] %v8354_v26  ;;  %v8355_v30 = vadd.f32 %v7932_v51, %v11364_v39  ;;  %v7936_v2 = vadd.f32 %v7935_v21, %v7885_v18  ;;  %v7887_v58 = vadd.f32 %v7886_v0, %v7836_v8  ;;  %8331 = vmatprep.mubr.bf16.mxu1 %v11241_v29  ;;  %v10401_v35 = vld [vmem:[#allocation8 + $0xfec] ss:$16 sps:$4 sm:$0xff]   ;;  %v10402_v55 = vld [vmem:[#allocation8 + $0xdc8] ss:$16 sps:$4 sm:$0xff]  }
 0x43d   : > { %v7937_v1 = vpop.f32.mrf.mxu1  ;;  %v7888_v3 = vpop.f32.mrf.mxu0  ;;  %8304 = vmatpush1.bf16.msra.mxu1 %v10363_v56  ;;  %8254 = vmatprep.subr.bf16.mxu0 %v10368_v48  ;;  %v10404_v9 = vld [vmem:[#allocation8 + $0xdcc] ss:$16 sps:$4 sm:$0xff]   ;;  %v10405_v44 = vld [vmem:[#allocation8 + $0xfc8] ss:$16 sps:$4 sm:$0xff]  }
 0x43e   : > { %8367 = vst [vmem:[%s11380_s26 + $0x28] sm:$0xff] %v8355_v30  ;;  %v8358_v60 = vadd.f32 %v7936_v2, %v11359_v43  ;;  %v7938_v12 = vadd.f32 %v7937_v1, %v7887_v58  ;;  %8305 = vmatprep.subr.bf16.mxu1 %v10371_v31  ;;  %v10375_v43 = vld [vmem:[#allocation8 + $0xe68] ss:$16 sps:$4 sm:$0xff]   ;;  %v10407_v49 = vld [vmem:[#allocation8 + $0xfcc] ss:$16 sps:$4 sm:$0xff]  }
 0x43f   : > { %v7939_v41 = vpop.f32.mrf.mxu1  ;;  %v7889_v13 = vpop.f32.mrf.mxu0  ;;  %8255 = vmatpush1.bf16.msra.mxu0 %v10366_v4  ;;  %v10410_v19 = vld [vmem:[#allocation8 + $0xdac] ss:$16 sps:$4 sm:$0xff]   ;;  %v10408_v53 = vld [vmem:[#allocation8 + $0xda8] ss:$16 sps:$4 sm:$0xff]  }
 0x440   : > { %8370 = vst [vmem:[%s11380_s26 + $0x40] sm:$0xff] %v8358_v60  ;;  %v8359_v6 = vadd.f32 %v7938_v12, %v11364_v39  ;;  %8256 = vmatprep.subr.bf16.mxu0 %v10374_v27  ;;  %v10384_v39 = vld [vmem:[#allocation8 + $0xc28] ss:$16 sps:$4 sm:$0xff]   ;;  %v10413_v25 = vld [vmem:[#allocation8 + $0xfac] ss:$16 sps:$4 sm:$0xff]  }
 0x441   : > { %v7940_v29 = vpop.f32.mrf.mxu1  ;;  %8306 = vmatpush1.bf16.msra.mxu1 %v10369_v40  ;;  %v10411_v62 = vld [vmem:[#allocation8 + $0xfa8] ss:$16 sps:$4 sm:$0xff]   ;;  %v10416_v36 = vld [vmem:[#allocation8 + $0xd8c] ss:$16 sps:$4 sm:$0xff]  }
 0x442   : > { %8371 = vst [vmem:[%s11380_s26 + $0x48] sm:$0xff] %v8359_v6  ;;  %8307 = vmatprep.subr.bf16.mxu1 %v10377_v59  ;;  %v10419_v33 = vld [vmem:[#allocation8 + $0xf8c] ss:$16 sps:$4 sm:$0xff]   ;;  %v10414_v50 = vld [vmem:[#allocation8 + $0xd88] ss:$16 sps:$4 sm:$0xff]  }
 0x443   : > { %8257 = vmatpush1.bf16.msra.mxu0 %v10372_v47  ;;  %v10417_v8 = vld [vmem:[#allocation8 + $0xf88] ss:$16 sps:$4 sm:$0xff]   ;;  %v10422_v46 = vld [vmem:[#allocation8 + $0xd6c] ss:$16 sps:$4 sm:$0xff]  }
 0x444   : > { %8258 = vmatprep.subr.bf16.mxu0 %v10380_v11  ;;  %v10425_v26 = vld [vmem:[#allocation8 + $0xf6c] ss:$16 sps:$4 sm:$0xff]   ;;  %v10420_v51 = vld [vmem:[#allocation8 + $0xd68] ss:$16 sps:$4 sm:$0xff]  }
 0x445   : > { %8308 = vmatpush1.bf16.msra.mxu1 %v10375_v43  ;;  %v10423_v18 = vld [vmem:[#allocation8 + $0xf68] ss:$16 sps:$4 sm:$0xff]   ;;  %v10428_v21 = vld [vmem:[#allocation8 + $0xd4c] ss:$16 sps:$4 sm:$0xff]  }
 0x446   : > { %8309 = vmatprep.subr.bf16.mxu1 %v10383_v63  ;;  %v10431_v28 = vld [vmem:[#allocation8 + $0xf4c] ss:$16 sps:$4 sm:$0xff]   ;;  %v10426_v56 = vld [vmem:[#allocation8 + $0xd48] ss:$16 sps:$4 sm:$0xff]  }
 0x447   : > { %8259 = vmatpush1.bf16.msra.mxu0 %v10378_v32  ;;  %v10429_v0 = vld [vmem:[#allocation8 + $0xf48] ss:$16 sps:$4 sm:$0xff]   ;;  %v10434_v48 = vld [vmem:[#allocation8 + $0xd2c] ss:$16 sps:$4 sm:$0xff]  }
 0x448   : > { %8260 = vmatprep.subr.bf16.mxu0 %v10386_v54  ;;  %v10437_v31 = vld [vmem:[#allocation8 + $0xf2c] ss:$16 sps:$4 sm:$0xff]   ;;  %v10432_v30 = vld [vmem:[#allocation8 + $0xd28] ss:$16 sps:$4 sm:$0xff]  }
 0x449   : > { %8310 = vmatpush1.bf16.msra.mxu1 %v10381_v20  ;;  %v10435_v2 = vld [vmem:[#allocation8 + $0xf28] ss:$16 sps:$4 sm:$0xff]   ;;  %v10440_v58 = vld [vmem:[#allocation8 + $0xd0c] ss:$16 sps:$4 sm:$0xff]  }
 0x44a   : > { %8311 = vmatprep.subr.bf16.mxu1 %v10389_v14  ;;  %v10443_v1 = vld [vmem:[#allocation8 + $0xf0c] ss:$16 sps:$4 sm:$0xff]   ;;  %v10438_v3 = vld [vmem:[#allocation8 + $0xd08] ss:$16 sps:$4 sm:$0xff]  }
 0x44b   : > { %8261 = vmatpush1.bf16.msra.mxu0 %v10384_v39  ;;  %v10441_v60 = vld [vmem:[#allocation8 + $0xf08] ss:$16 sps:$4 sm:$0xff]  }
 0x44c   : > { %8262 = vmatprep.subr.bf16.mxu0 %v10392_v23 }
 0x44d   : > { %8312 = vmatpush1.bf16.msra.mxu1 %v10387_v42 }
 0x44e   : > { %8313 = vmatprep.subr.bf16.mxu1 %v10395_v16 }
 0x44f   : > { %8263 = vmatpush1.bf16.msra.mxu0 %v10390_v52 }
 0x450   : > { %8264 = vmatprep.subr.bf16.mxu0 %v10398_v24 }
 0x451   : > { %8314 = vmatpush1.bf16.msra.mxu1 %v10393_v22 }
 0x452   : > { %8315 = vmatprep.subr.bf16.mxu1 %v10401_v35 }
 0x453   : > { %8265 = vmatpush2.bf16.msra.mxu0 %v10396_v57 }
 0x454   : > { %8266 = vmatprep.subr.bf16.mxu0 %v10404_v9 }
 0x455   : > { %8316 = vmatpush2.bf16.msra.mxu1 %v10399_v34 }
 0x456   : > { %8317 = vmatprep.subr.bf16.mxu1 %v10407_v49 }
 0x457   : > { %8267 = vmatpush2.bf16.msra.mxu0 %v10402_v55 }
 0x458   : > { %8268 = vmatprep.subr.bf16.mxu0 %v10410_v19 }
 0x459   : > { %8318 = vmatpush2.bf16.msra.mxu1 %v10405_v44 }
 0x45a   : > { %8319 = vmatprep.subr.bf16.mxu1 %v10413_v25 }
 0x45b   : > { %8269 = vmatpush2.bf16.msra.mxu0 %v10408_v53 }
 0x45c   : > { %8270 = vmatprep.subr.bf16.mxu0 %v10416_v36 }
 0x45d   : > { %8320 = vmatpush2.bf16.msra.mxu1 %v10411_v62 }
 0x45e   : > { %8321 = vmatprep.subr.bf16.mxu1 %v10419_v33 }
 0x45f   : > { %8271 = vmatpush2.bf16.msra.mxu0 %v10414_v50 }
 0x460   : > { %8272 = vmatprep.subr.bf16.mxu0 %v10422_v46 }
 0x461   : > { %8322 = vmatpush2.bf16.msra.mxu1 %v10417_v8 }
 0x462   : > { %8323 = vmatprep.subr.bf16.mxu1 %v10425_v26 }
 0x463   : > { %8273 = vmatpush2.bf16.msra.mxu0 %v10420_v51 }
 0x464   : > { %8274 = vmatprep.subr.bf16.mxu0 %v10428_v21 }
 0x465   : > { %8324 = vmatpush2.bf16.msra.mxu1 %v10423_v18 }
 0x466   : > { %8325 = vmatprep.subr.bf16.mxu1 %v10431_v28 }
 0x467   : > { %8275 = vmatpush2.bf16.msra.mxu0 %v10426_v56 }
 0x468   : > { %8276 = vmatprep.subr.bf16.mxu0 %v10434_v48 }
 0x469   : > { %8326 = vmatpush2.bf16.msra.mxu1 %v10429_v0 }
 0x46a   : > { %8327 = vmatprep.subr.bf16.mxu1 %v10437_v31 }
 0x46b   : > { %8277 = vmatpush2.bf16.msra.mxu0 %v10432_v30 }
 0x46c   : > { %8278 = vmatprep.subr.bf16.mxu0 %v10440_v58 }
 0x46d   : > { %8328 = vmatpush2.bf16.msra.mxu1 %v10435_v2 }
 0x46e   : > { %8329 = vmatprep.subr.bf16.mxu1 %v10443_v1 }
 0x46f   : > { %8279 = vmatpush2.bf16.msra.mxu0 %v10438_v3 }
 0x471   : > { %8330 = vmatpush2.bf16.msra.mxu1 %v10441_v60  ;;  %v7976_v12 = vpop.f32.mrf.mxu0 }
 0x472   : > { %8281 = vmatmul.mubr.bf16.vlgmr.msra.gmra.mxu0 %v11183_v5 }
 0x473   : > { %v8027_v41 = vpop.f32.mrf.mxu1  ;;  %v7978_v40 = vpop.f32.mrf.mxu0  ;;  %8290 = vmatprep.mubr.bf16.mxu0 %v11256_v37 }
 0x474   : > { %v8028_v4 = vadd.f32 %v8027_v41, %v7976_v12  ;;  %8332 = vmatmul.mubr.bf16.vlgmr.msra.gmra.mxu1 %v11258_v61 }
 0x475   : > { %v8029_v13 = vpop.f32.mrf.mxu1  ;;  %8341 = vmatprep.mubr.bf16.mxu1 %v11261_v15  ;;  %v7980_v59 = vpop.f32.mrf.mxu0 }
 0x476   : > { %v8030_v27 = vadd.f32 %v8029_v13, %v7978_v40 }
 0x477   : > { %v8031_v6 = vpop.f32.mrf.mxu1  ;;  %v7982_v47 = vpop.f32.mrf.mxu0 }
 0x478   : > { %v8032_v29 = vadd.f32 %v8031_v6, %v7980_v59 }
 0x479   : > { %v8033_v43 = vpop.f32.mrf.mxu1  ;;  %v7986_v63 = vpop.f32.mrf.mxu0 }
 0x47a   : > { %v8034_v11 = vadd.f32 %v8033_v43, %v7982_v47  ;;  %8291 = vmatmul.mubr.bf16.gmra.mxu0 %v11276_v10 }
 0x47b   : > { %v8037_v32 = vpop.f32.mrf.mxu1  ;;  %v7988_v54 = vpop.f32.mrf.mxu0 }
 0x47c   : > { %v8038_v20 = vadd.f32 %v8037_v32, %v7986_v63  ;;  %8342 = vmatmul.mubr.bf16.gmra.mxu1 %v11278_v7  ;;  %v357_v63 = vrot.slane %v11350_v17, %v10961_v38 }
 0x47d   : > { %v8039_v14 = vpop.f32.mrf.mxu1  ;;  %v7990_v61 = vpop.f32.mrf.mxu0 }
 0x47e   : > { %v8040_v5 = vadd.f32 %v8039_v14, %v7988_v54  ;;  %v361_v54 = vrot.slane %v11350_v17, %v10964_v45 }
 0x47f   : > { %v8041_v37 = vpop.f32.mrf.mxu1  ;;  %v7991_v39 = vpop.f32.mrf.mxu0 }
 0x481   : > { %v8042_v15 = vpop.f32.mrf.mxu1 }
 0x4b1   : > { %v8078_v42 = vpop.f32.mrf.mxu0 }
 0x4b2   : > { %v8079_v16 = vadd.f32 %v8078_v42, %v8028_v4 }
 0x4b3   : > { %v8129_v23 = vpop.f32.mrf.mxu1  ;;  %v8080_v52 = vpop.f32.mrf.mxu0 }
 0x4b4   : > { %v8130_v24 = vadd.f32 %v8129_v23, %v8079_v16  ;;  %v8081_v35 = vadd.f32 %v8080_v52, %v8030_v27 }
 0x4b5   : > { %v8131_v22 = vpop.f32.mrf.mxu1  ;;  %v8082_v57 = vpop.f32.mrf.mxu0 }
 0x4b6   : > { %v8132_v9 = vadd.f32 %v8131_v22, %v8081_v35  ;;  %v8083_v49 = vadd.f32 %v8082_v57, %v8032_v29 }
 0x4b7   : > { %v8133_v34 = vpop.f32.mrf.mxu1  ;;  %v8084_v55 = vpop.f32.mrf.mxu0 }
 0x4b8   : > { %v8134_v44 = vadd.f32 %v8133_v34, %v8083_v49  ;;  %v8085_v7 = vadd.f32 %v8084_v55, %v8034_v11 }
 0x4b9   : > { %v8135_v10 = vpop.f32.mrf.mxu1  ;;  %v8088_v19 = vpop.f32.mrf.mxu0 }
 0x4ba   : > { %v8136_v53 = vadd.f32 %v8135_v10, %v8085_v7  ;;  %v8089_v62 = vadd.f32 %v8088_v19, %v8038_v20 }
 0x4bb   : > { %v8139_v25 = vpop.f32.mrf.mxu1  ;;  %v8090_v36 = vpop.f32.mrf.mxu0 }
 0x4bc   : > { %v8140_v50 = vadd.f32 %v8139_v25, %v8089_v62  ;;  %v8091_v8 = vadd.f32 %v8090_v36, %v8040_v5 }
 0x4bd   : > { %v8141_v33 = vpop.f32.mrf.mxu1  ;;  %v8092_v46 = vpop.f32.mrf.mxu0 }
 0x4be   : > { %v8142_v51 = vadd.f32 %v8141_v33, %v8091_v8 }
 0x4bf   : > { %v8143_v26 = vpop.f32.mrf.mxu1  ;;  %v8093_v18 = vpop.f32.mrf.mxu0 }
 0x4c1   : > { %v8144_v21 = vpop.f32.mrf.mxu1 }
 0x4f1   : > { %v8180_v28 = vpop.f32.mrf.mxu0 }
 0x4f2   : > { %v8181_v27 = vadd.f32 %v8180_v28, %v8130_v24 }
 0x4f3   : > { %v8231_v56 = vpop.f32.mrf.mxu1  ;;  %v8182_v0 = vpop.f32.mrf.mxu0 }
 0x4f4   : > { %v8183_v59 = vadd.f32 %v8182_v0, %v8132_v9  ;;  %v8232_v6 = vadd.f32 %v8231_v56, %v8181_v27 }
 0x4f5   : > { %v8233_v48 = vpop.f32.mrf.mxu1  ;;  %v8184_v31 = vpop.f32.mrf.mxu0 }
 0x4f6   : > { %v8185_v29 = vadd.f32 %v8184_v31, %v8134_v44  ;;  %v8234_v32 = vadd.f32 %v8233_v48, %v8183_v59 }
 0x4f7   : > { %v8235_v30 = vpop.f32.mrf.mxu1  ;;  %v8186_v2 = vpop.f32.mrf.mxu0 }
 0x4f8   : > { %v8187_v47 = vadd.f32 %v8186_v2, %v8136_v53  ;;  %v8236_v61 = vadd.f32 %v8235_v30, %v8185_v29 }
 0x4f9   : > { %v8237_v58 = vpop.f32.mrf.mxu1  ;;  %v8190_v1 = vpop.f32.mrf.mxu0 }
 0x4fa   : > { %v8191_v37 = vadd.f32 %v8190_v1, %v8140_v50  ;;  %v8238_v42 = vadd.f32 %v8237_v58, %v8187_v47 }
 0x4fb   : > { %v8241_v3 = vpop.f32.mrf.mxu1  ;;  %v8192_v60 = vpop.f32.mrf.mxu0 }
 0x4fc   : > { %v8193_v52 = vadd.f32 %v8192_v60, %v8142_v51  ;;  %v8242_v45 = vadd.f32 %v8241_v3, %v8191_v37 }
 0x4fd   : > { %v8243_v12 = vpop.f32.mrf.mxu1  ;;  %v8194_v41 = vpop.f32.mrf.mxu0 }
 0x4fe   : > { %v8244_v10 = vadd.f32 %v8243_v12, %v8193_v52 }
 0x4ff   : > { %v8245_v4 = vpop.f32.mrf.mxu1  ;;  %v8195_v40 = vpop.f32.mrf.mxu0 }
 0x501   : > { %v8246_v13 = vpop.f32.mrf.mxu1 }
 0x532   : > { %v8282_v43 = vpop.f32.mrf.mxu0 }
 0x533   : > { %v8283_v20 = vadd.f32 %v8282_v43, %v8232_v6 }
 0x534   : > { %v8333_v11 = vpop.f32.mrf.mxu1  ;;  %v8284_v14 = vpop.f32.mrf.mxu0 }
 0x535   : > { %v8334_v39 = vadd.f32 %v8333_v11, %v8283_v20  ;;  %v8285_v15 = vadd.f32 %v8284_v14, %v8234_v32 }
 0x536   : > { %v8335_v5 = vpop.f32.mrf.mxu1  ;;  %v8286_v23 = vpop.f32.mrf.mxu0 }
 0x537   : > { %v8352_v22 = vadd.f32 %v8334_v39, %v357_v63  ;;  %v8336_v24 = vadd.f32 %v8335_v5, %v8285_v15  ;;  %v8287_v38 = vadd.f32 %v8286_v23, %v8236_v61 }
 0x538   : > { %v8337_v16 = vpop.f32.mrf.mxu1  ;;  %v8288_v35 = vpop.f32.mrf.mxu0 }
 0x539   : > { %8364 = vst [vmem:[%s11380_s26 + $0x10] sm:$0xff] %v8352_v22  ;;  %v8353_v17 = vadd.f32 %v8336_v24, %v361_v54  ;;  %v8338_v34 = vadd.f32 %v8337_v16, %v8287_v38  ;;  %v8289_v9 = vadd.f32 %v8288_v35, %v8238_v42 }
 0x53a   : > { %v8339_v57 = vpop.f32.mrf.mxu1  ;;  %v8292_v49 = vpop.f32.mrf.mxu0 }
 0x53b   : > { %8365 = vst [vmem:[%s11380_s26 + $0x18] sm:$0xff] %v8353_v17  ;;  %v8356_v44 = vadd.f32 %v8338_v34, %v357_v63  ;;  %v8340_v7 = vadd.f32 %v8339_v57, %v8289_v9  ;;  %v8293_v19 = vadd.f32 %v8292_v49, %v8242_v45 }
 0x53c   : > { %v8343_v55 = vpop.f32.mrf.mxu1  ;;  %v8294_v25 = vpop.f32.mrf.mxu0 }
 0x53d   : > { %8368 = vst [vmem:[%s11380_s26 + $0x30] sm:$0xff] %v8356_v44  ;;  %v8357_v62 = vadd.f32 %v8340_v7, %v361_v54  ;;  %v8344_v36 = vadd.f32 %v8343_v55, %v8293_v19  ;;  %v8295_v33 = vadd.f32 %v8294_v25, %v8244_v10 }
 0x53e   : > { %v8345_v53 = vpop.f32.mrf.mxu1  ;;  %v8296_v50 = vpop.f32.mrf.mxu0 }
 0x53f   : > { %8369 = vst [vmem:[%s11380_s26 + $0x38] sm:$0xff] %v8357_v62  ;;  %v8360_v46 = vadd.f32 %v8344_v36, %v357_v63  ;;  %v8346_v26 = vadd.f32 %v8345_v53, %v8295_v33 }
 0x540   : > { %v8347_v8 = vpop.f32.mrf.mxu1  ;;  %v8297_v51 = vpop.f32.mrf.mxu0 }
 0x541   : > { %8372 = vst [vmem:[%s11380_s26 + $0x50] sm:$0xff] %v8360_v46  ;;  %v8361_v21 = vadd.f32 %v8346_v26, %v361_v54 }
 0x542   : > { %v8348_v18 = vpop.f32.mrf.mxu1 }
 0x543   : > { %8373 = vst [vmem:[%s11380_s26 + $0x58] sm:$0xff] %v8361_v21 }
 0x544   : > { %10591 = shalt.err (!%p10588_p1)
}
 0x545   : > { %s10592_s25 = scalar_lea.hbm %s11417_s15, 1536  ;;  %s10596_s1 = scalar_lea.hbm %s11474_s5, 3072 }
 0x546   : > { %p10593_p2 = scmp.ne.s32.totalorder %s11417_s15, %s10592_s25  ;;  %p10597_p4 = scmp.lt.s32.totalorder %s11417_s15, %s11474_s5 }
 0x547   : > { %p10598_p3 = scmp.lt.s32.totalorder %s10596_s1, %s10592_s25 }
 0x548   : > { %p10594_p8 = pnand %p10593_p2, %p10823_p9 }
 0x549   : > { %p10599_p7 = por %p10598_p3, %p10597_p4 }
 0x54a   : > { %p10595_p12 = pneg %p10594_p8 }
 0x54c   : > { %p10600_p13 = pnand %p10599_p7, %p10595_p12 }
 0x54e   : > { %10603 = shalt.err (!%p10600_p13)
}
 0x54f   : > { %s10680_s26 = smov 512   ;;  %s10681_s28 = smov 32  }
 0x550   : > { %9583 = dma.vmem_to_hbm [thread:$0]  (%p10823_p9), %s11419_s30, 1536, %s11417_s15, %s8375_s21, %s10680_s26, %s10680_s26, %s10681_s28  }
 0x551 PF: > { %s8404_s11 = sand.u32 1, %s10646_s18   ;;  %p11501_p11 = scmp.ne.s32.totalorder %s11487_s29, 0 }
 0x552   : > { %p11502_p0 = scmp.ge.s32.totalorder %s10666_s23, 2  ;;  %s8405_s14 = scalar_lea.sflag [#allocation4], %s8404_s11 }
 0x554   : > { %p9603_p5 = pnand %p11502_p0, %p11501_p11 }
 0x556   : > { %p9604_p10 = pneg %p9603_p5 }
 0x558   : > { %10641 = dma.done.wait (%p9604_p10), %s8405_s14, 1536  }
 0x559   : > { %10643 = vsyncadd (%p9604_p10), %s8405_s14, 4294965760  ;;  %s23_s23 = sadd.s32 1, %s10666_s23   ;;  %s11503_s18 = smov %s10650_s19 }
 0x55a   : > { %p20_p6 = scmp.ge.s32.totalorder %s23_s23, 4   ;;  %s11504_s19 = smov %s10654_s20 }
 0x55b   : > { %s11505_s20 = smov %s10835_s12  ;;  %s11506_s21 = smov %s10662_s22 }
 0x55c   : > { %s11507_s22 = smov %s11509_s24  ;;  %22 = sbr.rel (!%p20_p6) target bundleno = 11 (0xb), region = 108 }
 0x561   :  { %8410 = vsyncpa [#allocation3], 1 }
 0x562   :  { %8412 = vsyncpa [#allocation3 + $0x1], 1 }
 0x563   :  { %8413 = vsyncpa [#allocation6], 1 }
 0x564   :  { %8414 = vsyncpa [#allocation9], 1 }
 0x565   :  { %8415 = vsyncpa [#allocation4], 1 }
 0x566   :  { %8417 = vsyncpa [#allocation4 + $0x1], 1 }

</bundles_post_ra>
